<compile_context>
chip_gen: v7x
topology: tpu7x:2x2x1
jax: 0.10.0
libtpu: 0.0.40
codegen_flags: <defaults>
</compile_context>

<pallas_src>
import math

import jax
import jax.numpy as jnp
from jax.experimental import pallas as pl
from jax.experimental.pallas import tpu as pltpu

# ----------------------------- hyper-parameters -----------------------------
MODEL_DIM = 32
N_HEAD = 4
HEAD_DIM = MODEL_DIM // N_HEAD
DIM_FF = 64
NUM_LAYERS = 2
SRC_VS = 50
TGT_VS = 60
SRC_PAD = 0
TGT_PAD = 0
MAX_LEN = 64
CONV_K = 3
CONV_STRIDES = tuple(range(1, NUM_LAYERS + 1))   # stride=i
CONV_DILS = tuple(range(1, NUM_LAYERS + 1))      # dilation=True branch
VOCAB_PAD = 128                                  # lane-dense padded logits
NEG_INF = -1e9                                   # finite stand-in for -inf
SLAB_LANE = 128                                  # lane width of packed slabs


# ============================ slab layout helpers ============================
def _layout(entries, sub):
    """entries: [(name, (rows, cols))]. Returns {name: (row_off, rows, cols)}, total."""
    offs, r = {}, 0
    for name, (h, w) in entries:
        offs[name] = (r, h, w)
        r += -(-h // sub) * sub          # align each entry's start to `sub` rows
    return offs, r


def _pack_slab(named, offs, total_rows, dtype, lane=SLAB_LANE):
    slab = jnp.zeros((total_rows, lane), dtype)
    for name, (r, h, w) in offs.items():
        slab = slab.at[r:r + h, :w].set(jnp.asarray(named[name], dtype))
    return slab


def _weight_entries():
    D, FF = MODEL_DIM, DIM_FF
    ents = []
    for l in range(NUM_LAYERS):
        ents += [(f"e_w1_{l}", (D, FF)), (f"e_w2_{l}", (FF, D)),
                 (f"pw_w_{l}", (D, D)),
                 (f"sa_wqkv_{l}", (D, 3 * D)), (f"sa_wo_{l}", (D, D)),
                 (f"ca_wq_{l}", (D, D)), (f"ca_wkv_{l}", (D, 2 * D)),
                 (f"ca_wo_{l}", (D, D)),
                 (f"d_w1_{l}", (D, FF)), (f"d_w2_{l}", (FF, D))]
    ents += [("out_w", (D, VOCAB_PAD))]
    return ents


def _fvec_entries():
    D, FF = MODEL_DIM, DIM_FF
    ents = []
    for l in range(NUM_LAYERS):
        ents += [(f"e_ln1_g_{l}", (1, D)), (f"e_ln1_b_{l}", (1, D)),
                 (f"e_ln2_g_{l}", (1, D)), (f"e_ln2_b_{l}", (1, D)),
                 (f"e_b1_{l}", (1, FF)), (f"e_b2_{l}", (1, D)),
                 (f"dw_w_{l}", (CONV_K, D)), (f"dw_b_{l}", (1, D)),
                 (f"pw_b_{l}", (1, D)),
                 (f"sa_bqkv_{l}", (1, 3 * D)), (f"sa_bo_{l}", (1, D)),
                 (f"ca_bq_{l}", (1, D)), (f"ca_bkv_{l}", (1, 2 * D)),
                 (f"ca_bo_{l}", (1, D)),
                 (f"d_ln1_g_{l}", (1, D)), (f"d_ln1_b_{l}", (1, D)),
                 (f"d_ln2_g_{l}", (1, D)), (f"d_ln2_b_{l}", (1, D)),
                 (f"d_ln3_g_{l}", (1, D)), (f"d_ln3_b_{l}", (1, D)),
                 (f"d_b1_{l}", (1, FF)), (f"d_b2_{l}", (1, D))]
    ents += [("out_b", (1, VOCAB_PAD))]
    return ents


WOFF, WROWS = _layout(_weight_entries(), 16)   # bf16 slab: 16-row (sublane) alignment
FOFF, FROWS = _layout(_fvec_entries(), 8)      # f32  slab: 8-row alignment


# ============================ constant builders ==============================
def dft_cos_sin(n):
    idx = jnp.arange(n, dtype=jnp.float32)
    ang = 2.0 * jnp.pi * jnp.outer(idx, idx) / float(n)
    return jnp.cos(ang), jnp.sin(ang)


def conv_selcat(S, B, k_size, stride, dilation):
    """0/1 selection realizing a 'same'-padded strided/dilated depthwise conv.

    Returns ([sel_0 | sel_1 | ... ], L_out): block-diagonal over the batch and
    concatenated over taps, so all K taps become ONE matmul in the kernel.
    """
    pad = (k_size // 2) * dilation
    l_out = (S + 2 * pad - dilation * (k_size - 1) - 1) // stride + 1
    i = jnp.arange(l_out)[:, None]
    j = jnp.arange(S)[None, :]
    eye_b = jnp.eye(B, dtype=jnp.float32)
    taps = []
    for k in range(k_size):
        src = i * stride + k * dilation - pad
        sel = ((src == j) & (src >= 0) & (src < S)).astype(jnp.float32)  # (L_out, S)
        taps.append(jnp.kron(eye_b, sel))                                # (B*L_out, B*S)
    return jnp.concatenate(taps, axis=1), l_out


def head_rmask(nk):
    """(N_HEAD*nk, D) 0/1 mask: row h*nk+j is nonzero only on head h's feature slice."""
    heads = jnp.arange(N_HEAD * nk) // nk
    dh = jnp.arange(MODEL_DIM) // HEAD_DIM
    return (heads[:, None] == dh[None, :]).astype(jnp.float32)


def cross_bias(B, T, Lm):
    """(B*T, N_HEAD*B*Lm) additive bias blocking cross-batch attention only."""
    same = (jnp.arange(B)[:, None, None, None] == jnp.arange(B)[None, None, :, None])
    blk = jnp.where(same, 0.0, NEG_INF)
    blk = jnp.broadcast_to(blk, (B, T, B, Lm)).reshape(B * T, B * Lm)
    return jnp.tile(blk, (1, N_HEAD)).astype(jnp.float32)


def self_bias(tgt):
    """Causal + key-padding + cross-batch-blocking bias, tiled over heads."""
    B, T = tgt.shape
    q = jnp.arange(T)
    causal = jnp.where(q[None, :] > q[:, None], NEG_INF, 0.0)      # (T,T)
    kpm = jnp.where(tgt == TGT_PAD, NEG_INF, 0.0)                  # (B,T)
    per_b = causal[None, :, :] + kpm[:, None, :]                   # (B,T,T)
    same = (jnp.arange(B)[:, None, None, None] == jnp.arange(B)[None, None, :, None])
    full = jnp.where(same, per_b[:, :, None, :], NEG_INF)          # (B,T,B,T)
    return jnp.tile(full.reshape(B * T, B * T), (1, N_HEAD)).astype(jnp.float32)


def triple_embed(tokens, emb):
    # TODO(synk): TripleEmbeddingBlock not provided; word + pos + type sum assumed.
    B, T = tokens.shape
    word = jnp.take(emb["word"], tokens, axis=0)       # gather stays outside the kernel
    pos = emb["pos"][:T][None, :, :]
    typ = emb["typ"][0][None, None, :]
    return (word + pos + typ).astype(jnp.float32)


# ================================== forward ==================================
@jax.jit
def forward(emb, wslab, fslab, src, tgt):
    B, S = src.shape
    _, T = tgt.shape
    D = MODEL_DIM
    BS, BT = B * S, B * T

    # ---- embeddings (gather outside the kernel), batch folded into rows ----
    enc_x = triple_embed(src, emb["enc"]).reshape(BS, D)
    dec_x = triple_embed(tgt, emb["dec"]).reshape(BT, D)

    # ---- data-dependent self-attention bias (tiny, (B*T, H*B*T)) ----
    sbias = self_bias(tgt)

    # ---- compile-time constants (const-folded under jit) -> one bf16 slab ----
    cs, ss = dft_cos_sin(S)
    eye_b = jnp.eye(B, dtype=jnp.float32)
    csss = jnp.concatenate([jnp.kron(eye_b, cs), jnp.kron(eye_b, ss)], axis=0)
    cd, sd = dft_cos_sin(D)

    sels, louts = [], []
    for l in range(NUM_LAYERS):
        sel, lo = conv_selcat(S, B, CONV_K, CONV_STRIDES[l], CONV_DILS[l])
        sels.append(sel)
        louts.append(lo)

    nk_set = sorted({BT} | {B * lo for lo in louts})
    c_entries = [("csss", csss), ("cd", cd), ("sd", sd)]
    c_entries += [(f"sel_{l}", sels[l]) for l in range(NUM_LAYERS)]
    c_entries += [(f"rmask_{nk}", head_rmask(nk)) for nk in nk_set]
    coff, crows = _layout([(n, a.shape) for n, a in c_entries], 16)
    cslab = _pack_slab(dict(c_entries), coff, crows, jnp.bfloat16)

    xb_entries = [(f"xbias_{l}", cross_bias(B, T, louts[l])) for l in range(NUM_LAYERS)]
    xoff, xrows = _layout([(n, a.shape) for n, a in xb_entries], 8)
    xbias = _pack_slab(dict(xb_entries), xoff, xrows, jnp.float32)

    # ----------------------------- fused kernel -----------------------------
    def kernel(enc_x_ref, dec_x_ref, sbias_ref, xbias_ref,
               wslab_ref, fslab_ref, cslab_ref, o_ref):
        f32, bf16 = jnp.float32, jnp.bfloat16

        def W(name):                     # bf16 weight (pre-cast at pack time)
            r, h, w = WOFF[name]
            return wslab_ref[r:r + h, :w]

        def F(name):                     # f32 bias / LN / depthwise weight
            r, h, w = FOFF[name]
            return fslab_ref[r:r + h, :w]

        def C(name):                     # bf16 constant (DFT / selection / head mask)
            r, h, w = coff[name]
            return cslab_ref[r:r + h, :w]

        def XB(name):                    # f32 cross-attention bias
            r, h, w = xoff[name]
            return xbias_ref[r:r + h, :w]

        def bdot(a, b):                  # bf16 MXU matmul, f32 accumulation
            return jnp.dot(a.astype(bf16), b.astype(bf16),
                           preferred_element_type=f32)

        def layernorm(x, g, b):
            mu = jnp.mean(x, axis=-1, keepdims=True)
            xc = x - mu
            var = jnp.mean(xc * xc, axis=-1, keepdims=True)
            return xc * jax.lax.rsqrt(var + 1e-5) * g + b

        def attention(q, k, v, bias, rmask, wo_name, bo_name, nk):
            # All heads at once: replicate K/V along sublanes and mask to a
            # head-block-diagonal layout.  One NT matmul gives every head's
            # scores; one matmul against the masked V replica gives the
            # context with heads already concatenated in lanes.
            # q is pre-scaled by 1/sqrt(HEAD_DIM) (folded into W_q at pack time).
            krep = jnp.concatenate([k.astype(bf16)] * N_HEAD, axis=0) * rmask
            s = jax.lax.dot_general(q.astype(bf16), krep,
                                    (((1,), (1,)), ((), ())),
                                    preferred_element_type=f32) + bias   # (Nq, H*nk)
            m = jnp.max(s, axis=-1, keepdims=True)       # shared row max (per-head valid)
            e = jnp.exp(s - m)
            p = jnp.concatenate(
                [e[:, h * nk:(h + 1) * nk]
                 / jnp.sum(e[:, h * nk:(h + 1) * nk], axis=-1, keepdims=True)
                 for h in range(N_HEAD)], axis=-1).astype(bf16)          # exact divide
            vrep = jnp.concatenate([v.astype(bf16)] * N_HEAD, axis=0) * rmask
            ctx = jnp.dot(p, vrep, preferred_element_type=f32)          # (Nq, D)
            return bdot(ctx, W(wo_name)) + F(bo_name)

        # ---------------- encoder (FNet mixing = block-diag DFT matmuls) ----
        x = enc_x_ref[...]                       # (B*S, D) f32
        csss_m = C("csss")
        cdm, sdm = C("cd"), C("sd")
        enc_feats = []
        for l in range(NUM_LAYERS):
            t = bdot(csss_m, x)                  # [Cs@x ; Ss@x]  (2BS, D)
            mix = bdot(t[:BS], cdm) - bdot(t[BS:], sdm)        # Re(FFT2(x))
            x = layernorm(x + mix, F(f"e_ln1_g_{l}"), F(f"e_ln1_b_{l}"))
            h = bdot(x, W(f"e_w1_{l}")) + F(f"e_b1_{l}")
            # TODO(synk): FnetEncoderLayer definition not provided; tanh-GELU assumed.
            h = jax.nn.gelu(h, approximate=True)
            h = bdot(h, W(f"e_w2_{l}")) + F(f"e_b2_{l}")
            x = layernorm(x + h, F(f"e_ln2_g_{l}"), F(f"e_ln2_b_{l}"))
            enc_feats.append(x)

        # -------- depthwise-separable convs: all K taps in ONE matmul --------
        mems = []
        for l in range(NUM_LAYERS):
            xe = enc_feats[l]
            dw = F(f"dw_w_{l}")                  # (K, D) f32, per-channel taps
            xdw = jnp.concatenate([xe * dw[k:k + 1, :] for k in range(CONV_K)],
                                  axis=0)        # (K*BS, D)
            y = bdot(C(f"sel_{l}"), xdw) + F(f"dw_b_{l}")      # fused taps
            y = bdot(y, W(f"pw_w_{l}")) + F(f"pw_b_{l}")       # pointwise 1x1 conv
            mems.append(y)                       # (B*L_out_l, D)

        # -------------- transformer decoder stack (post-norm) ---------------
        out = dec_x_ref[...]                     # (B*T, D)
        sb = sbias_ref[...]                      # (B*T, H*B*T)
        for l in range(NUM_LAYERS):
            # self-attention (fused QKV projection, Q pre-scaled)
            qkv = bdot(out, W(f"sa_wqkv_{l}")) + F(f"sa_bqkv_{l}")
            sa = attention(qkv[:, :D], qkv[:, D:2 * D], qkv[:, 2 * D:],
                           sb, C(f"rmask_{BT}"), f"sa_wo_{l}", f"sa_bo_{l}", BT)
            out = layernorm(out + sa, F(f"d_ln1_g_{l}"), F(f"d_ln1_b_{l}"))

            # cross-attention (fused KV projection); no memory mask per reference
            bm = B * louts[l]
            q = bdot(out, W(f"ca_wq_{l}")) + F(f"ca_bq_{l}")
            kv = bdot(mems[l], W(f"ca_wkv_{l}")) + F(f"ca_bkv_{l}")
            ca = attention(q, kv[:, :D], kv[:, D:], XB(f"xbias_{l}"),
                           C(f"rmask_{bm}"), f"ca_wo_{l}", f"ca_bo_{l}", bm)
            out = layernorm(out + ca, F(f"d_ln2_g_{l}"), F(f"d_ln2_b_{l}"))

            # feed-forward (ReLU)
            h = jnp.maximum(bdot(out, W(f"d_w1_{l}")) + F(f"d_b1_{l}"), 0.0)
            h = bdot(h, W(f"d_w2_{l}")) + F(f"d_b2_{l}")
            out = layernorm(out + h, F(f"d_ln3_g_{l}"), F(f"d_ln3_b_{l}"))

        # lane-dense (128-wide, zero-padded) output projection
        o_ref[...] = bdot(out, W("out_w")) + F("out_b")

    inputs = (enc_x, dec_x, sbias, xbias, wslab, fslab, cslab)
    spec2d = lambda a: pl.BlockSpec(a.shape, lambda i: (0, 0))
    logits_pad = pl.pallas_call(
        kernel,
        out_shape=jax.ShapeDtypeStruct((BT, VOCAB_PAD), jnp.float32),
        grid=(1,),                                   # batch folded: one step
        in_specs=[spec2d(a) for a in inputs],
        out_specs=pl.BlockSpec((BT, VOCAB_PAD), lambda i: (0, 0)),
        compiler_params=pltpu.CompilerParams(
            dimension_semantics=("arbitrary",)),
    )(*inputs)

    return logits_pad[:, :TGT_VS].reshape(B, T, TGT_VS)


# ============================== parameter init ===============================
def init_params(key):
    D, FF, L, K = MODEL_DIM, DIM_FF, NUM_LAYERS, CONV_K
    keys = iter(jax.random.split(key, 256))
    nk = lambda: next(keys)

    def xav(shape):
        fan_in, fan_out = shape[-2], shape[-1]
        lim = math.sqrt(6.0 / (fan_in + fan_out))
        return jax.random.uniform(nk(), shape, jnp.float32, -lim, lim)

    def emb(vs):
        return dict(word=xav((vs, D)), pos=xav((MAX_LEN, D)), typ=xav((1, D)))

    ones = lambda n: jnp.ones((1, n), jnp.float32)
    zeros = lambda n: jnp.zeros((1, n), jnp.float32)

    w, f = {}, {}
    for l in range(L):
        w[f"e_w1_{l}"], w[f"e_w2_{l}"] = xav((D, FF)), xav((FF, D))
        w[f"pw_w_{l}"] = xav((D, D))
        w[f"sa_wqkv_{l}"] = jnp.concatenate([xav((D, D)) for _ in range(3)], axis=1)
        w[f"sa_wo_{l}"] = xav((D, D))
        w[f"ca_wq_{l}"] = xav((D, D))
        w[f"ca_wkv_{l}"] = jnp.concatenate([xav((D, D)) for _ in range(2)], axis=1)
        w[f"ca_wo_{l}"] = xav((D, D))
        w[f"d_w1_{l}"], w[f"d_w2_{l}"] = xav((D, FF)), xav((FF, D))

        f[f"e_ln1_g_{l}"], f[f"e_ln1_b_{l}"] = ones(D), zeros(D)
        f[f"e_ln2_g_{l}"], f[f"e_ln2_b_{l}"] = ones(D), zeros(D)
        f[f"e_b1_{l}"], f[f"e_b2_{l}"] = zeros(FF), zeros(D)
        f[f"dw_w_{l}"] = xav((K, D))
        f[f"dw_b_{l}"], f[f"pw_b_{l}"] = zeros(D), zeros(D)
        f[f"sa_bqkv_{l}"], f[f"sa_bo_{l}"] = zeros(3 * D), zeros(D)
        f[f"ca_bq_{l}"], f[f"ca_bkv_{l}"], f[f"ca_bo_{l}"] = zeros(D), zeros(2 * D), zeros(D)
        f[f"d_ln1_g_{l}"], f[f"d_ln1_b_{l}"] = ones(D), zeros(D)
        f[f"d_ln2_g_{l}"], f[f"d_ln2_b_{l}"] = ones(D), zeros(D)
        f[f"d_ln3_g_{l}"], f[f"d_ln3_b_{l}"] = ones(D), zeros(D)
        f[f"d_b1_{l}"], f[f"d_b2_{l}"] = zeros(FF), zeros(D)

    w["out_w"] = jnp.pad(xav((D, TGT_VS)), ((0, 0), (0, VOCAB_PAD - TGT_VS)))
    f["out_b"] = zeros(VOCAB_PAD)
    return dict(emb=dict(enc=emb(SRC_VS), dec=emb(TGT_VS)), w=w, f=f)


def pack_weights(params):
    """Pack weights into two VMEM slabs (done once, outside the jitted forward).

    Folds 1/sqrt(HEAD_DIM) into the Q projections so the kernel never scales
    scores.  (Weights imported from PyTorch would additionally need transposing.)
    """
    w = dict(params["w"])
    f = dict(params["f"])
    qs = 1.0 / math.sqrt(HEAD_DIM)
    for l in range(NUM_LAYERS):
        w[f"sa_wqkv_{l}"] = w[f"sa_wqkv_{l}"].at[:, :MODEL_DIM].multiply(qs)
        f[f"sa_bqkv_{l}"] = f[f"sa_bqkv_{l}"].at[:, :MODEL_DIM].multiply(qs)
        w[f"ca_wq_{l}"] = w[f"ca_wq_{l}"] * qs
        f[f"ca_bq_{l}"] = f[f"ca_bq_{l}"] * qs
    wslab = _pack_slab(w, WOFF, WROWS, jnp.bfloat16)   # all matmul weights, pre-cast
    fslab = _pack_slab(f, FOFF, FROWS, jnp.float32)    # LN / biases / depthwise taps
    return wslab, fslab


# ==================================== main ===================================
if __name__ == "__main__":
    key = jax.random.PRNGKey(0)
    pkey, skey, tkey = jax.random.split(key, 3)
    params = init_params(pkey)
    wslab, fslab = pack_weights(params)

    B, S_SRC, T_TGT = 2, 16, 8
    src = jax.random.randint(skey, (B, S_SRC), 1, SRC_VS)
    tgt = jax.random.randint(tkey, (B, T_TGT), 1, TGT_VS)
    src = src.at[:, -2:].set(SRC_PAD)   # trailing padding tokens
    tgt = tgt.at[:, -2:].set(TGT_PAD)

    logits = forward(params["emb"], wslab, fslab, src, tgt)
    jax.block_until_ready(logits)
    assert logits.shape == (B, T_TGT, TGT_VS)
    assert bool(jnp.all(jnp.isfinite(logits)))
    print("KERNEL_OK")
</pallas_src>

<mosaic_0001>
module attributes {stable_mosaic.version = 11 : i64} {
  func.func @kernel(%arg0: i32, %arg1: memref<32x32xf32, #tpu.memory_space<vmem>>, %arg2: memref<16x32xf32, #tpu.memory_space<vmem>>, %arg3: memref<16x64xf32, #tpu.memory_space<vmem>>, %arg4: memref<32x128xf32, #tpu.memory_space<vmem>>, %arg5: memref<800x128xbf16, #tpu.memory_space<vmem>>, %arg6: memref<360x128xf32, #tpu.memory_space<vmem>>, %arg7: memref<368x128xbf16, #tpu.memory_space<vmem>>, %arg8: memref<16x128xf32, #tpu.memory_space<vmem>>) attributes {dimension_semantics = [#tpu.dimension_semantics<arbitrary>], iteration_bounds = array<i64: 1>, scalar_prefetch = 0 : i64, scratch_operands = 0 : i64, tpu.core_type = #tpu.core_type<tc>, window_params = [{pipeline_mode = #tpu.pipeline_mode<synchronous>, transform_indices = @transform_0, window_bounds = array<i64: 32, 32>}, {pipeline_mode = #tpu.pipeline_mode<synchronous>, transform_indices = @transform_1, window_bounds = array<i64: 16, 32>}, {pipeline_mode = #tpu.pipeline_mode<synchronous>, transform_indices = @transform_2, window_bounds = array<i64: 16, 64>}, {pipeline_mode = #tpu.pipeline_mode<synchronous>, transform_indices = @transform_3, window_bounds = array<i64: 32, 128>}, {pipeline_mode = #tpu.pipeline_mode<synchronous>, transform_indices = @transform_4, window_bounds = array<i64: 800, 128>}, {pipeline_mode = #tpu.pipeline_mode<synchronous>, transform_indices = @transform_5, window_bounds = array<i64: 360, 128>}, {pipeline_mode = #tpu.pipeline_mode<synchronous>, transform_indices = @transform_6, window_bounds = array<i64: 368, 128>}, {pipeline_mode = #tpu.pipeline_mode<synchronous>, transform_indices = @transform_7, window_bounds = array<i64: 16, 128>}]} {
    %c0 = arith.constant 0 : index
    %c0_0 = arith.constant 0 : index
    %0 = vector.load %arg1[%c0, %c0_0] : memref<32x32xf32, #tpu.memory_space<vmem>>, vector<32x32xf32>
    %c0_1 = arith.constant 0 : index
    %c0_2 = arith.constant 0 : index
    %1 = vector.load %arg7[%c0_1, %c0_2] : memref<368x128xbf16, #tpu.memory_space<vmem>>, vector<64x32xbf16>
    %c64 = arith.constant 64 : index
    %c0_3 = arith.constant 0 : index
    %2 = vector.load %arg7[%c64, %c0_3] : memref<368x128xbf16, #tpu.memory_space<vmem>>, vector<32x32xbf16>
    %c96 = arith.constant 96 : index
    %c0_4 = arith.constant 0 : index
    %3 = vector.load %arg7[%c96, %c0_4] : memref<368x128xbf16, #tpu.memory_space<vmem>>, vector<32x32xbf16>
    %4 = arith.truncf %0 : vector<32x32xf32> to vector<32x32xbf16>
    %cst = arith.constant dense<0.000000e+00> : vector<64x32xf32>
    %5 = tpu.matmul %1, %4, %cst {dimension_numbers = #tpu.dot_dimension_numbers<[1], [0], [0], [1], [0, 0, 1, 1], [], []>} : vector<64x32xbf16>, vector<32x32xbf16>, vector<64x32xf32> -> vector<64x32xf32>
    %6 = vector.extract_strided_slice %5 {offsets = [0, 0], sizes = [32, 32], strides = [1, 1]} : vector<64x32xf32> to vector<32x32xf32>
    %7 = arith.truncf %6 : vector<32x32xf32> to vector<32x32xbf16>
    %cst_5 = arith.constant dense<0.000000e+00> : vector<32x32xf32>
    %8 = tpu.matmul %7, %2, %cst_5 {dimension_numbers = #tpu.dot_dimension_numbers<[1], [0], [0], [1], [0, 0, 1, 1], [], []>} : vector<32x32xbf16>, vector<32x32xbf16>, vector<32x32xf32> -> vector<32x32xf32>
    %9 = vector.extract_strided_slice %5 {offsets = [32, 0], sizes = [32, 32], strides = [1, 1]} : vector<64x32xf32> to vector<32x32xf32>
    %10 = arith.truncf %9 : vector<32x32xf32> to vector<32x32xbf16>
    %cst_6 = arith.constant dense<0.000000e+00> : vector<32x32xf32>
    %11 = tpu.matmul %10, %3, %cst_6 {dimension_numbers = #tpu.dot_dimension_numbers<[1], [0], [0], [1], [0, 0, 1, 1], [], []>} : vector<32x32xbf16>, vector<32x32xbf16>, vector<32x32xf32> -> vector<32x32xf32>
    %12 = arith.subf %8, %11 : vector<32x32xf32>
    %13 = arith.addf %0, %12 : vector<32x32xf32>
    %c0_7 = arith.constant 0 : index
    %c0_8 = arith.constant 0 : index
    %14 = vector.load %arg6[%c0_7, %c0_8] : memref<360x128xf32, #tpu.memory_space<vmem>>, vector<1x32xf32>
    %c8 = arith.constant 8 : index
    %c0_9 = arith.constant 0 : index
    %15 = vector.load %arg6[%c8, %c0_9] : memref<360x128xf32, #tpu.memory_space<vmem>>, vector<1x32xf32>
    %cst_10 = arith.constant dense<0.000000e+00> : vector<32xf32>
    %16 = vector.multi_reduction <add>, %13, %cst_10 [1] : vector<32x32xf32> to vector<32xf32>
    %17 = vector.shape_cast %16 : vector<32xf32> to vector<32x1xf32>
    %cst_11 = arith.constant 3.200000e+01 : f32
    %18 = vector.broadcast %cst_11 : f32 to vector<32x1xf32>
    %19 = arith.divf %17, %18 : vector<32x1xf32>
    %20 = vector.broadcast %19 : vector<32x1xf32> to vector<32x32xf32>
    %21 = arith.subf %13, %20 : vector<32x32xf32>
    %22 = arith.mulf %21, %21 : vector<32x32xf32>
    %cst_12 = arith.constant dense<0.000000e+00> : vector<32xf32>
    %23 = vector.multi_reduction <add>, %22, %cst_12 [1] : vector<32x32xf32> to vector<32xf32>
    %24 = vector.shape_cast %23 : vector<32xf32> to vector<32x1xf32>
    %cst_13 = arith.constant 3.200000e+01 : f32
    %25 = vector.broadcast %cst_13 : f32 to vector<32x1xf32>
    %26 = arith.divf %24, %25 : vector<32x1xf32>
    %cst_14 = arith.constant 9.99999974E-6 : f32
    %27 = vector.broadcast %cst_14 : f32 to vector<32x1xf32>
    %28 = arith.addf %26, %27 : vector<32x1xf32>
    %29 = math.rsqrt %28 : vector<32x1xf32>
    %30 = vector.broadcast %29 : vector<32x1xf32> to vector<32x32xf32>
    %31 = arith.mulf %21, %30 : vector<32x32xf32>
    %32 = vector.broadcast %14 : vector<1x32xf32> to vector<32x32xf32>
    %33 = arith.mulf %31, %32 : vector<32x32xf32>
    %34 = vector.broadcast %15 : vector<1x32xf32> to vector<32x32xf32>
    %35 = arith.addf %33, %34 : vector<32x32xf32>
    %c0_15 = arith.constant 0 : index
    %c0_16 = arith.constant 0 : index
    %36 = vector.load %arg5[%c0_15, %c0_16] : memref<800x128xbf16, #tpu.memory_space<vmem>>, vector<32x64xbf16>
    %37 = arith.truncf %35 : vector<32x32xf32> to vector<32x32xbf16>
    %cst_17 = arith.constant dense<0.000000e+00> : vector<32x64xf32>
    %38 = tpu.matmul %37, %36, %cst_17 {dimension_numbers = #tpu.dot_dimension_numbers<[1], [0], [0], [1], [0, 0, 1, 1], [], []>} : vector<32x32xbf16>, vector<32x64xbf16>, vector<32x64xf32> -> vector<32x64xf32>
    %c32 = arith.constant 32 : index
    %c0_18 = arith.constant 0 : index
    %39 = vector.load %arg6[%c32, %c0_18] : memref<360x128xf32, #tpu.memory_space<vmem>>, vector<1x64xf32>
    %40 = vector.broadcast %39 : vector<1x64xf32> to vector<32x64xf32>
    %41 = arith.addf %38, %40 : vector<32x64xf32>
    %42 = arith.mulf %41, %41 : vector<32x64xf32>
    %43 = arith.mulf %41, %42 : vector<32x64xf32>
    %cst_19 = arith.constant 4.471500e-02 : f32
    %44 = vector.broadcast %cst_19 : f32 to vector<32x64xf32>
    %45 = arith.mulf %44, %43 : vector<32x64xf32>
    %46 = arith.addf %41, %45 : vector<32x64xf32>
    %cst_20 = arith.constant 0.797884583 : f32
    %47 = vector.broadcast %cst_20 : f32 to vector<32x64xf32>
    %48 = arith.mulf %47, %46 : vector<32x64xf32>
    %49 = math.tanh %48 : vector<32x64xf32>
    %cst_21 = arith.constant 1.000000e+00 : f32
    %50 = vector.broadcast %cst_21 : f32 to vector<32x64xf32>
    %51 = arith.addf %50, %49 : vector<32x64xf32>
    %cst_22 = arith.constant 5.000000e-01 : f32
    %52 = vector.broadcast %cst_22 : f32 to vector<32x64xf32>
    %53 = arith.mulf %52, %51 : vector<32x64xf32>
    %54 = arith.mulf %41, %53 : vector<32x64xf32>
    %c32_23 = arith.constant 32 : index
    %c0_24 = arith.constant 0 : index
    %55 = vector.load %arg5[%c32_23, %c0_24] : memref<800x128xbf16, #tpu.memory_space<vmem>>, vector<64x32xbf16>
    %56 = arith.truncf %54 : vector<32x64xf32> to vector<32x64xbf16>
    %cst_25 = arith.constant dense<0.000000e+00> : vector<32x32xf32>
    %57 = tpu.matmul %56, %55, %cst_25 {dimension_numbers = #tpu.dot_dimension_numbers<[1], [0], [0], [1], [0, 0, 1, 1], [], []>} : vector<32x64xbf16>, vector<64x32xbf16>, vector<32x32xf32> -> vector<32x32xf32>
    %c40 = arith.constant 40 : index
    %c0_26 = arith.constant 0 : index
    %58 = vector.load %arg6[%c40, %c0_26] : memref<360x128xf32, #tpu.memory_space<vmem>>, vector<1x32xf32>
    %59 = vector.broadcast %58 : vector<1x32xf32> to vector<32x32xf32>
    %60 = arith.addf %57, %59 : vector<32x32xf32>
    %61 = arith.addf %35, %60 : vector<32x32xf32>
    %c16 = arith.constant 16 : index
    %c0_27 = arith.constant 0 : index
    %62 = vector.load %arg6[%c16, %c0_27] : memref<360x128xf32, #tpu.memory_space<vmem>>, vector<1x32xf32>
    %c24 = arith.constant 24 : index
    %c0_28 = arith.constant 0 : index
    %63 = vector.load %arg6[%c24, %c0_28] : memref<360x128xf32, #tpu.memory_space<vmem>>, vector<1x32xf32>
    %cst_29 = arith.constant dense<0.000000e+00> : vector<32xf32>
    %64 = vector.multi_reduction <add>, %61, %cst_29 [1] : vector<32x32xf32> to vector<32xf32>
    %65 = vector.shape_cast %64 : vector<32xf32> to vector<32x1xf32>
    %cst_30 = arith.constant 3.200000e+01 : f32
    %66 = vector.broadcast %cst_30 : f32 to vector<32x1xf32>
    %67 = arith.divf %65, %66 : vector<32x1xf32>
    %68 = vector.broadcast %67 : vector<32x1xf32> to vector<32x32xf32>
    %69 = arith.subf %61, %68 : vector<32x32xf32>
    %70 = arith.mulf %69, %69 : vector<32x32xf32>
    %cst_31 = arith.constant dense<0.000000e+00> : vector<32xf32>
    %71 = vector.multi_reduction <add>, %70, %cst_31 [1] : vector<32x32xf32> to vector<32xf32>
    %72 = vector.shape_cast %71 : vector<32xf32> to vector<32x1xf32>
    %cst_32 = arith.constant 3.200000e+01 : f32
    %73 = vector.broadcast %cst_32 : f32 to vector<32x1xf32>
    %74 = arith.divf %72, %73 : vector<32x1xf32>
    %cst_33 = arith.constant 9.99999974E-6 : f32
    %75 = vector.broadcast %cst_33 : f32 to vector<32x1xf32>
    %76 = arith.addf %74, %75 : vector<32x1xf32>
    %77 = math.rsqrt %76 : vector<32x1xf32>
    %78 = vector.broadcast %77 : vector<32x1xf32> to vector<32x32xf32>
    %79 = arith.mulf %69, %78 : vector<32x32xf32>
    %80 = vector.broadcast %62 : vector<1x32xf32> to vector<32x32xf32>
    %81 = arith.mulf %79, %80 : vector<32x32xf32>
    %82 = vector.broadcast %63 : vector<1x32xf32> to vector<32x32xf32>
    %83 = arith.addf %81, %82 : vector<32x32xf32>
    %84 = arith.truncf %83 : vector<32x32xf32> to vector<32x32xbf16>
    %cst_34 = arith.constant dense<0.000000e+00> : vector<64x32xf32>
    %85 = tpu.matmul %1, %84, %cst_34 {dimension_numbers = #tpu.dot_dimension_numbers<[1], [0], [0], [1], [0, 0, 1, 1], [], []>} : vector<64x32xbf16>, vector<32x32xbf16>, vector<64x32xf32> -> vector<64x32xf32>
    %86 = vector.extract_strided_slice %85 {offsets = [0, 0], sizes = [32, 32], strides = [1, 1]} : vector<64x32xf32> to vector<32x32xf32>
    %87 = arith.truncf %86 : vector<32x32xf32> to vector<32x32xbf16>
    %cst_35 = arith.constant dense<0.000000e+00> : vector<32x32xf32>
    %88 = tpu.matmul %87, %2, %cst_35 {dimension_numbers = #tpu.dot_dimension_numbers<[1], [0], [0], [1], [0, 0, 1, 1], [], []>} : vector<32x32xbf16>, vector<32x32xbf16>, vector<32x32xf32> -> vector<32x32xf32>
    %89 = vector.extract_strided_slice %85 {offsets = [32, 0], sizes = [32, 32], strides = [1, 1]} : vector<64x32xf32> to vector<32x32xf32>
    %90 = arith.truncf %89 : vector<32x32xf32> to vector<32x32xbf16>
    %cst_36 = arith.constant dense<0.000000e+00> : vector<32x32xf32>
    %91 = tpu.matmul %90, %3, %cst_36 {dimension_numbers = #tpu.dot_dimension_numbers<[1], [0], [0], [1], [0, 0, 1, 1], [], []>} : vector<32x32xbf16>, vector<32x32xbf16>, vector<32x32xf32> -> vector<32x32xf32>
    %92 = arith.subf %88, %91 : vector<32x32xf32>
    %93 = arith.addf %83, %92 : vector<32x32xf32>
    %c176 = arith.constant 176 : index
    %c0_37 = arith.constant 0 : index
    %94 = vector.load %arg6[%c176, %c0_37] : memref<360x128xf32, #tpu.memory_space<vmem>>, vector<1x32xf32>
    %c184 = arith.constant 184 : index
    %c0_38 = arith.constant 0 : index
    %95 = vector.load %arg6[%c184, %c0_38] : memref<360x128xf32, #tpu.memory_space<vmem>>, vector<1x32xf32>
    %cst_39 = arith.constant dense<0.000000e+00> : vector<32xf32>
    %96 = vector.multi_reduction <add>, %93, %cst_39 [1] : vector<32x32xf32> to vector<32xf32>
    %97 = vector.shape_cast %96 : vector<32xf32> to vector<32x1xf32>
    %cst_40 = arith.constant 3.200000e+01 : f32
    %98 = vector.broadcast %cst_40 : f32 to vector<32x1xf32>
    %99 = arith.divf %97, %98 : vector<32x1xf32>
    %100 = vector.broadcast %99 : vector<32x1xf32> to vector<32x32xf32>
    %101 = arith.subf %93, %100 : vector<32x32xf32>
    %102 = arith.mulf %101, %101 : vector<32x32xf32>
    %cst_41 = arith.constant dense<0.000000e+00> : vector<32xf32>
    %103 = vector.multi_reduction <add>, %102, %cst_41 [1] : vector<32x32xf32> to vector<32xf32>
    %104 = vector.shape_cast %103 : vector<32xf32> to vector<32x1xf32>
    %cst_42 = arith.constant 3.200000e+01 : f32
    %105 = vector.broadcast %cst_42 : f32 to vector<32x1xf32>
    %106 = arith.divf %104, %105 : vector<32x1xf32>
    %cst_43 = arith.constant 9.99999974E-6 : f32
    %107 = vector.broadcast %cst_43 : f32 to vector<32x1xf32>
    %108 = arith.addf %106, %107 : vector<32x1xf32>
    %109 = math.rsqrt %108 : vector<32x1xf32>
    %110 = vector.broadcast %109 : vector<32x1xf32> to vector<32x32xf32>
    %111 = arith.mulf %101, %110 : vector<32x32xf32>
    %112 = vector.broadcast %94 : vector<1x32xf32> to vector<32x32xf32>
    %113 = arith.mulf %111, %112 : vector<32x32xf32>
    %114 = vector.broadcast %95 : vector<1x32xf32> to vector<32x32xf32>
    %115 = arith.addf %113, %114 : vector<32x32xf32>
    %c384 = arith.constant 384 : index
    %c0_44 = arith.constant 0 : index
    %116 = vector.load %arg5[%c384, %c0_44] : memref<800x128xbf16, #tpu.memory_space<vmem>>, vector<32x64xbf16>
    %117 = arith.truncf %115 : vector<32x32xf32> to vector<32x32xbf16>
    %cst_45 = arith.constant dense<0.000000e+00> : vector<32x64xf32>
    %118 = tpu.matmul %117, %116, %cst_45 {dimension_numbers = #tpu.dot_dimension_numbers<[1], [0], [0], [1], [0, 0, 1, 1], [], []>} : vector<32x32xbf16>, vector<32x64xbf16>, vector<32x64xf32> -> vector<32x64xf32>
    %c208 = arith.constant 208 : index
    %c0_46 = arith.constant 0 : index
    %119 = vector.load %arg6[%c208, %c0_46] : memref<360x128xf32, #tpu.memory_space<vmem>>, vector<1x64xf32>
    %120 = vector.broadcast %119 : vector<1x64xf32> to vector<32x64xf32>
    %121 = arith.addf %118, %120 : vector<32x64xf32>
    %122 = arith.mulf %121, %121 : vector<32x64xf32>
    %123 = arith.mulf %121, %122 : vector<32x64xf32>
    %cst_47 = arith.constant 4.471500e-02 : f32
    %124 = vector.broadcast %cst_47 : f32 to vector<32x64xf32>
    %125 = arith.mulf %124, %123 : vector<32x64xf32>
    %126 = arith.addf %121, %125 : vector<32x64xf32>
    %cst_48 = arith.constant 0.797884583 : f32
    %127 = vector.broadcast %cst_48 : f32 to vector<32x64xf32>
    %128 = arith.mulf %127, %126 : vector<32x64xf32>
    %129 = math.tanh %128 : vector<32x64xf32>
    %cst_49 = arith.constant 1.000000e+00 : f32
    %130 = vector.broadcast %cst_49 : f32 to vector<32x64xf32>
    %131 = arith.addf %130, %129 : vector<32x64xf32>
    %cst_50 = arith.constant 5.000000e-01 : f32
    %132 = vector.broadcast %cst_50 : f32 to vector<32x64xf32>
    %133 = arith.mulf %132, %131 : vector<32x64xf32>
    %134 = arith.mulf %121, %133 : vector<32x64xf32>
    %c416 = arith.constant 416 : index
    %c0_51 = arith.constant 0 : index
    %135 = vector.load %arg5[%c416, %c0_51] : memref<800x128xbf16, #tpu.memory_space<vmem>>, vector<64x32xbf16>
    %136 = arith.truncf %134 : vector<32x64xf32> to vector<32x64xbf16>
    %cst_52 = arith.constant dense<0.000000e+00> : vector<32x32xf32>
    %137 = tpu.matmul %136, %135, %cst_52 {dimension_numbers = #tpu.dot_dimension_numbers<[1], [0], [0], [1], [0, 0, 1, 1], [], []>} : vector<32x64xbf16>, vector<64x32xbf16>, vector<32x32xf32> -> vector<32x32xf32>
    %c216 = arith.constant 216 : index
    %c0_53 = arith.constant 0 : index
    %138 = vector.load %arg6[%c216, %c0_53] : memref<360x128xf32, #tpu.memory_space<vmem>>, vector<1x32xf32>
    %139 = vector.broadcast %138 : vector<1x32xf32> to vector<32x32xf32>
    %140 = arith.addf %137, %139 : vector<32x32xf32>
    %141 = arith.addf %115, %140 : vector<32x32xf32>
    %c192 = arith.constant 192 : index
    %c0_54 = arith.constant 0 : index
    %142 = vector.load %arg6[%c192, %c0_54] : memref<360x128xf32, #tpu.memory_space<vmem>>, vector<1x32xf32>
    %c200 = arith.constant 200 : index
    %c0_55 = arith.constant 0 : index
    %143 = vector.load %arg6[%c200, %c0_55] : memref<360x128xf32, #tpu.memory_space<vmem>>, vector<1x32xf32>
    %cst_56 = arith.constant dense<0.000000e+00> : vector<32xf32>
    %144 = vector.multi_reduction <add>, %141, %cst_56 [1] : vector<32x32xf32> to vector<32xf32>
    %145 = vector.shape_cast %144 : vector<32xf32> to vector<32x1xf32>
    %cst_57 = arith.constant 3.200000e+01 : f32
    %146 = vector.broadcast %cst_57 : f32 to vector<32x1xf32>
    %147 = arith.divf %145, %146 : vector<32x1xf32>
    %148 = vector.broadcast %147 : vector<32x1xf32> to vector<32x32xf32>
    %149 = arith.subf %141, %148 : vector<32x32xf32>
    %150 = arith.mulf %149, %149 : vector<32x32xf32>
    %cst_58 = arith.constant dense<0.000000e+00> : vector<32xf32>
    %151 = vector.multi_reduction <add>, %150, %cst_58 [1] : vector<32x32xf32> to vector<32xf32>
    %152 = vector.shape_cast %151 : vector<32xf32> to vector<32x1xf32>
    %cst_59 = arith.constant 3.200000e+01 : f32
    %153 = vector.broadcast %cst_59 : f32 to vector<32x1xf32>
    %154 = arith.divf %152, %153 : vector<32x1xf32>
    %cst_60 = arith.constant 9.99999974E-6 : f32
    %155 = vector.broadcast %cst_60 : f32 to vector<32x1xf32>
    %156 = arith.addf %154, %155 : vector<32x1xf32>
    %157 = math.rsqrt %156 : vector<32x1xf32>
    %158 = vector.broadcast %157 : vector<32x1xf32> to vector<32x32xf32>
    %159 = arith.mulf %149, %158 : vector<32x32xf32>
    %160 = vector.broadcast %142 : vector<1x32xf32> to vector<32x32xf32>
    %161 = arith.mulf %159, %160 : vector<32x32xf32>
    %162 = vector.broadcast %143 : vector<1x32xf32> to vector<32x32xf32>
    %163 = arith.addf %161, %162 : vector<32x32xf32>
    %c48 = arith.constant 48 : index
    %c0_61 = arith.constant 0 : index
    %164 = vector.load %arg6[%c48, %c0_61] : memref<360x128xf32, #tpu.memory_space<vmem>>, vector<3x32xf32>
    %165 = vector.extract_strided_slice %164 {offsets = [0, 0], sizes = [1, 32], strides = [1, 1]} : vector<3x32xf32> to vector<1x32xf32>
    %166 = vector.broadcast %165 : vector<1x32xf32> to vector<32x32xf32>
    %167 = arith.mulf %83, %166 : vector<32x32xf32>
    %168 = vector.extract_strided_slice %164 {offsets = [1, 0], sizes = [1, 32], strides = [1, 1]} : vector<3x32xf32> to vector<1x32xf32>
    %169 = vector.broadcast %168 : vector<1x32xf32> to vector<32x32xf32>
    %170 = arith.mulf %83, %169 : vector<32x32xf32>
    %171 = vector.extract_strided_slice %164 {offsets = [2, 0], sizes = [1, 32], strides = [1, 1]} : vector<3x32xf32> to vector<1x32xf32>
    %172 = vector.broadcast %171 : vector<1x32xf32> to vector<32x32xf32>
    %173 = arith.mulf %83, %172 : vector<32x32xf32>
    %174 = tpu.concatenate %167, %170, %173 in 0 : vector<32x32xf32>, vector<32x32xf32>, vector<32x32xf32> -> vector<96x32xf32>
    %c128 = arith.constant 128 : index
    %c0_62 = arith.constant 0 : index
    %175 = vector.load %arg7[%c128, %c0_62] : memref<368x128xbf16, #tpu.memory_space<vmem>>, vector<32x96xbf16>
    %176 = arith.truncf %174 : vector<96x32xf32> to vector<96x32xbf16>
    %cst_63 = arith.constant dense<0.000000e+00> : vector<32x32xf32>
    %177 = tpu.matmul %175, %176, %cst_63 {dimension_numbers = #tpu.dot_dimension_numbers<[1], [0], [0], [1], [0, 0, 1, 1], [], []>} : vector<32x96xbf16>, vector<96x32xbf16>, vector<32x32xf32> -> vector<32x32xf32>
    %c56 = arith.constant 56 : index
    %c0_64 = arith.constant 0 : index
    %178 = vector.load %arg6[%c56, %c0_64] : memref<360x128xf32, #tpu.memory_space<vmem>>, vector<1x32xf32>
    %179 = vector.broadcast %178 : vector<1x32xf32> to vector<32x32xf32>
    %180 = arith.addf %177, %179 : vector<32x32xf32>
    %c96_65 = arith.constant 96 : index
    %c0_66 = arith.constant 0 : index
    %181 = vector.load %arg5[%c96_65, %c0_66] : memref<800x128xbf16, #tpu.memory_space<vmem>>, vector<32x32xbf16>
    %182 = arith.truncf %180 : vector<32x32xf32> to vector<32x32xbf16>
    %cst_67 = arith.constant dense<0.000000e+00> : vector<32x32xf32>
    %183 = tpu.matmul %182, %181, %cst_67 {dimension_numbers = #tpu.dot_dimension_numbers<[1], [0], [0], [1], [0, 0, 1, 1], [], []>} : vector<32x32xbf16>, vector<32x32xbf16>, vector<32x32xf32> -> vector<32x32xf32>
    %c64_68 = arith.constant 64 : index
    %c0_69 = arith.constant 0 : index
    %184 = vector.load %arg6[%c64_68, %c0_69] : memref<360x128xf32, #tpu.memory_space<vmem>>, vector<1x32xf32>
    %185 = vector.broadcast %184 : vector<1x32xf32> to vector<32x32xf32>
    %186 = arith.addf %183, %185 : vector<32x32xf32>
    %c224 = arith.constant 224 : index
    %c0_70 = arith.constant 0 : index
    %187 = vector.load %arg6[%c224, %c0_70] : memref<360x128xf32, #tpu.memory_space<vmem>>, vector<3x32xf32>
    %188 = vector.extract_strided_slice %187 {offsets = [0, 0], sizes = [1, 32], strides = [1, 1]} : vector<3x32xf32> to vector<1x32xf32>
    %189 = vector.broadcast %188 : vector<1x32xf32> to vector<32x32xf32>
    %190 = arith.mulf %163, %189 : vector<32x32xf32>
    %191 = vector.extract_strided_slice %187 {offsets = [1, 0], sizes = [1, 32], strides = [1, 1]} : vector<3x32xf32> to vector<1x32xf32>
    %192 = vector.broadcast %191 : vector<1x32xf32> to vector<32x32xf32>
    %193 = arith.mulf %163, %192 : vector<32x32xf32>
    %194 = vector.extract_strided_slice %187 {offsets = [2, 0], sizes = [1, 32], strides = [1, 1]} : vector<3x32xf32> to vector<1x32xf32>
    %195 = vector.broadcast %194 : vector<1x32xf32> to vector<32x32xf32>
    %196 = arith.mulf %163, %195 : vector<32x32xf32>
    %197 = tpu.concatenate %190, %193, %196 in 0 : vector<32x32xf32>, vector<32x32xf32>, vector<32x32xf32> -> vector<96x32xf32>
    %c160 = arith.constant 160 : index
    %c0_71 = arith.constant 0 : index
    %198 = vector.load %arg7[%c160, %c0_71] : memref<368x128xbf16, #tpu.memory_space<vmem>>, vector<16x96xbf16>
    %199 = arith.truncf %197 : vector<96x32xf32> to vector<96x32xbf16>
    %cst_72 = arith.constant dense<0.000000e+00> : vector<16x32xf32>
    %200 = tpu.matmul %198, %199, %cst_72 {dimension_numbers = #tpu.dot_dimension_numbers<[1], [0], [0], [1], [0, 0, 1, 1], [], []>} : vector<16x96xbf16>, vector<96x32xbf16>, vector<16x32xf32> -> vector<16x32xf32>
    %c232 = arith.constant 232 : index
    %c0_73 = arith.constant 0 : index
    %201 = vector.load %arg6[%c232, %c0_73] : memref<360x128xf32, #tpu.memory_space<vmem>>, vector<1x32xf32>
    %202 = vector.broadcast %201 : vector<1x32xf32> to vector<16x32xf32>
    %203 = arith.addf %200, %202 : vector<16x32xf32>
    %c480 = arith.constant 480 : index
    %c0_74 = arith.constant 0 : index
    %204 = vector.load %arg5[%c480, %c0_74] : memref<800x128xbf16, #tpu.memory_space<vmem>>, vector<32x32xbf16>
    %205 = arith.truncf %203 : vector<16x32xf32> to vector<16x32xbf16>
    %cst_75 = arith.constant dense<0.000000e+00> : vector<16x32xf32>
    %206 = tpu.matmul %205, %204, %cst_75 {dimension_numbers = #tpu.dot_dimension_numbers<[1], [0], [0], [1], [0, 0, 1, 1], [], []>} : vector<16x32xbf16>, vector<32x32xbf16>, vector<16x32xf32> -> vector<16x32xf32>
    %c240 = arith.constant 240 : index
    %c0_76 = arith.constant 0 : index
    %207 = vector.load %arg6[%c240, %c0_76] : memref<360x128xf32, #tpu.memory_space<vmem>>, vector<1x32xf32>
    %208 = vector.broadcast %207 : vector<1x32xf32> to vector<16x32xf32>
    %209 = arith.addf %206, %208 : vector<16x32xf32>
    %c0_77 = arith.constant 0 : index
    %c0_78 = arith.constant 0 : index
    %210 = vector.load %arg2[%c0_77, %c0_78] : memref<16x32xf32, #tpu.memory_space<vmem>>, vector<16x32xf32>
    %c0_79 = arith.constant 0 : index
    %c0_80 = arith.constant 0 : index
    %211 = vector.load %arg3[%c0_79, %c0_80] : memref<16x64xf32, #tpu.memory_space<vmem>>, vector<16x64xf32>
    %c128_81 = arith.constant 128 : index
    %c0_82 = arith.constant 0 : index
    %212 = vector.load %arg5[%c128_81, %c0_82] : memref<800x128xbf16, #tpu.memory_space<vmem>>, vector<32x96xbf16>
    %213 = arith.truncf %210 : vector<16x32xf32> to vector<16x32xbf16>
    %cst_83 = arith.constant dense<0.000000e+00> : vector<16x96xf32>
    %214 = tpu.matmul %213, %212, %cst_83 {dimension_numbers = #tpu.dot_dimension_numbers<[1], [0], [0], [1], [0, 0, 1, 1], [], []>} : vector<16x32xbf16>, vector<32x96xbf16>, vector<16x96xf32> -> vector<16x96xf32>
    %c72 = arith.constant 72 : index
    %c0_84 = arith.constant 0 : index
    %215 = vector.load %arg6[%c72, %c0_84] : memref<360x128xf32, #tpu.memory_space<vmem>>, vector<1x96xf32>
    %216 = vector.broadcast %215 : vector<1x96xf32> to vector<16x96xf32>
    %217 = arith.addf %214, %216 : vector<16x96xf32>
    %218 = vector.extract_strided_slice %217 {offsets = [0, 0], sizes = [16, 32], strides = [1, 1]} : vector<16x96xf32> to vector<16x32xf32>
    %219 = vector.extract_strided_slice %217 {offsets = [0, 32], sizes = [16, 32], strides = [1, 1]} : vector<16x96xf32> to vector<16x32xf32>
    %220 = vector.extract_strided_slice %217 {offsets = [0, 64], sizes = [16, 32], strides = [1, 1]} : vector<16x96xf32> to vector<16x32xf32>
    %c176_85 = arith.constant 176 : index
    %c0_86 = arith.constant 0 : index
    %221 = vector.load %arg7[%c176_85, %c0_86] : memref<368x128xbf16, #tpu.memory_space<vmem>>, vector<64x32xbf16>
    %222 = arith.truncf %219 : vector<16x32xf32> to vector<16x32xbf16>
    %223 = tpu.concatenate %222, %222, %222, %222 in 0 : vector<16x32xbf16>, vector<16x32xbf16>, vector<16x32xbf16>, vector<16x32xbf16> -> vector<64x32xbf16>
    %224 = arith.mulf %223, %221 : vector<64x32xbf16>
    %225 = arith.truncf %218 : vector<16x32xf32> to vector<16x32xbf16>
    %cst_87 = arith.constant dense<0.000000e+00> : vector<16x64xf32>
    %226 = tpu.matmul %225, %224, %cst_87 {dimension_numbers = #tpu.dot_dimension_numbers<[1], [1], [0], [0], [0, 0, 1, 0], [], []>} : vector<16x32xbf16>, vector<64x32xbf16>, vector<16x64xf32> -> vector<16x64xf32>
    %227 = arith.addf %226, %211 : vector<16x64xf32>
    %cst_88 = arith.constant dense<0xFF800000> : vector<16xf32>
    %228 = vector.multi_reduction <maximumf>, %227, %cst_88 [1] : vector<16x64xf32> to vector<16xf32>
    %229 = vector.shape_cast %228 : vector<16xf32> to vector<16x1xf32>
    %230 = vector.broadcast %229 : vector<16x1xf32> to vector<16x64xf32>
    %231 = arith.subf %227, %230 : vector<16x64xf32>
    %232 = math.exp %231 : vector<16x64xf32>
    %233 = vector.extract_strided_slice %232 {offsets = [0, 0], sizes = [16, 16], strides = [1, 1]} : vector<16x64xf32> to vector<16x16xf32>
    %234 = vector.extract_strided_slice %232 {offsets = [0, 0], sizes = [16, 16], strides = [1, 1]} : vector<16x64xf32> to vector<16x16xf32>
    %cst_89 = arith.constant dense<0.000000e+00> : vector<16xf32>
    %235 = vector.multi_reduction <add>, %234, %cst_89 [1] : vector<16x16xf32> to vector<16xf32>
    %236 = vector.shape_cast %235 : vector<16xf32> to vector<16x1xf32>
    %237 = vector.broadcast %236 : vector<16x1xf32> to vector<16x16xf32>
    %238 = arith.divf %233, %237 : vector<16x16xf32>
    %239 = vector.extract_strided_slice %232 {offsets = [0, 16], sizes = [16, 16], strides = [1, 1]} : vector<16x64xf32> to vector<16x16xf32>
    %240 = vector.extract_strided_slice %232 {offsets = [0, 16], sizes = [16, 16], strides = [1, 1]} : vector<16x64xf32> to vector<16x16xf32>
    %cst_90 = arith.constant dense<0.000000e+00> : vector<16xf32>
    %241 = vector.multi_reduction <add>, %240, %cst_90 [1] : vector<16x16xf32> to vector<16xf32>
    %242 = vector.shape_cast %241 : vector<16xf32> to vector<16x1xf32>
    %243 = vector.broadcast %242 : vector<16x1xf32> to vector<16x16xf32>
    %244 = arith.divf %239, %243 : vector<16x16xf32>
    %245 = vector.extract_strided_slice %232 {offsets = [0, 32], sizes = [16, 16], strides = [1, 1]} : vector<16x64xf32> to vector<16x16xf32>
    %246 = vector.extract_strided_slice %232 {offsets = [0, 32], sizes = [16, 16], strides = [1, 1]} : vector<16x64xf32> to vector<16x16xf32>
    %cst_91 = arith.constant dense<0.000000e+00> : vector<16xf32>
    %247 = vector.multi_reduction <add>, %246, %cst_91 [1] : vector<16x16xf32> to vector<16xf32>
    %248 = vector.shape_cast %247 : vector<16xf32> to vector<16x1xf32>
    %249 = vector.broadcast %248 : vector<16x1xf32> to vector<16x16xf32>
    %250 = arith.divf %245, %249 : vector<16x16xf32>
    %251 = vector.extract_strided_slice %232 {offsets = [0, 48], sizes = [16, 16], strides = [1, 1]} : vector<16x64xf32> to vector<16x16xf32>
    %252 = vector.extract_strided_slice %232 {offsets = [0, 48], sizes = [16, 16], strides = [1, 1]} : vector<16x64xf32> to vector<16x16xf32>
    %cst_92 = arith.constant dense<0.000000e+00> : vector<16xf32>
    %253 = vector.multi_reduction <add>, %252, %cst_92 [1] : vector<16x16xf32> to vector<16xf32>
    %254 = vector.shape_cast %253 : vector<16xf32> to vector<16x1xf32>
    %255 = vector.broadcast %254 : vector<16x1xf32> to vector<16x16xf32>
    %256 = arith.divf %251, %255 : vector<16x16xf32>
    %257 = tpu.concatenate %238, %244, %250, %256 in 1 : vector<16x16xf32>, vector<16x16xf32>, vector<16x16xf32>, vector<16x16xf32> -> vector<16x64xf32>
    %258 = arith.truncf %257 : vector<16x64xf32> to vector<16x64xbf16>
    %259 = arith.truncf %220 : vector<16x32xf32> to vector<16x32xbf16>
    %260 = tpu.concatenate %259, %259, %259, %259 in 0 : vector<16x32xbf16>, vector<16x32xbf16>, vector<16x32xbf16>, vector<16x32xbf16> -> vector<64x32xbf16>
    %261 = arith.mulf %260, %221 : vector<64x32xbf16>
    %cst_93 = arith.constant dense<0.000000e+00> : vector<16x32xf32>
    %262 = tpu.matmul %258, %261, %cst_93 {dimension_numbers = #tpu.dot_dimension_numbers<[1], [0], [0], [1], [0, 0, 1, 1], [], []>} : vector<16x64xbf16>, vector<64x32xbf16>, vector<16x32xf32> -> vector<16x32xf32>
    %c160_94 = arith.constant 160 : index
    %c0_95 = arith.constant 0 : index
    %263 = vector.load %arg5[%c160_94, %c0_95] : memref<800x128xbf16, #tpu.memory_space<vmem>>, vector<32x32xbf16>
    %264 = arith.truncf %262 : vector<16x32xf32> to vector<16x32xbf16>
    %cst_96 = arith.constant dense<0.000000e+00> : vector<16x32xf32>
    %265 = tpu.matmul %264, %263, %cst_96 {dimension_numbers = #tpu.dot_dimension_numbers<[1], [0], [0], [1], [0, 0, 1, 1], [], []>} : vector<16x32xbf16>, vector<32x32xbf16>, vector<16x32xf32> -> vector<16x32xf32>
    %c80 = arith.constant 80 : index
    %c0_97 = arith.constant 0 : index
    %266 = vector.load %arg6[%c80, %c0_97] : memref<360x128xf32, #tpu.memory_space<vmem>>, vector<1x32xf32>
    %267 = vector.broadcast %266 : vector<1x32xf32> to vector<16x32xf32>
    %268 = arith.addf %265, %267 : vector<16x32xf32>
    %269 = arith.addf %210, %268 : vector<16x32xf32>
    %c112 = arith.constant 112 : index
    %c0_98 = arith.constant 0 : index
    %270 = vector.load %arg6[%c112, %c0_98] : memref<360x128xf32, #tpu.memory_space<vmem>>, vector<1x32xf32>
    %c120 = arith.constant 120 : index
    %c0_99 = arith.constant 0 : index
    %271 = vector.load %arg6[%c120, %c0_99] : memref<360x128xf32, #tpu.memory_space<vmem>>, vector<1x32xf32>
    %cst_100 = arith.constant dense<0.000000e+00> : vector<16xf32>
    %272 = vector.multi_reduction <add>, %269, %cst_100 [1] : vector<16x32xf32> to vector<16xf32>
    %273 = vector.shape_cast %272 : vector<16xf32> to vector<16x1xf32>
    %cst_101 = arith.constant 3.200000e+01 : f32
    %274 = vector.broadcast %cst_101 : f32 to vector<16x1xf32>
    %275 = arith.divf %273, %274 : vector<16x1xf32>
    %276 = vector.broadcast %275 : vector<16x1xf32> to vector<16x32xf32>
    %277 = arith.subf %269, %276 : vector<16x32xf32>
    %278 = arith.mulf %277, %277 : vector<16x32xf32>
    %cst_102 = arith.constant dense<0.000000e+00> : vector<16xf32>
    %279 = vector.multi_reduction <add>, %278, %cst_102 [1] : vector<16x32xf32> to vector<16xf32>
    %280 = vector.shape_cast %279 : vector<16xf32> to vector<16x1xf32>
    %cst_103 = arith.constant 3.200000e+01 : f32
    %281 = vector.broadcast %cst_103 : f32 to vector<16x1xf32>
    %282 = arith.divf %280, %281 : vector<16x1xf32>
    %cst_104 = arith.constant 9.99999974E-6 : f32
    %283 = vector.broadcast %cst_104 : f32 to vector<16x1xf32>
    %284 = arith.addf %282, %283 : vector<16x1xf32>
    %285 = math.rsqrt %284 : vector<16x1xf32>
    %286 = vector.broadcast %285 : vector<16x1xf32> to vector<16x32xf32>
    %287 = arith.mulf %277, %286 : vector<16x32xf32>
    %288 = vector.broadcast %270 : vector<1x32xf32> to vector<16x32xf32>
    %289 = arith.mulf %287, %288 : vector<16x32xf32>
    %290 = vector.broadcast %271 : vector<1x32xf32> to vector<16x32xf32>
    %291 = arith.addf %289, %290 : vector<16x32xf32>
    %c192_105 = arith.constant 192 : index
    %c0_106 = arith.constant 0 : index
    %292 = vector.load %arg5[%c192_105, %c0_106] : memref<800x128xbf16, #tpu.memory_space<vmem>>, vector<32x32xbf16>
    %293 = arith.truncf %291 : vector<16x32xf32> to vector<16x32xbf16>
    %cst_107 = arith.constant dense<0.000000e+00> : vector<16x32xf32>
    %294 = tpu.matmul %293, %292, %cst_107 {dimension_numbers = #tpu.dot_dimension_numbers<[1], [0], [0], [1], [0, 0, 1, 1], [], []>} : vector<16x32xbf16>, vector<32x32xbf16>, vector<16x32xf32> -> vector<16x32xf32>
    %c88 = arith.constant 88 : index
    %c0_108 = arith.constant 0 : index
    %295 = vector.load %arg6[%c88, %c0_108] : memref<360x128xf32, #tpu.memory_space<vmem>>, vector<1x32xf32>
    %296 = vector.broadcast %295 : vector<1x32xf32> to vector<16x32xf32>
    %297 = arith.addf %294, %296 : vector<16x32xf32>
    %c224_109 = arith.constant 224 : index
    %c0_110 = arith.constant 0 : index
    %298 = vector.load %arg5[%c224_109, %c0_110] : memref<800x128xbf16, #tpu.memory_space<vmem>>, vector<32x64xbf16>
    %299 = arith.truncf %186 : vector<32x32xf32> to vector<32x32xbf16>
    %cst_111 = arith.constant dense<0.000000e+00> : vector<32x64xf32>
    %300 = tpu.matmul %299, %298, %cst_111 {dimension_numbers = #tpu.dot_dimension_numbers<[1], [0], [0], [1], [0, 0, 1, 1], [], []>} : vector<32x32xbf16>, vector<32x64xbf16>, vector<32x64xf32> -> vector<32x64xf32>
    %c96_112 = arith.constant 96 : index
    %c0_113 = arith.constant 0 : index
    %301 = vector.load %arg6[%c96_112, %c0_113] : memref<360x128xf32, #tpu.memory_space<vmem>>, vector<1x64xf32>
    %302 = vector.broadcast %301 : vector<1x64xf32> to vector<32x64xf32>
    %303 = arith.addf %300, %302 : vector<32x64xf32>
    %304 = vector.extract_strided_slice %303 {offsets = [0, 0], sizes = [32, 32], strides = [1, 1]} : vector<32x64xf32> to vector<32x32xf32>
    %305 = vector.extract_strided_slice %303 {offsets = [0, 32], sizes = [32, 32], strides = [1, 1]} : vector<32x64xf32> to vector<32x32xf32>
    %c0_114 = arith.constant 0 : index
    %c0_115 = arith.constant 0 : index
    %306 = vector.load %arg4[%c0_114, %c0_115] : memref<32x128xf32, #tpu.memory_space<vmem>>, vector<16x128xf32>
    %c240_116 = arith.constant 240 : index
    %c0_117 = arith.constant 0 : index
    %307 = vector.load %arg7[%c240_116, %c0_117] : memref<368x128xbf16, #tpu.memory_space<vmem>>, vector<128x32xbf16>
    %308 = arith.truncf %304 : vector<32x32xf32> to vector<32x32xbf16>
    %309 = tpu.concatenate %308, %308, %308, %308 in 0 : vector<32x32xbf16>, vector<32x32xbf16>, vector<32x32xbf16>, vector<32x32xbf16> -> vector<128x32xbf16>
    %310 = arith.mulf %309, %307 : vector<128x32xbf16>
    %311 = arith.truncf %297 : vector<16x32xf32> to vector<16x32xbf16>
    %cst_118 = arith.constant dense<0.000000e+00> : vector<16x128xf32>
    %312 = tpu.matmul %311, %310, %cst_118 {dimension_numbers = #tpu.dot_dimension_numbers<[1], [1], [0], [0], [0, 0, 1, 0], [], []>} : vector<16x32xbf16>, vector<128x32xbf16>, vector<16x128xf32> -> vector<16x128xf32>
    %313 = arith.addf %312, %306 : vector<16x128xf32>
    %cst_119 = arith.constant dense<0xFF800000> : vector<16xf32>
    %314 = vector.multi_reduction <maximumf>, %313, %cst_119 [1] : vector<16x128xf32> to vector<16xf32>
    %315 = vector.shape_cast %314 : vector<16xf32> to vector<16x1xf32>
    %316 = vector.broadcast %315 : vector<16x1xf32> to vector<16x128xf32>
    %317 = arith.subf %313, %316 : vector<16x128xf32>
    %318 = math.exp %317 : vector<16x128xf32>
    %319 = vector.extract_strided_slice %318 {offsets = [0, 0], sizes = [16, 32], strides = [1, 1]} : vector<16x128xf32> to vector<16x32xf32>
    %320 = vector.extract_strided_slice %318 {offsets = [0, 0], sizes = [16, 32], strides = [1, 1]} : vector<16x128xf32> to vector<16x32xf32>
    %cst_120 = arith.constant dense<0.000000e+00> : vector<16xf32>
    %321 = vector.multi_reduction <add>, %320, %cst_120 [1] : vector<16x32xf32> to vector<16xf32>
    %322 = vector.shape_cast %321 : vector<16xf32> to vector<16x1xf32>
    %323 = vector.broadcast %322 : vector<16x1xf32> to vector<16x32xf32>
    %324 = arith.divf %319, %323 : vector<16x32xf32>
    %325 = vector.extract_strided_slice %318 {offsets = [0, 32], sizes = [16, 32], strides = [1, 1]} : vector<16x128xf32> to vector<16x32xf32>
    %326 = vector.extract_strided_slice %318 {offsets = [0, 32], sizes = [16, 32], strides = [1, 1]} : vector<16x128xf32> to vector<16x32xf32>
    %cst_121 = arith.constant dense<0.000000e+00> : vector<16xf32>
    %327 = vector.multi_reduction <add>, %326, %cst_121 [1] : vector<16x32xf32> to vector<16xf32>
    %328 = vector.shape_cast %327 : vector<16xf32> to vector<16x1xf32>
    %329 = vector.broadcast %328 : vector<16x1xf32> to vector<16x32xf32>
    %330 = arith.divf %325, %329 : vector<16x32xf32>
    %331 = vector.extract_strided_slice %318 {offsets = [0, 64], sizes = [16, 32], strides = [1, 1]} : vector<16x128xf32> to vector<16x32xf32>
    %332 = vector.extract_strided_slice %318 {offsets = [0, 64], sizes = [16, 32], strides = [1, 1]} : vector<16x128xf32> to vector<16x32xf32>
    %cst_122 = arith.constant dense<0.000000e+00> : vector<16xf32>
    %333 = vector.multi_reduction <add>, %332, %cst_122 [1] : vector<16x32xf32> to vector<16xf32>
    %334 = vector.shape_cast %333 : vector<16xf32> to vector<16x1xf32>
    %335 = vector.broadcast %334 : vector<16x1xf32> to vector<16x32xf32>
    %336 = arith.divf %331, %335 : vector<16x32xf32>
    %337 = vector.extract_strided_slice %318 {offsets = [0, 96], sizes = [16, 32], strides = [1, 1]} : vector<16x128xf32> to vector<16x32xf32>
    %338 = vector.extract_strided_slice %318 {offsets = [0, 96], sizes = [16, 32], strides = [1, 1]} : vector<16x128xf32> to vector<16x32xf32>
    %cst_123 = arith.constant dense<0.000000e+00> : vector<16xf32>
    %339 = vector.multi_reduction <add>, %338, %cst_123 [1] : vector<16x32xf32> to vector<16xf32>
    %340 = vector.shape_cast %339 : vector<16xf32> to vector<16x1xf32>
    %341 = vector.broadcast %340 : vector<16x1xf32> to vector<16x32xf32>
    %342 = arith.divf %337, %341 : vector<16x32xf32>
    %343 = tpu.concatenate %324, %330, %336, %342 in 1 : vector<16x32xf32>, vector<16x32xf32>, vector<16x32xf32>, vector<16x32xf32> -> vector<16x128xf32>
    %344 = arith.truncf %343 : vector<16x128xf32> to vector<16x128xbf16>
    %345 = arith.truncf %305 : vector<32x32xf32> to vector<32x32xbf16>
    %346 = tpu.concatenate %345, %345, %345, %345 in 0 : vector<32x32xbf16>, vector<32x32xbf16>, vector<32x32xbf16>, vector<32x32xbf16> -> vector<128x32xbf16>
    %347 = arith.mulf %346, %307 : vector<128x32xbf16>
    %cst_124 = arith.constant dense<0.000000e+00> : vector<16x32xf32>
    %348 = tpu.matmul %344, %347, %cst_124 {dimension_numbers = #tpu.dot_dimension_numbers<[1], [0], [0], [1], [0, 0, 1, 1], [], []>} : vector<16x128xbf16>, vector<128x32xbf16>, vector<16x32xf32> -> vector<16x32xf32>
    %c256 = arith.constant 256 : index
    %c0_125 = arith.constant 0 : index
    %349 = vector.load %arg5[%c256, %c0_125] : memref<800x128xbf16, #tpu.memory_space<vmem>>, vector<32x32xbf16>
    %350 = arith.truncf %348 : vector<16x32xf32> to vector<16x32xbf16>
    %cst_126 = arith.constant dense<0.000000e+00> : vector<16x32xf32>
    %351 = tpu.matmul %350, %349, %cst_126 {dimension_numbers = #tpu.dot_dimension_numbers<[1], [0], [0], [1], [0, 0, 1, 1], [], []>} : vector<16x32xbf16>, vector<32x32xbf16>, vector<16x32xf32> -> vector<16x32xf32>
    %c104 = arith.constant 104 : index
    %c0_127 = arith.constant 0 : index
    %352 = vector.load %arg6[%c104, %c0_127] : memref<360x128xf32, #tpu.memory_space<vmem>>, vector<1x32xf32>
    %353 = vector.broadcast %352 : vector<1x32xf32> to vector<16x32xf32>
    %354 = arith.addf %351, %353 : vector<16x32xf32>
    %355 = arith.addf %291, %354 : vector<16x32xf32>
    %c128_128 = arith.constant 128 : index
    %c0_129 = arith.constant 0 : index
    %356 = vector.load %arg6[%c128_128, %c0_129] : memref<360x128xf32, #tpu.memory_space<vmem>>, vector<1x32xf32>
    %c136 = arith.constant 136 : index
    %c0_130 = arith.constant 0 : index
    %357 = vector.load %arg6[%c136, %c0_130] : memref<360x128xf32, #tpu.memory_space<vmem>>, vector<1x32xf32>
    %cst_131 = arith.constant dense<0.000000e+00> : vector<16xf32>
    %358 = vector.multi_reduction <add>, %355, %cst_131 [1] : vector<16x32xf32> to vector<16xf32>
    %359 = vector.shape_cast %358 : vector<16xf32> to vector<16x1xf32>
    %cst_132 = arith.constant 3.200000e+01 : f32
    %360 = vector.broadcast %cst_132 : f32 to vector<16x1xf32>
    %361 = arith.divf %359, %360 : vector<16x1xf32>
    %362 = vector.broadcast %361 : vector<16x1xf32> to vector<16x32xf32>
    %363 = arith.subf %355, %362 : vector<16x32xf32>
    %364 = arith.mulf %363, %363 : vector<16x32xf32>
    %cst_133 = arith.constant dense<0.000000e+00> : vector<16xf32>
    %365 = vector.multi_reduction <add>, %364, %cst_133 [1] : vector<16x32xf32> to vector<16xf32>
    %366 = vector.shape_cast %365 : vector<16xf32> to vector<16x1xf32>
    %cst_134 = arith.constant 3.200000e+01 : f32
    %367 = vector.broadcast %cst_134 : f32 to vector<16x1xf32>
    %368 = arith.divf %366, %367 : vector<16x1xf32>
    %cst_135 = arith.constant 9.99999974E-6 : f32
    %369 = vector.broadcast %cst_135 : f32 to vector<16x1xf32>
    %370 = arith.addf %368, %369 : vector<16x1xf32>
    %371 = math.rsqrt %370 : vector<16x1xf32>
    %372 = vector.broadcast %371 : vector<16x1xf32> to vector<16x32xf32>
    %373 = arith.mulf %363, %372 : vector<16x32xf32>
    %374 = vector.broadcast %356 : vector<1x32xf32> to vector<16x32xf32>
    %375 = arith.mulf %373, %374 : vector<16x32xf32>
    %376 = vector.broadcast %357 : vector<1x32xf32> to vector<16x32xf32>
    %377 = arith.addf %375, %376 : vector<16x32xf32>
    %c288 = arith.constant 288 : index
    %c0_136 = arith.constant 0 : index
    %378 = vector.load %arg5[%c288, %c0_136] : memref<800x128xbf16, #tpu.memory_space<vmem>>, vector<32x64xbf16>
    %379 = arith.truncf %377 : vector<16x32xf32> to vector<16x32xbf16>
    %cst_137 = arith.constant dense<0.000000e+00> : vector<16x64xf32>
    %380 = tpu.matmul %379, %378, %cst_137 {dimension_numbers = #tpu.dot_dimension_numbers<[1], [0], [0], [1], [0, 0, 1, 1], [], []>} : vector<16x32xbf16>, vector<32x64xbf16>, vector<16x64xf32> -> vector<16x64xf32>
    %c160_138 = arith.constant 160 : index
    %c0_139 = arith.constant 0 : index
    %381 = vector.load %arg6[%c160_138, %c0_139] : memref<360x128xf32, #tpu.memory_space<vmem>>, vector<1x64xf32>
    %382 = vector.broadcast %381 : vector<1x64xf32> to vector<16x64xf32>
    %383 = arith.addf %380, %382 : vector<16x64xf32>
    %cst_140 = arith.constant 0.000000e+00 : f32
    %384 = vector.broadcast %cst_140 : f32 to vector<16x64xf32>
    %385 = arith.maximumf %383, %384 : vector<16x64xf32>
    %c320 = arith.constant 320 : index
    %c0_141 = arith.constant 0 : index
    %386 = vector.load %arg5[%c320, %c0_141] : memref<800x128xbf16, #tpu.memory_space<vmem>>, vector<64x32xbf16>
    %387 = arith.truncf %385 : vector<16x64xf32> to vector<16x64xbf16>
    %cst_142 = arith.constant dense<0.000000e+00> : vector<16x32xf32>
    %388 = tpu.matmul %387, %386, %cst_142 {dimension_numbers = #tpu.dot_dimension_numbers<[1], [0], [0], [1], [0, 0, 1, 1], [], []>} : vector<16x64xbf16>, vector<64x32xbf16>, vector<16x32xf32> -> vector<16x32xf32>
    %c168 = arith.constant 168 : index
    %c0_143 = arith.constant 0 : index
    %389 = vector.load %arg6[%c168, %c0_143] : memref<360x128xf32, #tpu.memory_space<vmem>>, vector<1x32xf32>
    %390 = vector.broadcast %389 : vector<1x32xf32> to vector<16x32xf32>
    %391 = arith.addf %388, %390 : vector<16x32xf32>
    %392 = arith.addf %377, %391 : vector<16x32xf32>
    %c144 = arith.constant 144 : index
    %c0_144 = arith.constant 0 : index
    %393 = vector.load %arg6[%c144, %c0_144] : memref<360x128xf32, #tpu.memory_space<vmem>>, vector<1x32xf32>
    %c152 = arith.constant 152 : index
    %c0_145 = arith.constant 0 : index
    %394 = vector.load %arg6[%c152, %c0_145] : memref<360x128xf32, #tpu.memory_space<vmem>>, vector<1x32xf32>
    %cst_146 = arith.constant dense<0.000000e+00> : vector<16xf32>
    %395 = vector.multi_reduction <add>, %392, %cst_146 [1] : vector<16x32xf32> to vector<16xf32>
    %396 = vector.shape_cast %395 : vector<16xf32> to vector<16x1xf32>
    %cst_147 = arith.constant 3.200000e+01 : f32
    %397 = vector.broadcast %cst_147 : f32 to vector<16x1xf32>
    %398 = arith.divf %396, %397 : vector<16x1xf32>
    %399 = vector.broadcast %398 : vector<16x1xf32> to vector<16x32xf32>
    %400 = arith.subf %392, %399 : vector<16x32xf32>
    %401 = arith.mulf %400, %400 : vector<16x32xf32>
    %cst_148 = arith.constant dense<0.000000e+00> : vector<16xf32>
    %402 = vector.multi_reduction <add>, %401, %cst_148 [1] : vector<16x32xf32> to vector<16xf32>
    %403 = vector.shape_cast %402 : vector<16xf32> to vector<16x1xf32>
    %cst_149 = arith.constant 3.200000e+01 : f32
    %404 = vector.broadcast %cst_149 : f32 to vector<16x1xf32>
    %405 = arith.divf %403, %404 : vector<16x1xf32>
    %cst_150 = arith.constant 9.99999974E-6 : f32
    %406 = vector.broadcast %cst_150 : f32 to vector<16x1xf32>
    %407 = arith.addf %405, %406 : vector<16x1xf32>
    %408 = math.rsqrt %407 : vector<16x1xf32>
    %409 = vector.broadcast %408 : vector<16x1xf32> to vector<16x32xf32>
    %410 = arith.mulf %400, %409 : vector<16x32xf32>
    %411 = vector.broadcast %393 : vector<1x32xf32> to vector<16x32xf32>
    %412 = arith.mulf %410, %411 : vector<16x32xf32>
    %413 = vector.broadcast %394 : vector<1x32xf32> to vector<16x32xf32>
    %414 = arith.addf %412, %413 : vector<16x32xf32>
    %c512 = arith.constant 512 : index
    %c0_151 = arith.constant 0 : index
    %415 = vector.load %arg5[%c512, %c0_151] : memref<800x128xbf16, #tpu.memory_space<vmem>>, vector<32x96xbf16>
    %416 = arith.truncf %414 : vector<16x32xf32> to vector<16x32xbf16>
    %cst_152 = arith.constant dense<0.000000e+00> : vector<16x96xf32>
    %417 = tpu.matmul %416, %415, %cst_152 {dimension_numbers = #tpu.dot_dimension_numbers<[1], [0], [0], [1], [0, 0, 1, 1], [], []>} : vector<16x32xbf16>, vector<32x96xbf16>, vector<16x96xf32> -> vector<16x96xf32>
    %c248 = arith.constant 248 : index
    %c0_153 = arith.constant 0 : index
    %418 = vector.load %arg6[%c248, %c0_153] : memref<360x128xf32, #tpu.memory_space<vmem>>, vector<1x96xf32>
    %419 = vector.broadcast %418 : vector<1x96xf32> to vector<16x96xf32>
    %420 = arith.addf %417, %419 : vector<16x96xf32>
    %421 = vector.extract_strided_slice %420 {offsets = [0, 0], sizes = [16, 32], strides = [1, 1]} : vector<16x96xf32> to vector<16x32xf32>
    %422 = vector.extract_strided_slice %420 {offsets = [0, 32], sizes = [16, 32], strides = [1, 1]} : vector<16x96xf32> to vector<16x32xf32>
    %423 = vector.extract_strided_slice %420 {offsets = [0, 64], sizes = [16, 32], strides = [1, 1]} : vector<16x96xf32> to vector<16x32xf32>
    %c176_154 = arith.constant 176 : index
    %c0_155 = arith.constant 0 : index
    %424 = vector.load %arg7[%c176_154, %c0_155] : memref<368x128xbf16, #tpu.memory_space<vmem>>, vector<64x32xbf16>
    %425 = arith.truncf %422 : vector<16x32xf32> to vector<16x32xbf16>
    %426 = tpu.concatenate %425, %425, %425, %425 in 0 : vector<16x32xbf16>, vector<16x32xbf16>, vector<16x32xbf16>, vector<16x32xbf16> -> vector<64x32xbf16>
    %427 = arith.mulf %426, %424 : vector<64x32xbf16>
    %428 = arith.truncf %421 : vector<16x32xf32> to vector<16x32xbf16>
    %cst_156 = arith.constant dense<0.000000e+00> : vector<16x64xf32>
    %429 = tpu.matmul %428, %427, %cst_156 {dimension_numbers = #tpu.dot_dimension_numbers<[1], [1], [0], [0], [0, 0, 1, 0], [], []>} : vector<16x32xbf16>, vector<64x32xbf16>, vector<16x64xf32> -> vector<16x64xf32>
    %430 = arith.addf %429, %211 : vector<16x64xf32>
    %cst_157 = arith.constant dense<0xFF800000> : vector<16xf32>
    %431 = vector.multi_reduction <maximumf>, %430, %cst_157 [1] : vector<16x64xf32> to vector<16xf32>
    %432 = vector.shape_cast %431 : vector<16xf32> to vector<16x1xf32>
    %433 = vector.broadcast %432 : vector<16x1xf32> to vector<16x64xf32>
    %434 = arith.subf %430, %433 : vector<16x64xf32>
    %435 = math.exp %434 : vector<16x64xf32>
    %436 = vector.extract_strided_slice %435 {offsets = [0, 0], sizes = [16, 16], strides = [1, 1]} : vector<16x64xf32> to vector<16x16xf32>
    %437 = vector.extract_strided_slice %435 {offsets = [0, 0], sizes = [16, 16], strides = [1, 1]} : vector<16x64xf32> to vector<16x16xf32>
    %cst_158 = arith.constant dense<0.000000e+00> : vector<16xf32>
    %438 = vector.multi_reduction <add>, %437, %cst_158 [1] : vector<16x16xf32> to vector<16xf32>
    %439 = vector.shape_cast %438 : vector<16xf32> to vector<16x1xf32>
    %440 = vector.broadcast %439 : vector<16x1xf32> to vector<16x16xf32>
    %441 = arith.divf %436, %440 : vector<16x16xf32>
    %442 = vector.extract_strided_slice %435 {offsets = [0, 16], sizes = [16, 16], strides = [1, 1]} : vector<16x64xf32> to vector<16x16xf32>
    %443 = vector.extract_strided_slice %435 {offsets = [0, 16], sizes = [16, 16], strides = [1, 1]} : vector<16x64xf32> to vector<16x16xf32>
    %cst_159 = arith.constant dense<0.000000e+00> : vector<16xf32>
    %444 = vector.multi_reduction <add>, %443, %cst_159 [1] : vector<16x16xf32> to vector<16xf32>
    %445 = vector.shape_cast %444 : vector<16xf32> to vector<16x1xf32>
    %446 = vector.broadcast %445 : vector<16x1xf32> to vector<16x16xf32>
    %447 = arith.divf %442, %446 : vector<16x16xf32>
    %448 = vector.extract_strided_slice %435 {offsets = [0, 32], sizes = [16, 16], strides = [1, 1]} : vector<16x64xf32> to vector<16x16xf32>
    %449 = vector.extract_strided_slice %435 {offsets = [0, 32], sizes = [16, 16], strides = [1, 1]} : vector<16x64xf32> to vector<16x16xf32>
    %cst_160 = arith.constant dense<0.000000e+00> : vector<16xf32>
    %450 = vector.multi_reduction <add>, %449, %cst_160 [1] : vector<16x16xf32> to vector<16xf32>
    %451 = vector.shape_cast %450 : vector<16xf32> to vector<16x1xf32>
    %452 = vector.broadcast %451 : vector<16x1xf32> to vector<16x16xf32>
    %453 = arith.divf %448, %452 : vector<16x16xf32>
    %454 = vector.extract_strided_slice %435 {offsets = [0, 48], sizes = [16, 16], strides = [1, 1]} : vector<16x64xf32> to vector<16x16xf32>
    %455 = vector.extract_strided_slice %435 {offsets = [0, 48], sizes = [16, 16], strides = [1, 1]} : vector<16x64xf32> to vector<16x16xf32>
    %cst_161 = arith.constant dense<0.000000e+00> : vector<16xf32>
    %456 = vector.multi_reduction <add>, %455, %cst_161 [1] : vector<16x16xf32> to vector<16xf32>
    %457 = vector.shape_cast %456 : vector<16xf32> to vector<16x1xf32>
    %458 = vector.broadcast %457 : vector<16x1xf32> to vector<16x16xf32>
    %459 = arith.divf %454, %458 : vector<16x16xf32>
    %460 = tpu.concatenate %441, %447, %453, %459 in 1 : vector<16x16xf32>, vector<16x16xf32>, vector<16x16xf32>, vector<16x16xf32> -> vector<16x64xf32>
    %461 = arith.truncf %460 : vector<16x64xf32> to vector<16x64xbf16>
    %462 = arith.truncf %423 : vector<16x32xf32> to vector<16x32xbf16>
    %463 = tpu.concatenate %462, %462, %462, %462 in 0 : vector<16x32xbf16>, vector<16x32xbf16>, vector<16x32xbf16>, vector<16x32xbf16> -> vector<64x32xbf16>
    %464 = arith.mulf %463, %424 : vector<64x32xbf16>
    %cst_162 = arith.constant dense<0.000000e+00> : vector<16x32xf32>
    %465 = tpu.matmul %461, %464, %cst_162 {dimension_numbers = #tpu.dot_dimension_numbers<[1], [0], [0], [1], [0, 0, 1, 1], [], []>} : vector<16x64xbf16>, vector<64x32xbf16>, vector<16x32xf32> -> vector<16x32xf32>
    %c544 = arith.constant 544 : index
    %c0_163 = arith.constant 0 : index
    %466 = vector.load %arg5[%c544, %c0_163] : memref<800x128xbf16, #tpu.memory_space<vmem>>, vector<32x32xbf16>
    %467 = arith.truncf %465 : vector<16x32xf32> to vector<16x32xbf16>
    %cst_164 = arith.constant dense<0.000000e+00> : vector<16x32xf32>
    %468 = tpu.matmul %467, %466, %cst_164 {dimension_numbers = #tpu.dot_dimension_numbers<[1], [0], [0], [1], [0, 0, 1, 1], [], []>} : vector<16x32xbf16>, vector<32x32xbf16>, vector<16x32xf32> -> vector<16x32xf32>
    %c256_165 = arith.constant 256 : index
    %c0_166 = arith.constant 0 : index
    %469 = vector.load %arg6[%c256_165, %c0_166] : memref<360x128xf32, #tpu.memory_space<vmem>>, vector<1x32xf32>
    %470 = vector.broadcast %469 : vector<1x32xf32> to vector<16x32xf32>
    %471 = arith.addf %468, %470 : vector<16x32xf32>
    %472 = arith.addf %414, %471 : vector<16x32xf32>
    %c288_167 = arith.constant 288 : index
    %c0_168 = arith.constant 0 : index
    %473 = vector.load %arg6[%c288_167, %c0_168] : memref<360x128xf32, #tpu.memory_space<vmem>>, vector<1x32xf32>
    %c296 = arith.constant 296 : index
    %c0_169 = arith.constant 0 : index
    %474 = vector.load %arg6[%c296, %c0_169] : memref<360x128xf32, #tpu.memory_space<vmem>>, vector<1x32xf32>
    %cst_170 = arith.constant dense<0.000000e+00> : vector<16xf32>
    %475 = vector.multi_reduction <add>, %472, %cst_170 [1] : vector<16x32xf32> to vector<16xf32>
    %476 = vector.shape_cast %475 : vector<16xf32> to vector<16x1xf32>
    %cst_171 = arith.constant 3.200000e+01 : f32
    %477 = vector.broadcast %cst_171 : f32 to vector<16x1xf32>
    %478 = arith.divf %476, %477 : vector<16x1xf32>
    %479 = vector.broadcast %478 : vector<16x1xf32> to vector<16x32xf32>
    %480 = arith.subf %472, %479 : vector<16x32xf32>
    %481 = arith.mulf %480, %480 : vector<16x32xf32>
    %cst_172 = arith.constant dense<0.000000e+00> : vector<16xf32>
    %482 = vector.multi_reduction <add>, %481, %cst_172 [1] : vector<16x32xf32> to vector<16xf32>
    %483 = vector.shape_cast %482 : vector<16xf32> to vector<16x1xf32>
    %cst_173 = arith.constant 3.200000e+01 : f32
    %484 = vector.broadcast %cst_173 : f32 to vector<16x1xf32>
    %485 = arith.divf %483, %484 : vector<16x1xf32>
    %cst_174 = arith.constant 9.99999974E-6 : f32
    %486 = vector.broadcast %cst_174 : f32 to vector<16x1xf32>
    %487 = arith.addf %485, %486 : vector<16x1xf32>
    %488 = math.rsqrt %487 : vector<16x1xf32>
    %489 = vector.broadcast %488 : vector<16x1xf32> to vector<16x32xf32>
    %490 = arith.mulf %480, %489 : vector<16x32xf32>
    %491 = vector.broadcast %473 : vector<1x32xf32> to vector<16x32xf32>
    %492 = arith.mulf %490, %491 : vector<16x32xf32>
    %493 = vector.broadcast %474 : vector<1x32xf32> to vector<16x32xf32>
    %494 = arith.addf %492, %493 : vector<16x32xf32>
    %c576 = arith.constant 576 : index
    %c0_175 = arith.constant 0 : index
    %495 = vector.load %arg5[%c576, %c0_175] : memref<800x128xbf16, #tpu.memory_space<vmem>>, vector<32x32xbf16>
    %496 = arith.truncf %494 : vector<16x32xf32> to vector<16x32xbf16>
    %cst_176 = arith.constant dense<0.000000e+00> : vector<16x32xf32>
    %497 = tpu.matmul %496, %495, %cst_176 {dimension_numbers = #tpu.dot_dimension_numbers<[1], [0], [0], [1], [0, 0, 1, 1], [], []>} : vector<16x32xbf16>, vector<32x32xbf16>, vector<16x32xf32> -> vector<16x32xf32>
    %c264 = arith.constant 264 : index
    %c0_177 = arith.constant 0 : index
    %498 = vector.load %arg6[%c264, %c0_177] : memref<360x128xf32, #tpu.memory_space<vmem>>, vector<1x32xf32>
    %499 = vector.broadcast %498 : vector<1x32xf32> to vector<16x32xf32>
    %500 = arith.addf %497, %499 : vector<16x32xf32>
    %c608 = arith.constant 608 : index
    %c0_178 = arith.constant 0 : index
    %501 = vector.load %arg5[%c608, %c0_178] : memref<800x128xbf16, #tpu.memory_space<vmem>>, vector<32x64xbf16>
    %502 = arith.truncf %209 : vector<16x32xf32> to vector<16x32xbf16>
    %cst_179 = arith.constant dense<0.000000e+00> : vector<16x64xf32>
    %503 = tpu.matmul %502, %501, %cst_179 {dimension_numbers = #tpu.dot_dimension_numbers<[1], [0], [0], [1], [0, 0, 1, 1], [], []>} : vector<16x32xbf16>, vector<32x64xbf16>, vector<16x64xf32> -> vector<16x64xf32>
    %c272 = arith.constant 272 : index
    %c0_180 = arith.constant 0 : index
    %504 = vector.load %arg6[%c272, %c0_180] : memref<360x128xf32, #tpu.memory_space<vmem>>, vector<1x64xf32>
    %505 = vector.broadcast %504 : vector<1x64xf32> to vector<16x64xf32>
    %506 = arith.addf %503, %505 : vector<16x64xf32>
    %507 = vector.extract_strided_slice %506 {offsets = [0, 0], sizes = [16, 32], strides = [1, 1]} : vector<16x64xf32> to vector<16x32xf32>
    %508 = vector.extract_strided_slice %506 {offsets = [0, 32], sizes = [16, 32], strides = [1, 1]} : vector<16x64xf32> to vector<16x32xf32>
    %c16_181 = arith.constant 16 : index
    %c0_182 = arith.constant 0 : index
    %509 = vector.load %arg4[%c16_181, %c0_182] : memref<32x128xf32, #tpu.memory_space<vmem>>, vector<16x64xf32>
    %c176_183 = arith.constant 176 : index
    %c0_184 = arith.constant 0 : index
    %510 = vector.load %arg7[%c176_183, %c0_184] : memref<368x128xbf16, #tpu.memory_space<vmem>>, vector<64x32xbf16>
    %511 = arith.truncf %507 : vector<16x32xf32> to vector<16x32xbf16>
    %512 = tpu.concatenate %511, %511, %511, %511 in 0 : vector<16x32xbf16>, vector<16x32xbf16>, vector<16x32xbf16>, vector<16x32xbf16> -> vector<64x32xbf16>
    %513 = arith.mulf %512, %510 : vector<64x32xbf16>
    %514 = arith.truncf %500 : vector<16x32xf32> to vector<16x32xbf16>
    %cst_185 = arith.constant dense<0.000000e+00> : vector<16x64xf32>
    %515 = tpu.matmul %514, %513, %cst_185 {dimension_numbers = #tpu.dot_dimension_numbers<[1], [1], [0], [0], [0, 0, 1, 0], [], []>} : vector<16x32xbf16>, vector<64x32xbf16>, vector<16x64xf32> -> vector<16x64xf32>
    %516 = arith.addf %515, %509 : vector<16x64xf32>
    %cst_186 = arith.constant dense<0xFF800000> : vector<16xf32>
    %517 = vector.multi_reduction <maximumf>, %516, %cst_186 [1] : vector<16x64xf32> to vector<16xf32>
    %518 = vector.shape_cast %517 : vector<16xf32> to vector<16x1xf32>
    %519 = vector.broadcast %518 : vector<16x1xf32> to vector<16x64xf32>
    %520 = arith.subf %516, %519 : vector<16x64xf32>
    %521 = math.exp %520 : vector<16x64xf32>
    %522 = vector.extract_strided_slice %521 {offsets = [0, 0], sizes = [16, 16], strides = [1, 1]} : vector<16x64xf32> to vector<16x16xf32>
    %523 = vector.extract_strided_slice %521 {offsets = [0, 0], sizes = [16, 16], strides = [1, 1]} : vector<16x64xf32> to vector<16x16xf32>
    %cst_187 = arith.constant dense<0.000000e+00> : vector<16xf32>
    %524 = vector.multi_reduction <add>, %523, %cst_187 [1] : vector<16x16xf32> to vector<16xf32>
    %525 = vector.shape_cast %524 : vector<16xf32> to vector<16x1xf32>
    %526 = vector.broadcast %525 : vector<16x1xf32> to vector<16x16xf32>
    %527 = arith.divf %522, %526 : vector<16x16xf32>
    %528 = vector.extract_strided_slice %521 {offsets = [0, 16], sizes = [16, 16], strides = [1, 1]} : vector<16x64xf32> to vector<16x16xf32>
    %529 = vector.extract_strided_slice %521 {offsets = [0, 16], sizes = [16, 16], strides = [1, 1]} : vector<16x64xf32> to vector<16x16xf32>
    %cst_188 = arith.constant dense<0.000000e+00> : vector<16xf32>
    %530 = vector.multi_reduction <add>, %529, %cst_188 [1] : vector<16x16xf32> to vector<16xf32>
    %531 = vector.shape_cast %530 : vector<16xf32> to vector<16x1xf32>
    %532 = vector.broadcast %531 : vector<16x1xf32> to vector<16x16xf32>
    %533 = arith.divf %528, %532 : vector<16x16xf32>
    %534 = vector.extract_strided_slice %521 {offsets = [0, 32], sizes = [16, 16], strides = [1, 1]} : vector<16x64xf32> to vector<16x16xf32>
    %535 = vector.extract_strided_slice %521 {offsets = [0, 32], sizes = [16, 16], strides = [1, 1]} : vector<16x64xf32> to vector<16x16xf32>
    %cst_189 = arith.constant dense<0.000000e+00> : vector<16xf32>
    %536 = vector.multi_reduction <add>, %535, %cst_189 [1] : vector<16x16xf32> to vector<16xf32>
    %537 = vector.shape_cast %536 : vector<16xf32> to vector<16x1xf32>
    %538 = vector.broadcast %537 : vector<16x1xf32> to vector<16x16xf32>
    %539 = arith.divf %534, %538 : vector<16x16xf32>
    %540 = vector.extract_strided_slice %521 {offsets = [0, 48], sizes = [16, 16], strides = [1, 1]} : vector<16x64xf32> to vector<16x16xf32>
    %541 = vector.extract_strided_slice %521 {offsets = [0, 48], sizes = [16, 16], strides = [1, 1]} : vector<16x64xf32> to vector<16x16xf32>
    %cst_190 = arith.constant dense<0.000000e+00> : vector<16xf32>
    %542 = vector.multi_reduction <add>, %541, %cst_190 [1] : vector<16x16xf32> to vector<16xf32>
    %543 = vector.shape_cast %542 : vector<16xf32> to vector<16x1xf32>
    %544 = vector.broadcast %543 : vector<16x1xf32> to vector<16x16xf32>
    %545 = arith.divf %540, %544 : vector<16x16xf32>
    %546 = tpu.concatenate %527, %533, %539, %545 in 1 : vector<16x16xf32>, vector<16x16xf32>, vector<16x16xf32>, vector<16x16xf32> -> vector<16x64xf32>
    %547 = arith.truncf %546 : vector<16x64xf32> to vector<16x64xbf16>
    %548 = arith.truncf %508 : vector<16x32xf32> to vector<16x32xbf16>
    %549 = tpu.concatenate %548, %548, %548, %548 in 0 : vector<16x32xbf16>, vector<16x32xbf16>, vector<16x32xbf16>, vector<16x32xbf16> -> vector<64x32xbf16>
    %550 = arith.mulf %549, %510 : vector<64x32xbf16>
    %cst_191 = arith.constant dense<0.000000e+00> : vector<16x32xf32>
    %551 = tpu.matmul %547, %550, %cst_191 {dimension_numbers = #tpu.dot_dimension_numbers<[1], [0], [0], [1], [0, 0, 1, 1], [], []>} : vector<16x64xbf16>, vector<64x32xbf16>, vector<16x32xf32> -> vector<16x32xf32>
    %c640 = arith.constant 640 : index
    %c0_192 = arith.constant 0 : index
    %552 = vector.load %arg5[%c640, %c0_192] : memref<800x128xbf16, #tpu.memory_space<vmem>>, vector<32x32xbf16>
    %553 = arith.truncf %551 : vector<16x32xf32> to vector<16x32xbf16>
    %cst_193 = arith.constant dense<0.000000e+00> : vector<16x32xf32>
    %554 = tpu.matmul %553, %552, %cst_193 {dimension_numbers = #tpu.dot_dimension_numbers<[1], [0], [0], [1], [0, 0, 1, 1], [], []>} : vector<16x32xbf16>, vector<32x32xbf16>, vector<16x32xf32> -> vector<16x32xf32>
    %c280 = arith.constant 280 : index
    %c0_194 = arith.constant 0 : index
    %555 = vector.load %arg6[%c280, %c0_194] : memref<360x128xf32, #tpu.memory_space<vmem>>, vector<1x32xf32>
    %556 = vector.broadcast %555 : vector<1x32xf32> to vector<16x32xf32>
    %557 = arith.addf %554, %556 : vector<16x32xf32>
    %558 = arith.addf %494, %557 : vector<16x32xf32>
    %c304 = arith.constant 304 : index
    %c0_195 = arith.constant 0 : index
    %559 = vector.load %arg6[%c304, %c0_195] : memref<360x128xf32, #tpu.memory_space<vmem>>, vector<1x32xf32>
    %c312 = arith.constant 312 : index
    %c0_196 = arith.constant 0 : index
    %560 = vector.load %arg6[%c312, %c0_196] : memref<360x128xf32, #tpu.memory_space<vmem>>, vector<1x32xf32>
    %cst_197 = arith.constant dense<0.000000e+00> : vector<16xf32>
    %561 = vector.multi_reduction <add>, %558, %cst_197 [1] : vector<16x32xf32> to vector<16xf32>
    %562 = vector.shape_cast %561 : vector<16xf32> to vector<16x1xf32>
    %cst_198 = arith.constant 3.200000e+01 : f32
    %563 = vector.broadcast %cst_198 : f32 to vector<16x1xf32>
    %564 = arith.divf %562, %563 : vector<16x1xf32>
    %565 = vector.broadcast %564 : vector<16x1xf32> to vector<16x32xf32>
    %566 = arith.subf %558, %565 : vector<16x32xf32>
    %567 = arith.mulf %566, %566 : vector<16x32xf32>
    %cst_199 = arith.constant dense<0.000000e+00> : vector<16xf32>
    %568 = vector.multi_reduction <add>, %567, %cst_199 [1] : vector<16x32xf32> to vector<16xf32>
    %569 = vector.shape_cast %568 : vector<16xf32> to vector<16x1xf32>
    %cst_200 = arith.constant 3.200000e+01 : f32
    %570 = vector.broadcast %cst_200 : f32 to vector<16x1xf32>
    %571 = arith.divf %569, %570 : vector<16x1xf32>
    %cst_201 = arith.constant 9.99999974E-6 : f32
    %572 = vector.broadcast %cst_201 : f32 to vector<16x1xf32>
    %573 = arith.addf %571, %572 : vector<16x1xf32>
    %574 = math.rsqrt %573 : vector<16x1xf32>
    %575 = vector.broadcast %574 : vector<16x1xf32> to vector<16x32xf32>
    %576 = arith.mulf %566, %575 : vector<16x32xf32>
    %577 = vector.broadcast %559 : vector<1x32xf32> to vector<16x32xf32>
    %578 = arith.mulf %576, %577 : vector<16x32xf32>
    %579 = vector.broadcast %560 : vector<1x32xf32> to vector<16x32xf32>
    %580 = arith.addf %578, %579 : vector<16x32xf32>
    %c672 = arith.constant 672 : index
    %c0_202 = arith.constant 0 : index
    %581 = vector.load %arg5[%c672, %c0_202] : memref<800x128xbf16, #tpu.memory_space<vmem>>, vector<32x64xbf16>
    %582 = arith.truncf %580 : vector<16x32xf32> to vector<16x32xbf16>
    %cst_203 = arith.constant dense<0.000000e+00> : vector<16x64xf32>
    %583 = tpu.matmul %582, %581, %cst_203 {dimension_numbers = #tpu.dot_dimension_numbers<[1], [0], [0], [1], [0, 0, 1, 1], [], []>} : vector<16x32xbf16>, vector<32x64xbf16>, vector<16x64xf32> -> vector<16x64xf32>
    %c336 = arith.constant 336 : index
    %c0_204 = arith.constant 0 : index
    %584 = vector.load %arg6[%c336, %c0_204] : memref<360x128xf32, #tpu.memory_space<vmem>>, vector<1x64xf32>
    %585 = vector.broadcast %584 : vector<1x64xf32> to vector<16x64xf32>
    %586 = arith.addf %583, %585 : vector<16x64xf32>
    %cst_205 = arith.constant 0.000000e+00 : f32
    %587 = vector.broadcast %cst_205 : f32 to vector<16x64xf32>
    %588 = arith.maximumf %586, %587 : vector<16x64xf32>
    %c704 = arith.constant 704 : index
    %c0_206 = arith.constant 0 : index
    %589 = vector.load %arg5[%c704, %c0_206] : memref<800x128xbf16, #tpu.memory_space<vmem>>, vector<64x32xbf16>
    %590 = arith.truncf %588 : vector<16x64xf32> to vector<16x64xbf16>
    %cst_207 = arith.constant dense<0.000000e+00> : vector<16x32xf32>
    %591 = tpu.matmul %590, %589, %cst_207 {dimension_numbers = #tpu.dot_dimension_numbers<[1], [0], [0], [1], [0, 0, 1, 1], [], []>} : vector<16x64xbf16>, vector<64x32xbf16>, vector<16x32xf32> -> vector<16x32xf32>
    %c344 = arith.constant 344 : index
    %c0_208 = arith.constant 0 : index
    %592 = vector.load %arg6[%c344, %c0_208] : memref<360x128xf32, #tpu.memory_space<vmem>>, vector<1x32xf32>
    %593 = vector.broadcast %592 : vector<1x32xf32> to vector<16x32xf32>
    %594 = arith.addf %591, %593 : vector<16x32xf32>
    %595 = arith.addf %580, %594 : vector<16x32xf32>
    %c320_209 = arith.constant 320 : index
    %c0_210 = arith.constant 0 : index
    %596 = vector.load %arg6[%c320_209, %c0_210] : memref<360x128xf32, #tpu.memory_space<vmem>>, vector<1x32xf32>
    %c328 = arith.constant 328 : index
    %c0_211 = arith.constant 0 : index
    %597 = vector.load %arg6[%c328, %c0_211] : memref<360x128xf32, #tpu.memory_space<vmem>>, vector<1x32xf32>
    %cst_212 = arith.constant dense<0.000000e+00> : vector<16xf32>
    %598 = vector.multi_reduction <add>, %595, %cst_212 [1] : vector<16x32xf32> to vector<16xf32>
    %599 = vector.shape_cast %598 : vector<16xf32> to vector<16x1xf32>
    %cst_213 = arith.constant 3.200000e+01 : f32
    %600 = vector.broadcast %cst_213 : f32 to vector<16x1xf32>
    %601 = arith.divf %599, %600 : vector<16x1xf32>
    %602 = vector.broadcast %601 : vector<16x1xf32> to vector<16x32xf32>
    %603 = arith.subf %595, %602 : vector<16x32xf32>
    %604 = arith.mulf %603, %603 : vector<16x32xf32>
    %cst_214 = arith.constant dense<0.000000e+00> : vector<16xf32>
    %605 = vector.multi_reduction <add>, %604, %cst_214 [1] : vector<16x32xf32> to vector<16xf32>
    %606 = vector.shape_cast %605 : vector<16xf32> to vector<16x1xf32>
    %cst_215 = arith.constant 3.200000e+01 : f32
    %607 = vector.broadcast %cst_215 : f32 to vector<16x1xf32>
    %608 = arith.divf %606, %607 : vector<16x1xf32>
    %cst_216 = arith.constant 9.99999974E-6 : f32
    %609 = vector.broadcast %cst_216 : f32 to vector<16x1xf32>
    %610 = arith.addf %608, %609 : vector<16x1xf32>
    %611 = math.rsqrt %610 : vector<16x1xf32>
    %612 = vector.broadcast %611 : vector<16x1xf32> to vector<16x32xf32>
    %613 = arith.mulf %603, %612 : vector<16x32xf32>
    %614 = vector.broadcast %596 : vector<1x32xf32> to vector<16x32xf32>
    %615 = arith.mulf %613, %614 : vector<16x32xf32>
    %616 = vector.broadcast %597 : vector<1x32xf32> to vector<16x32xf32>
    %617 = arith.addf %615, %616 : vector<16x32xf32>
    %c768 = arith.constant 768 : index
    %c0_217 = arith.constant 0 : index
    %618 = vector.load %arg5[%c768, %c0_217] : memref<800x128xbf16, #tpu.memory_space<vmem>>, vector<32x128xbf16>
    %619 = arith.truncf %617 : vector<16x32xf32> to vector<16x32xbf16>
    %cst_218 = arith.constant dense<0.000000e+00> : vector<16x128xf32>
    %620 = tpu.matmul %619, %618, %cst_218 {dimension_numbers = #tpu.dot_dimension_numbers<[1], [0], [0], [1], [0, 0, 1, 1], [], []>} : vector<16x32xbf16>, vector<32x128xbf16>, vector<16x128xf32> -> vector<16x128xf32>
    %c352 = arith.constant 352 : index
    %c0_219 = arith.constant 0 : index
    %621 = vector.load %arg6[%c352, %c0_219] : memref<360x128xf32, #tpu.memory_space<vmem>>, vector<1x128xf32>
    %622 = vector.broadcast %621 : vector<1x128xf32> to vector<16x128xf32>
    %623 = arith.addf %620, %622 : vector<16x128xf32>
    %c0_220 = arith.constant 0 : index
    %c0_221 = arith.constant 0 : index
    %624 = vector.load %arg8[%c0_220, %c0_221] : memref<16x128xf32, #tpu.memory_space<vmem>>, vector<16x128xf32>
    tpu.vector_store %arg8[%c0_220, %c0_221], %623 {strides = array<i32>} : memref<16x128xf32, #tpu.memory_space<vmem>>, vector<16x128xf32>,
    return
  }
  func.func @transform_0(%arg0: i32) -> (i32, i32) {
    %c0_i32 = arith.constant 0 : i32
    %c0_i32_0 = arith.constant 0 : i32
    %c0_i32_1 = arith.constant 0 : i32
    return %c0_i32, %c0_i32_0 : i32, i32
  }
  func.func @transform_1(%arg0: i32) -> (i32, i32) {
    %c0_i32 = arith.constant 0 : i32
    %c0_i32_0 = arith.constant 0 : i32
    %c0_i32_1 = arith.constant 0 : i32
    return %c0_i32, %c0_i32_0 : i32, i32
  }
  func.func @transform_2(%arg0: i32) -> (i32, i32) {
    %c0_i32 = arith.constant 0 : i32
    %c0_i32_0 = arith.constant 0 : i32
    %c0_i32_1 = arith.constant 0 : i32
    return %c0_i32, %c0_i32_0 : i32, i32
  }
  func.func @transform_3(%arg0: i32) -> (i32, i32) {
    %c0_i32 = arith.constant 0 : i32
    %c0_i32_0 = arith.constant 0 : i32
    %c0_i32_1 = arith.constant 0 : i32
    return %c0_i32, %c0_i32_0 : i32, i32
  }
  func.func @transform_4(%arg0: i32) -> (i32, i32) {
    %c0_i32 = arith.constant 0 : i32
    %c0_i32_0 = arith.constant 0 : i32
    %c0_i32_1 = arith.constant 0 : i32
    return %c0_i32, %c0_i32_0 : i32, i32
  }
  func.func @transform_5(%arg0: i32) -> (i32, i32) {
    %c0_i32 = arith.constant 0 : i32
    %c0_i32_0 = arith.constant 0 : i32
    %c0_i32_1 = arith.constant 0 : i32
    return %c0_i32, %c0_i32_0 : i32, i32
  }
  func.func @transform_6(%arg0: i32) -> (i32, i32) {
    %c0_i32 = arith.constant 0 : i32
    %c0_i32_0 = arith.constant 0 : i32
    %c0_i32_1 = arith.constant 0 : i32
    return %c0_i32, %c0_i32_0 : i32, i32
  }
  func.func @transform_7(%arg0: i32) -> (i32, i32) {
    %c0_i32 = arith.constant 0 : i32
    %c0_i32_0 = arith.constant 0 : i32
    %c0_i32_1 = arith.constant 0 : i32
    return %c0_i32, %c0_i32_0 : i32, i32
  }
}

</mosaic_0001>

<bundles_post_ra>
// kernel: forward.1
= control target key start
LH: loop header
LB: loop body
LE: loop exit
PB: predicated region body
PF: predicated region fallthrough
CT: control target
= control target key end

     0   :  { %vm69_vm0 = vcmask 261120   ;;  %vm517_vm1 = vcmask 523264   ;;  %vm1238_vm2 = vcmask 785408   ;;  %vm4809_vm3 = vmmov 0   ;;  %s4810_s26 = smov 32   ;;  %s4811_s20 = smov 96   ;;  %s6063_s0 = inlined_call_operand.vmem [shape: f32[32,32], index: 0, kind: input, shape index: {}]   ;;  %s6064_s6 = inlined_call_operand.vmem [shape: bf16[368,128], index: 6, kind: input, shape index: {}]   ;;  %s6065_s4 = inlined_call_operand.vmem [shape: bf16[800,128], index: 4, kind: input, shape index: {}]   ;;  %s6066_s5 = inlined_call_operand.vmem [shape: f32[360,128], index: 5, kind: input, shape index: {}]   ;;  %s6067_s1 = inlined_call_operand.vmem [shape: f32[16,32], index: 1, kind: input, shape index: {}]   ;;  %s6068_s2 = inlined_call_operand.vmem [shape: f32[16,64], index: 2, kind: input, shape index: {}]   ;;  %s6069_s3 = inlined_call_operand.vmem [shape: f32[32,128], index: 3, kind: input, shape index: {}]   ;;  %s6070_s7 = inlined_call_operand.vmem [shape: f32[16,128], index: 7, kind: output, shape index: {}]  }
   0x1   :  { %v27_v0 = vld [vmem:[%s6063_s0] sm:$0xff]  ;;  %v4861_v1 = vld [vmem:[%s6063_s0 + $0x8] sm:$0xff]  ;;  %v29_v2 = vld [vmem:[%s6063_s0 + $0x10] sm:$0xff]  ;;  %s4812_s9 = smov 64   ;;  %s4813_s10 = smov 112   ;;  %vm1720_vm4 = vcmask 130048  }
   0x2   :  { %v47_v3 = vpack.c.bf16 %v4861_v1, %v27_v0  ;;  %v30_v4 = vld [vmem:[%s6063_s0 + $0x18] sm:$0xff]  ;;  %v4873_v6 = vld [vmem:[%s6064_s6] sm:$0xff]   ;;  %v4880_v7 = vld [vmem:[%s6064_s6 + $0x8] sm:$0xff]   ;;  %s4814_s11 = smov 80   ;;  %vm1785_vm5 = vcmask 392192  }
   0x3   :  { %v48_v5 = vpack.c.bf16 %v30_v4, %v29_v2  ;;  %4190 = vmatprep.mubr.msk.bf16.mxu0 %vm69_vm0, %v4873_v6  ;;  %v4885_v8 = vld [vmem:[%s6064_s6 + $0x10] sm:$0xff]   ;;  %v4890_v9 = vld [vmem:[%s6064_s6 + $0x20] sm:$0xff]   ;;  %v4901_v10 = vld [vmem:[%s6064_s6 + $0x18] sm:$0xff]  }
   0x4   :  { %4186 = vmatprep.subr.bf16.mxu0 %v47_v3  ;;  %4198 = vmatprep.subr.bf16.mxu1 %v4890_v9  ;;  %v4908_v11 = vld [vmem:[%s6064_s6 + $0x28] sm:$0xff]   ;;  %v4915_v12 = vld [vmem:[%s6064_s6 + $0x30] sm:$0xff]   ;;  %v4921_v19 = vld [vmem:[%s6064_s6 + $0x38] sm:$0xff]  }
   0x5   :  { %4187 = vmatpush3.bf16.msra.mxu0 %v47_v3  ;;  %4199 = vmatpush3.bf16.msra.mxu1 %v4890_v9  ;;  %v4586_v3 = vld [vmem:[%s6065_s4 + $0x8] sm:$0xff]  }
   0x6   :  { %4188 = vmatprep.subr.bf16.mxu0 %v48_v5  ;;  %4200 = vmatprep.subr.bf16.mxu1 %v4908_v11 }
   0x9   :  { %4189 = vmatpush3.bf16.msra.mxu0 %v48_v5  ;;  %4201 = vmatpush3.bf16.msra.mxu1 %v4908_v11 }
   0xa   :  { %4206 = vmatprep.subr.bf16.mxu1 %v4915_v12 }
   0xc   :  { %4191 = vmatmul.mubr.msk.bf16.vlgmr.msra.gmra.mrb[0].mxu0 %vm69_vm0, %v4880_v7 }
   0xd   :  { %4194 = vmatprep.mubr.msk.bf16.mxu0 %vm69_vm0, %v4885_v8 }
  0x14   :  { %4195 = vmatmul.mubr.msk.bf16.gmra.mrb[4].mxu0 %vm69_vm0, %v4901_v10 }
  0xdf   :  { %v4192_v13 = vpop.f32.mrb[0].mxu0 }
  0xe0   :  { %v116_v14 = vpop.f32.mrb[1].mxu0 }
  0xe1   :  { %v4193_v15 = vpop.f32.mrb[2].mxu0 }
  0xe2   :  { %v148_v16 = vpack.c.bf16 %v4193_v15, %v4192_v13  ;;  %v119_v17 = vpop.f32.mrb[3].mxu0 }
  0xe3   :  { %v147_v18 = vpack.c.bf16 %v119_v17, %v116_v14 }
  0xe5   :  { %4202 = vmatprep.mubr.msk.bf16.mxu1 %vm69_vm0, %v147_v18 }
  0xe6   :  { %4203 = vmatmul.mubr.msk.bf16.vlgmr.msra.gmra.mrb[0].mxu1 %vm69_vm0, %v148_v16 }
  0xe7   :  { %v4196_v20 = vpop.f32.mrb[4].mxu0  ;;  %4207 = vmatpush3.bf16.msra.mxu1 %v4915_v12 }
  0xe8   :  { %v132_v21 = vpop.f32.mrb[5].mxu0  ;;  %4208 = vmatprep.subr.bf16.mxu1 %v4921_v19 }
  0xe9   :  { %v4197_v22 = vpop.f32.mrb[6].mxu0 }
  0xea   :  { %v217_v23 = vpack.c.bf16 %v4197_v22, %v4196_v20  ;;  %v135_v24 = vpop.f32.mrb[7].mxu0 }
  0xeb   :  { %v216_v25 = vpack.c.bf16 %v135_v24, %v132_v21  ;;  %4209 = vmatpush3.bf16.msra.mxu1 %v4921_v19 }
  0xed   :  { %4210 = vmatprep.mubr.msk.bf16.mxu1 %vm69_vm0, %v216_v25 }
  0xee   :  { %4211 = vmatmul.mubr.msk.bf16.vlgmr.msra.gmra.mrb[4].mxu1 %vm69_vm0, %v217_v23 }
 0x1b9   :  { %v4204_v26 = vpop.f32.mrb[0].mxu1 }
 0x1ba   :  { %v201_v27 = vpop.f32.mrb[1].mxu1 }
 0x1bb   :  { %v4205_v28 = vpop.f32.mrb[2].mxu1 }
 0x1bc   :  { %v204_v29 = vpop.f32.mrb[3].mxu1 }
 0x1c1   :  { %v4212_v30 = vpop.f32.mrb[4].mxu1 }
 0x1c2   :  { %v287_v31 = vsub.f32 %v4204_v26, %v4212_v30  ;;  %v270_v32 = vpop.f32.mrb[5].mxu1  ;;  %v3865_v26 = vld [vmem:[%s6066_s5] ss:$0 sm:$0xff] }
 0x1c3   :  { %v285_v33 = vsub.f32 %v201_v27, %v270_v32  ;;  %v4213_v34 = vpop.f32.mrb[6].mxu1  ;;  %v3866_v32 = vld [vmem:[%s6066_s5 + $0x8] ss:$0 sm:$0xff] }
 0x1c4   :  { %v288_v35 = vsub.f32 %v4205_v28, %v4213_v34  ;;  %v273_v36 = vpop.f32.mrb[7].mxu1  ;;  %v291_v37 = vadd.f32 %v287_v31, %v29_v2  ;;  %v4585_v2 = vld [vmem:[%s6065_s4] sm:$0xff]  }
 0x1c5   :  { %v286_v38 = vsub.f32 %v204_v29, %v273_v36  ;;  %v289_v39 = vadd.f32 %v285_v33, %v27_v0  ;;  %4214 = vmatprep.subr.bf16.mxu0 %v4585_v2 }
 0x1c6   :  { %v301_v40 = vsel %vm69_vm0, %v291_v37, 0.0  ;;  %v292_v41 = vadd.f32 %v288_v35, %v30_v4  ;;  %4215 = vmatpush3.bf16.msra.mxu0 %v4585_v2 }
 0x1c7   :  { %302 = vadd.xlane.f32.xlu1 %v301_v40  ;;  %v295_v42 = vsel %vm69_vm0, %v289_v39, 0.0  ;;  %v290_v43 = vadd.f32 %v286_v38, %v4861_v1  ;;  %4216 = vmatprep.subr.bf16.mxu0 %v4586_v3 }
 0x1c8   :  { %296 = vadd.xlane.f32.xlu0 %v295_v42  ;;  %v304_v44 = vsel %vm69_vm0, %v292_v41, 0.0 }
 0x1c9   :  { %v298_v45 = vsel %vm69_vm0, %v290_v43, 0.0 }
 0x1ca   :  { %4217 = vmatpush3.bf16.msra.mxu0 %v4586_v3 }
 0x1cb   :  { %305 = vadd.xlane.f32.xlu1 %v304_v44  ;;  %v4587_v44 = vld [vmem:[%s6065_s4 + $0x10] sm:$0xff]  }
 0x1cc   :  { %299 = vadd.xlane.f32.xlu0 %v298_v45  ;;  %4222 = vmatprep.subr.bf16.mxu1 %v4587_v44  ;;  %v4588_v45 = vld [vmem:[%s6065_s4 + $0x18] sm:$0xff]  }
 0x1cd   :  { %4223 = vmatpush3.bf16.msra.mxu1 %v4587_v44 }
 0x1ce   :  { %4224 = vmatprep.subr.bf16.mxu1 %v4588_v45 }
 0x1d1   :  { %4225 = vmatpush3.bf16.msra.mxu1 %v4588_v45 }
 0x254   :  { %v303_v46 = vpop.xlane.xlu1 %302 }
 0x255   :  { %v310_v47 = vmul.f32 0.03125, %v303_v46  ;;  %v297_v48 = vpop.xlane.xlu0 %296  ;;  %v4589_v46 = vld [vmem:[%s6065_s4 + $0x20] sm:$0xff]  }
 0x256   :  { %v308_v49 = vmul.f32 0.03125, %v297_v48  ;;  %4226 = vmatprep.subr.bf16.mxu1 %v4589_v46 }
 0x257   :  { %v314_v50 = vsub.f32 %v291_v37, %v310_v47  ;;  %4227 = vmatpush3.bf16.msra.mxu1 %v4589_v46  ;;  %v3867_v47 = vld [vmem:[%s6066_s5 + $0x20] ss:$0 sm:$0xff] }
 0x258   :  { %v312_v51 = vsub.f32 %v289_v39, %v308_v49  ;;  %v306_v52 = vpop.xlane.xlu1 %305 }
 0x259   :  { %v311_v53 = vmul.f32 0.03125, %v306_v52  ;;  %v300_v54 = vpop.xlane.xlu0 %299  ;;  %v318_v60 = vmul.f32 %v314_v50, %v314_v50 }
 0x25a   :  { %v309_v55 = vmul.f32 0.03125, %v300_v54  ;;  %v316_v56 = vmul.f32 %v312_v51, %v312_v51 }
 0x25b   :  { %v315_v57 = vsub.f32 %v292_v41, %v311_v53  ;;  %v326_v62 = vsel %vm69_vm0, %v318_v60, 0.0 }
 0x25c   :  { %v313_v58 = vsub.f32 %v290_v43, %v309_v55  ;;  %v320_v59 = vsel %vm69_vm0, %v316_v56, 0.0 }
 0x25d   :  { %321 = vadd.xlane.f32.xlu0 %v320_v59  ;;  %v319_v0 = vmul.f32 %v315_v57, %v315_v57 }
 0x25e   :  { %v317_v61 = vmul.f32 %v313_v58, %v313_v58 }
 0x25f   :  { %v329_v1 = vsel %vm69_vm0, %v319_v0, 0.0 }
 0x260   :  { %v323_v63 = vsel %vm69_vm0, %v317_v61, 0.0 }
 0x261   :  { %327 = vadd.xlane.f32.xlu0 %v326_v62  ;;  %324 = vadd.xlane.f32.xlu1 %v323_v63 }
 0x265   :  { %330 = vadd.xlane.f32.xlu1 %v329_v1 }
 0x2ea   :  { %v322_v4 = vpop.xlane.xlu0 %321 }
 0x2eb   :  { %v332_v5 = vmul.f32 0.03125, %v322_v4 }
 0x2ed   :  { %v336_v13 = vadd.f32 1e-05, %v332_v5 }
 0x2ee   :  { %v325_v14 = vpop.xlane.xlu1 %324  ;;  %v328_v15 = vpop.xlane.xlu0 %327 }
 0x2ef   :  { %4650 = vrsqrt.f32 %v336_v13  ;;  %v333_v16 = vmul.f32 0.03125, %v325_v14  ;;  %v334_v17 = vmul.f32 0.03125, %v328_v15 }
 0x2f1   :  { %v337_v18 = vadd.f32 1e-05, %v333_v16  ;;  %v338_v20 = vadd.f32 1e-05, %v334_v17 }
 0x2f2   :  { %v331_v21 = vpop.xlane.xlu1 %330 }
 0x2f3   :  { %4652 = vrsqrt.f32 %v337_v18  ;;  %v335_v22 = vmul.f32 0.03125, %v331_v21 }
 0x2f4   :  { %4654 = vrsqrt.f32 %v338_v20 }
 0x2f5   :  { %v339_v23 = vadd.f32 1e-05, %v335_v22 }
 0x2f7   :  { %4656 = vrsqrt.f32 %v339_v23 }
 0x2f9   :  { %v4651_v24 = vpop.eup %4650 }
 0x2fa   :  { %v344_v25 = vmul.f32 %v4651_v24, %v312_v51 }
 0x2fc   :  { %v352_v30 = vmul.f32 %v3865_v26, %v344_v25 }
 0x2fd   :  { %v4653_v27 = vpop.eup %4652 }
 0x2fe   :  { %v4655_v28 = vpop.eup %4654  ;;  %v345_v29 = vmul.f32 %v4653_v27, %v313_v58  ;;  %v4951_v37 = vadd.f32 %v3866_v32, %v352_v30 }
 0x2ff   :  { %v346_v31 = vmul.f32 %v4655_v28, %v314_v50 }
 0x300   :  { %v353_v33 = vmul.f32 %v3865_v26, %v345_v29 }
 0x301   :  { %v4657_v34 = vpop.eup %4656  ;;  %v354_v36 = vmul.f32 %v3865_v26, %v346_v31 }
 0x302   :  { %v347_v35 = vmul.f32 %v4657_v34, %v315_v57  ;;  %v4953_v38 = vadd.f32 %v3866_v32, %v353_v33 }
 0x303   :  { %v4957_v41 = vadd.f32 %v3866_v32, %v354_v36 }
 0x304   :  { %v355_v39 = vmul.f32 %v3865_v26, %v347_v35  ;;  %v368_v40 = vpack.c.bf16 %v4953_v38, %v4951_v37 }
 0x306   :  { %v4959_v42 = vadd.f32 %v3866_v32, %v355_v39  ;;  %4218 = vmatprep.mubr.msk.bf16.mxu0 %vm69_vm0, %v368_v40  ;;  %v3872_v40 = vld [vmem:[%s6066_s5 + $0x28] ss:$0 sm:$0xff] }
 0x308   :  { %v369_v43 = vpack.c.bf16 %v4959_v42, %v4957_v41 }
 0x30a   :  { %4219 = vmatmul.mubr.msk.bf16.vlgmr.msra.gmra.mrb[8].mxu0 %vm69_vm0, %v369_v43 }
 0x30b   :  { %4238 = vmatprep.mubr.msk.bf16.mxu0 %vm69_vm0, %v4873_v6  ;;  %v4590_v6 = vld [vmem:[%s6065_s4 + $0x28] sm:$0xff]  }
 0x30c   :  { %4228 = vmatprep.subr.bf16.mxu1 %v4590_v6 }
 0x30d   :  { %4229 = vmatpush3.bf16.msra.mxu1 %v4590_v6 }
 0x30e   :  { %4246 = vmatprep.subr.bf16.mxu1 %v4890_v9 }
 0x3dd   :  { %v4220_v48 = vpop.f32.mrb[8].mxu0 }
 0x3de   :  { %v436_v49 = vadd.f32 %v4220_v48, %v3867_v47  ;;  %v427_v50 = vpop.f32.mrb[9].mxu0 }
 0x3df   :  { %v428_v51 = vadd.f32 %v3867_v47, %v427_v50  ;;  %v4221_v52 = vpop.f32.mrb[10].mxu0 }
 0x3e0   :  { %v444_v53 = vmul.f32 %v436_v49, %v436_v49  ;;  %v439_v54 = vadd.f32 %v4221_v52, %v3867_v47  ;;  %v430_v55 = vpop.f32.mrb[11].mxu0 }
 0x3e1   :  { %v442_v56 = vmul.f32 %v428_v51, %v428_v51  ;;  %v431_v57 = vadd.f32 %v3867_v47, %v430_v55 }
 0x3e2   :  { %v448_v58 = vmul.f32 %v444_v53, %v436_v49  ;;  %v445_v59 = vmul.f32 %v439_v54, %v439_v54 }
 0x3e3   :  { %v446_v60 = vmul.f32 %v442_v56, %v428_v51  ;;  %v443_v61 = vmul.f32 %v431_v57, %v431_v57 }
 0x3e4   :  { %v452_v62 = vmul.f32 0.044715, %v448_v58  ;;  %v449_v63 = vmul.f32 %v445_v59, %v439_v54 }
 0x3e5   :  { %v450_v0 = vmul.f32 0.044715, %v446_v60  ;;  %v447_v1 = vmul.f32 %v443_v61, %v431_v57 }
 0x3e6   :  { %v456_v2 = vadd.f32 %v452_v62, %v436_v49  ;;  %v453_v3 = vmul.f32 0.044715, %v449_v63 }
 0x3e7   :  { %v454_v4 = vadd.f32 %v450_v0, %v428_v51  ;;  %v451_v5 = vmul.f32 0.044715, %v447_v1 }
 0x3e8   :  { %v460_v13 = vmul.f32 0.7978846, %v456_v2  ;;  %v457_v14 = vadd.f32 %v453_v3, %v439_v54 }
 0x3e9   :  { %v458_v15 = vmul.f32 0.7978846, %v454_v4  ;;  %v455_v16 = vadd.f32 %v451_v5, %v431_v57 }
 0x3ea   :  { %4658 = vtanh.f32 %v460_v13  ;;  %v461_v17 = vmul.f32 0.7978846, %v457_v14 }
 0x3eb   :  { %4660 = vtanh.f32 %v458_v15  ;;  %v459_v18 = vmul.f32 0.7978846, %v455_v16 }
 0x3ec   :  { %4662 = vtanh.f32 %v461_v17 }
 0x3ed   :  { %4664 = vtanh.f32 %v459_v18 }
 0x3f4   :  { %v4659_v20 = vpop.eup %4658 }
 0x3f5   :  { %v4661_v21 = vpop.eup %4660  ;;  %v468_v22 = vadd.f32 1.0, %v4659_v20 }
 0x3f6   :  { %v4663_v23 = vpop.eup %4662  ;;  %v466_v24 = vadd.f32 1.0, %v4661_v21 }
 0x3f7   :  { %v4665_v25 = vpop.eup %4664  ;;  %v472_v26 = vmul.f32 0.5, %v468_v22  ;;  %v469_v27 = vadd.f32 1.0, %v4663_v23 }
 0x3f8   :  { %v470_v28 = vmul.f32 0.5, %v466_v24  ;;  %v467_v29 = vadd.f32 1.0, %v4665_v25 }
 0x3f9   :  { %v473_v30 = vmul.f32 0.5, %v469_v27  ;;  %v476_v32 = vmul.f32 %v472_v26, %v436_v49 }
 0x3fa   :  { %v471_v31 = vmul.f32 0.5, %v467_v29  ;;  %v474_v34 = vmul.f32 %v470_v28, %v428_v51  ;;  %v3879_v29 = vld [vmem:[%s6066_s5 + $0x10] ss:$0 sm:$0xff] }
 0x3fb   :  { %v477_v33 = vmul.f32 %v473_v30, %v439_v54 }
 0x3fc   :  { %v475_v35 = vmul.f32 %v471_v31, %v431_v57 }
 0x3fd   :  { %v487_v36 = vpack.c.bf16 %v477_v33, %v476_v32 }
 0x3fe   :  { %v486_v39 = vpack.c.bf16 %v475_v35, %v474_v34  ;;  %v3880_v35 = vld [vmem:[%s6066_s5 + $0x18] ss:$0 sm:$0xff] }
 0x400   :  { %4230 = vmatprep.mubr.msk.bf16.mxu1 %vm517_vm1, %v486_v39 }
 0x401   :  { %4231 = vmatmul.mubr.msk.bf16.vlgmr.msra.gmra.mrb[8].mxu1 %vm517_vm1, %v487_v36 }
 0x402   :  { %4247 = vmatpush3.bf16.msra.mxu1 %v4890_v9 }
 0x403   :  { %4248 = vmatprep.subr.bf16.mxu1 %v4908_v11 }
 0x406   :  { %4249 = vmatpush3.bf16.msra.mxu1 %v4908_v11 }
 0x4d4   :  { %v4232_v43 = vpop.f32.mrb[8].mxu1 }
 0x4d5   :  { %v558_v44 = vpop.f32.mrb[9].mxu1  ;;  %v567_v45 = vadd.f32 %v4232_v43, %v3872_v40 }
 0x4d6   :  { %v559_v46 = vadd.f32 %v3872_v40, %v558_v44  ;;  %v4233_v6 = vpop.f32.mrb[10].mxu1 }
 0x4d7   :  { %v561_v47 = vpop.f32.mrb[11].mxu1  ;;  %v570_v48 = vadd.f32 %v4233_v6, %v3872_v40  ;;  %v575_v11 = vadd.f32 %v567_v45, %v4957_v41 }
 0x4d8   :  { %v562_v49 = vadd.f32 %v3872_v40, %v561_v47  ;;  %v573_v50 = vadd.f32 %v559_v46, %v4951_v37 }
 0x4d9   :  { %v576_v53 = vadd.f32 %v570_v48, %v4959_v42  ;;  %v585_v54 = vsel %vm69_vm0, %v575_v11, 0.0 }
 0x4da   :  { %v579_v9 = vsel %vm69_vm0, %v573_v50, 0.0  ;;  %v574_v51 = vadd.f32 %v562_v49, %v4953_v38 }
 0x4db   :  { %580 = vadd.xlane.f32.xlu0 %v579_v9  ;;  %v588_v55 = vsel %vm69_vm0, %v576_v53, 0.0  ;;  %v4591_v9 = vld [vmem:[%s6065_s4 + $0xc0] sm:$0xff]  }
 0x4dc   :  { %v582_v52 = vsel %vm69_vm0, %v574_v51, 0.0  ;;  %4262 = vmatprep.subr.bf16.mxu1 %v4591_v9 }
 0x4dd   :  { %583 = vadd.xlane.f32.xlu1 %v582_v52 }
 0x4df   :  { %586 = vadd.xlane.f32.xlu0 %v585_v54 }
 0x4e1   :  { %589 = vadd.xlane.f32.xlu1 %v588_v55  ;;  %v4592_v55 = vld [vmem:[%s6065_s4 + $0xc8] sm:$0xff]  }
 0x568   :  { %v581_v56 = vpop.xlane.xlu0 %580 }
 0x569   :  { %v591_v37 = vmul.f32 0.03125, %v581_v56 }
 0x56a   :  { %v584_v57 = vpop.xlane.xlu1 %583 }
 0x56b   :  { %v595_v58 = vsub.f32 %v573_v50, %v591_v37  ;;  %v592_v59 = vmul.f32 0.03125, %v584_v57 }
 0x56c   :  { %v587_v38 = vpop.xlane.xlu0 %586 }
 0x56d   :  { %v596_v60 = vsub.f32 %v574_v51, %v592_v59  ;;  %v593_v41 = vmul.f32 0.03125, %v587_v38  ;;  %v599_v61 = vmul.f32 %v595_v58, %v595_v58  ;;  %v1189_v51 = vlaneseq }
 0x56e   :  { %v590_v62 = vpop.xlane.xlu1 %589 }
 0x56f   :  { %v597_v63 = vsub.f32 %v575_v11, %v593_v41  ;;  %v594_v0 = vmul.f32 0.03125, %v590_v62  ;;  %v603_v42 = vsel %vm69_vm0, %v599_v61, 0.0  ;;  %v600_v1 = vmul.f32 %v596_v60, %v596_v60 }
 0x570   :  { %604 = vadd.xlane.f32.xlu0 %v603_v42  ;;  %v5034_v11 = vshrl.u32 %v1189_v51, 7 }
 0x571   :  { %v598_v2 = vsub.f32 %v576_v53, %v594_v0  ;;  %v606_v3 = vsel %vm69_vm0, %v600_v1, 0.0  ;;  %v601_v4 = vmul.f32 %v597_v63, %v597_v63 }
 0x572   :  { %607 = vadd.xlane.f32.xlu1 %v606_v3 }
 0x573   :  { %v609_v5 = vsel %vm69_vm0, %v601_v4, 0.0  ;;  %v602_v13 = vmul.f32 %v598_v2, %v598_v2 }
 0x574   :  { %610 = vadd.xlane.f32.xlu0 %v609_v5 }
 0x575   :  { %v612_v14 = vsel %vm69_vm0, %v602_v13, 0.0 }
 0x576   :  { %613 = vadd.xlane.f32.xlu1 %v612_v14 }
 0x5fd   :  { %v605_v15 = vpop.xlane.xlu0 %604 }
 0x5fe   :  { %v615_v16 = vmul.f32 0.03125, %v605_v15 }
 0x5ff   :  { %v608_v17 = vpop.xlane.xlu1 %607 }
 0x600   :  { %v619_v18 = vadd.f32 1e-05, %v615_v16  ;;  %v616_v20 = vmul.f32 0.03125, %v608_v17 }
 0x601   :  { %v611_v21 = vpop.xlane.xlu0 %610 }
 0x602   :  { %4666 = vrsqrt.f32 %v619_v18  ;;  %v620_v22 = vadd.f32 1e-05, %v616_v20  ;;  %v617_v23 = vmul.f32 0.03125, %v611_v21 }
 0x603   :  { %v614_v24 = vpop.xlane.xlu1 %613 }
 0x604   :  { %4668 = vrsqrt.f32 %v620_v22  ;;  %v621_v25 = vadd.f32 1e-05, %v617_v23  ;;  %v618_v26 = vmul.f32 0.03125, %v614_v24 }
 0x606   :  { %4670 = vrsqrt.f32 %v621_v25  ;;  %v622_v27 = vadd.f32 1e-05, %v618_v26 }
 0x608   :  { %4672 = vrsqrt.f32 %v622_v27 }
 0x60c   :  { %v4667_v28 = vpop.eup %4666 }
 0x60d   :  { %v627_v30 = vmul.f32 %v4667_v28, %v595_v58 }
 0x60e   :  { %v4669_v31 = vpop.eup %4668 }
 0x60f   :  { %v635_v32 = vmul.f32 %v3879_v29, %v627_v30  ;;  %v628_v33 = vmul.f32 %v4669_v31, %v596_v60 }
 0x610   :  { %v4671_v34 = vpop.eup %4670 }
 0x611   :  { %v636_v36 = vmul.f32 %v3879_v29, %v628_v33  ;;  %v629_v39 = vmul.f32 %v4671_v34, %v597_v63  ;;  %v5009_v45 = vadd.f32 %v3880_v35, %v635_v32 }
 0x612   :  { %v4673_v40 = vpop.eup %4672 }
 0x613   :  { %v637_v43 = vmul.f32 %v3879_v29, %v629_v39  ;;  %v630_v44 = vmul.f32 %v4673_v40, %v598_v2  ;;  %v5011_v46 = vadd.f32 %v3880_v35, %v636_v36 }
 0x615   :  { %v638_v6 = vmul.f32 %v3879_v29, %v630_v44  ;;  %v647_v47 = vpack.c.bf16 %v5011_v46, %v5009_v45  ;;  %v5015_v48 = vadd.f32 %v3880_v35, %v637_v43 }
 0x617   :  { %4234 = vmatprep.subr.bf16.mxu0 %v647_v47  ;;  %v5017_v49 = vadd.f32 %v3880_v35, %v638_v6 }
 0x618   :  { %4235 = vmatpush3.bf16.msra.mxu0 %v647_v47 }
 0x619   :  { %v648_v50 = vpack.c.bf16 %v5017_v49, %v5015_v48 }
 0x61b   :  { %4236 = vmatprep.subr.bf16.mxu0 %v648_v50 }
 0x61c   :  { %4237 = vmatpush3.bf16.msra.mxu0 %v648_v50 }
 0x61d   :  { %4254 = vmatprep.subr.bf16.mxu0 %v4915_v12 }
 0x61f   :  { %4239 = vmatmul.mubr.msk.bf16.vlgmr.msra.gmra.mrb[12].mxu0 %vm69_vm0, %v4880_v7 }
 0x620   :  { %4242 = vmatprep.mubr.msk.bf16.mxu0 %vm69_vm0, %v4885_v8  ;;  %4255 = vmatpush3.bf16.msra.mxu0 %v4915_v12  ;;  %v1191_v8 = vsub.s32 0, %v5034_v11 }
 0x621   :  { %4256 = vmatprep.subr.bf16.mxu0 %v4921_v19 }
 0x624   :  { %4257 = vmatpush3.bf16.msra.mxu0 %v4921_v19  ;;  %v5040_v19 = vld [vmem:[%s6066_s5 + $0x30] sm:$0x7] }
 0x625   :  { %v5048_v56 = vrot.slane %v5040_v19, %v1191_v8 }
 0x627   :  { %4243 = vmatmul.mubr.msk.bf16.gmra.mrb[16].mxu0 %vm69_vm0, %v4901_v10  ;;  %v1194_v37 = vmul.f32 %v5048_v56, %v5011_v46  ;;  %v1193_v59 = vmul.f32 %v5048_v56, %v5009_v45 }
 0x629   :  { %v5056_v61 = vpack.c.bf16 %v1194_v37, %v1193_v59 }
 0x6f2   :  { %v4240_v7 = vpop.f32.mrb[12].mxu0 }
 0x6f3   :  { %v683_v52 = vpop.f32.mrb[13].mxu0 }
 0x6f4   :  { %v4241_v12 = vpop.f32.mrb[14].mxu0 }
 0x6f5   :  { %v715_v53 = vpack.c.bf16 %v4241_v12, %v4240_v7  ;;  %v686_v10 = vpop.f32.mrb[15].mxu0 }
 0x6f6   :  { %v714_v54 = vpack.c.bf16 %v686_v10, %v683_v52 }
 0x6f8   :  { %4250 = vmatprep.mubr.msk.bf16.mxu1 %vm69_vm0, %v714_v54 }
 0x6f9   :  { %4251 = vmatmul.mubr.msk.bf16.vlgmr.msra.gmra.mrb[12].mxu1 %vm69_vm0, %v715_v53 }
 0x6fa   :  { %4263 = vmatpush3.bf16.msra.mxu1 %v4591_v9  ;;  %v4244_v57 = vpop.f32.mrb[16].mxu0 }
 0x6fb   :  { %v699_v58 = vpop.f32.mrb[17].mxu0  ;;  %4264 = vmatprep.subr.bf16.mxu1 %v4592_v55 }
 0x6fc   :  { %v4245_v38 = vpop.f32.mrb[18].mxu0 }
 0x6fd   :  { %v772_v60 = vpack.c.bf16 %v4245_v38, %v4244_v57  ;;  %v702_v41 = vpop.f32.mrb[19].mxu0 }
 0x6fe   :  { %v771_v62 = vpack.c.bf16 %v702_v41, %v699_v58  ;;  %4265 = vmatpush3.bf16.msra.mxu1 %v4592_v55  ;;  %v3889_v41 = vld [vmem:[%s6066_s5 + $0xb0] ss:$0 sm:$0xff] }
 0x6ff   :  { %4282 = vmatprep.subr.bf16.mxu1 %v5056_v61 }
 0x700   :  { %4258 = vmatprep.mubr.msk.bf16.mxu0 %vm69_vm0, %v771_v62 }
 0x701   :  { %4259 = vmatmul.mubr.msk.bf16.vlgmr.msra.gmra.mrb[20].mxu0 %vm69_vm0, %v772_v60 }
 0x7cc   :  { %v4252_v63 = vpop.f32.mrb[12].mxu1 }
 0x7cd   :  { %v756_v0 = vpop.f32.mrb[13].mxu1 }
 0x7ce   :  { %v4253_v42 = vpop.f32.mrb[14].mxu1 }
 0x7cf   :  { %v759_v1 = vpop.f32.mrb[15].mxu1 }
 0x7d4   :  { %v4260_v2 = vpop.f32.mrb[20].mxu0 }
 0x7d5   :  { %v830_v3 = vsub.f32 %v4252_v63, %v4260_v2  ;;  %v813_v4 = vpop.f32.mrb[21].mxu0  ;;  %v3890_v2 = vld [vmem:[%s6066_s5 + $0xb8] ss:$0 sm:$0xff] }
 0x7d6   :  { %v828_v5 = vsub.f32 %v756_v0, %v813_v4  ;;  %v4261_v13 = vpop.f32.mrb[22].mxu0 }
 0x7d7   :  { %v831_v14 = vsub.f32 %v4253_v42, %v4261_v13  ;;  %v816_v15 = vpop.f32.mrb[23].mxu0  ;;  %v834_v21 = vadd.f32 %v830_v3, %v5015_v48 }
 0x7d8   :  { %v829_v16 = vsub.f32 %v759_v1, %v816_v15  ;;  %v832_v17 = vadd.f32 %v828_v5, %v5009_v45 }
 0x7d9   :  { %v835_v23 = vadd.f32 %v831_v14, %v5017_v49  ;;  %v844_v24 = vsel %vm69_vm0, %v834_v21, 0.0 }
 0x7da   :  { %v838_v18 = vsel %vm69_vm0, %v832_v17, 0.0  ;;  %v833_v20 = vadd.f32 %v829_v16, %v5011_v46 }
 0x7db   :  { %839 = vadd.xlane.f32.xlu0 %v838_v18  ;;  %v847_v25 = vsel %vm69_vm0, %v835_v23, 0.0 }
 0x7dc   :  { %v841_v22 = vsel %vm69_vm0, %v833_v20, 0.0 }
 0x7dd   :  { %842 = vadd.xlane.f32.xlu1 %v841_v22 }
 0x7df   :  { %845 = vadd.xlane.f32.xlu0 %v844_v24 }
 0x7e1   :  { %848 = vadd.xlane.f32.xlu1 %v847_v25  ;;  %v1195_v25 = vmul.f32 %v5048_v56, %v5015_v48 }
 0x868   :  { %v840_v26 = vpop.xlane.xlu0 %839 }
 0x869   :  { %v850_v27 = vmul.f32 0.03125, %v840_v26 }
 0x86a   :  { %v843_v28 = vpop.xlane.xlu1 %842 }
 0x86b   :  { %v854_v29 = vsub.f32 %v832_v17, %v850_v27  ;;  %v851_v30 = vmul.f32 0.03125, %v843_v28 }
 0x86c   :  { %v846_v31 = vpop.xlane.xlu0 %845 }
 0x86d   :  { %v855_v32 = vsub.f32 %v833_v20, %v851_v30  ;;  %v852_v33 = vmul.f32 0.03125, %v846_v31  ;;  %v858_v34 = vmul.f32 %v854_v29, %v854_v29  ;;  %v1199_v20 = vsub.s32 1, %v5034_v11 }
 0x86e   :  { %v849_v35 = vpop.xlane.xlu1 %848  ;;  %v1207_v30 = vsub.s32 2, %v5034_v11  ;;  %v4601_v11 = vld [vmem:[%s6064_s6 + $0x50] sm:$0xff]  }
 0x86f   :  { %v856_v36 = vsub.f32 %v834_v21, %v852_v33  ;;  %v853_v39 = vmul.f32 0.03125, %v849_v35  ;;  %v862_v40 = vsel %vm69_vm0, %v858_v34, 0.0  ;;  %v859_v43 = vmul.f32 %v855_v32, %v855_v32 }
 0x870   :  { %863 = vadd.xlane.f32.xlu0 %v862_v40  ;;  %v1200_v26 = vrot.slane %v5040_v19, %v1199_v20  ;;  %v1208_v33 = vrot.slane %v5040_v19, %v1207_v30  ;;  %v4593_v19 = vld [vmem:[%s6065_s4 + $0xd0] sm:$0xff]  }
 0x871   :  { %v857_v44 = vsub.f32 %v835_v23, %v853_v39  ;;  %v865_v6 = vsel %vm69_vm0, %v859_v43, 0.0  ;;  %v860_v47 = vmul.f32 %v856_v36, %v856_v36  ;;  %v1196_v23 = vmul.f32 %v5048_v56, %v5017_v49  ;;  %4270 = vmatprep.subr.bf16.mxu0 %v4593_v19 }
 0x872   :  { %866 = vadd.xlane.f32.xlu1 %v865_v6  ;;  %v1202_v28 = vmul.f32 %v1200_v26, %v5011_v46  ;;  %v1203_v56 = vmul.f32 %v1200_v26, %v5015_v48  ;;  %v1210_v35 = vmul.f32 %v1208_v33, %v5011_v46  ;;  %v1212_v39 = vmul.f32 %v1208_v33, %v5017_v49  ;;  %v4595_v46 = vld [vmem:[%s6065_s4 + $0xe0] sm:$0xff]  }
 0x873   :  { %v868_v50 = vsel %vm69_vm0, %v860_v47, 0.0  ;;  %v861_v9 = vmul.f32 %v857_v44, %v857_v44  ;;  %v1218_v27 = vpack.c.bf16 %v1196_v23, %v1195_v25  ;;  %v1211_v40 = vmul.f32 %v1208_v33, %v5015_v48  ;;  %4271 = vmatpush3.bf16.msra.mxu0 %v4593_v19  ;;  %v4596_v48 = vld [vmem:[%s6065_s4 + $0xe8] sm:$0xff]  }
 0x874   :  { %869 = vadd.xlane.f32.xlu0 %v868_v50 }
 0x875   :  { %v871_v51 = vsel %vm69_vm0, %v861_v9, 0.0  ;;  %v1222_v43 = vpack.c.bf16 %v1212_v39, %v1211_v40  ;;  %v3896_v39 = vld [vmem:[%s6066_s5 + $0xd8] ss:$0 sm:$0xff] }
 0x876   :  { %872 = vadd.xlane.f32.xlu1 %v871_v51 }
 0x8fd   :  { %v864_v7 = vpop.xlane.xlu0 %863 }
 0x8fe   :  { %v874_v52 = vmul.f32 0.03125, %v864_v7 }
 0x8ff   :  { %v867_v12 = vpop.xlane.xlu1 %866 }
 0x900   :  { %v878_v53 = vadd.f32 1e-05, %v874_v52  ;;  %v875_v10 = vmul.f32 0.03125, %v867_v12 }
 0x901   :  { %v870_v54 = vpop.xlane.xlu0 %869 }
 0x902   :  { %4674 = vrsqrt.f32 %v878_v53  ;;  %v879_v55 = vadd.f32 1e-05, %v875_v10  ;;  %v876_v37 = vmul.f32 0.03125, %v870_v54 }
 0x903   :  { %v873_v57 = vpop.xlane.xlu1 %872 }
 0x904   :  { %4676 = vrsqrt.f32 %v879_v55  ;;  %v880_v58 = vadd.f32 1e-05, %v876_v37  ;;  %v877_v59 = vmul.f32 0.03125, %v873_v57 }
 0x906   :  { %4678 = vrsqrt.f32 %v880_v58  ;;  %v881_v38 = vadd.f32 1e-05, %v877_v59 }
 0x908   :  { %4680 = vrsqrt.f32 %v881_v38 }
 0x90c   :  { %v4675_v60 = vpop.eup %4674 }
 0x90d   :  { %v886_v62 = vmul.f32 %v4675_v60, %v854_v29  ;;  %v1201_v29 = vmul.f32 %v1200_v26, %v5009_v45 }
 0x90e   :  { %v4677_v63 = vpop.eup %4676 }
 0x90f   :  { %v887_v0 = vmul.f32 %v4677_v63, %v855_v32  ;;  %v894_v42 = vmul.f32 %v3889_v41, %v886_v62  ;;  %v1219_v31 = vpack.c.bf16 %v1202_v28, %v1201_v29  ;;  %v1204_v32 = vmul.f32 %v1200_v26, %v5017_v49  ;;  %v3891_v49 = vld [vmem:[%s6066_s5 + $0xd0] ss:$0 sm:$0xff] }
 0x910   :  { %v4679_v1 = vpop.eup %4678 }
 0x911   :  { %v888_v3 = vmul.f32 %v4679_v1, %v856_v36  ;;  %v895_v4 = vmul.f32 %v3889_v41, %v887_v0  ;;  %v5079_v14 = vadd.f32 %v3890_v2, %v894_v42  ;;  %v1220_v34 = vpack.c.bf16 %v1204_v32, %v1203_v56 }
 0x912   :  { %v4681_v5 = vpop.eup %4680 }
 0x913   :  { %v889_v13 = vmul.f32 %v4681_v5, %v857_v44  ;;  %v5081_v15 = vadd.f32 %v3890_v2, %v895_v4  ;;  %v896_v16 = vmul.f32 %v3889_v41, %v888_v3 }
 0x915   :  { %v910_v17 = vpack.c.bf16 %v5081_v15, %v5079_v14  ;;  %v897_v18 = vmul.f32 %v3889_v41, %v889_v13  ;;  %v5087_v21 = vadd.f32 %v3890_v2, %v896_v16 }
 0x917   :  { %4266 = vmatprep.mubr.msk.bf16.mxu1 %vm69_vm0, %v910_v17  ;;  %v5089_v22 = vadd.f32 %v3890_v2, %v897_v18 }
 0x919   :  { %v911_v24 = vpack.c.bf16 %v5089_v22, %v5087_v21 }
 0x91b   :  { %4267 = vmatmul.mubr.msk.bf16.vlgmr.msra.gmra.mrb[16].mxu1 %vm69_vm0, %v911_v24 }
 0x91c   :  { %4283 = vmatpush3.bf16.msra.mxu1 %v5056_v61  ;;  %v1209_v61 = vmul.f32 %v1208_v33, %v5009_v45  ;;  %v4594_v45 = vld [vmem:[%s6065_s4 + $0xd8] sm:$0xff]  }
 0x91d   :  { %4284 = vmatprep.subr.bf16.mxu1 %v1218_v27  ;;  %4272 = vmatprep.subr.bf16.mxu0 %v4594_v45 }
 0x91e   :  { %v1221_v36 = vpack.c.bf16 %v1210_v35, %v1209_v61  ;;  %4273 = vmatpush3.bf16.msra.mxu0 %v4594_v45  ;;  %v4597_v61 = vld [vmem:[%s6064_s6 + $0x40] sm:$0xff]  }
 0x91f   :  { %4274 = vmatprep.subr.bf16.mxu0 %v4595_v46  ;;  %4294 = vmatprep.mubr.msk.bf16.mxu1 %vm1238_vm2, %v4597_v61 }
 0x920   :  { %4285 = vmatpush3.bf16.msra.mxu1 %v1218_v27 }
 0x921   :  { %4286 = vmatprep.subr.bf16.mxu1 %v1219_v31 }
 0x922   :  { %4275 = vmatpush3.bf16.msra.mxu0 %v4595_v46 }
 0x923   :  { %4276 = vmatprep.subr.bf16.mxu0 %v4596_v48 }
 0x924   :  { %4287 = vmatpush3.bf16.msra.mxu1 %v1219_v31 }
 0x925   :  { %4288 = vmatprep.subr.bf16.mxu1 %v1220_v34 }
 0x926   :  { %4277 = vmatpush3.bf16.msra.mxu0 %v4596_v48 }
 0x928   :  { %4289 = vmatpush3.bf16.msra.mxu1 %v1220_v34 }
 0x929   :  { %4290 = vmatprep.subr.bf16.mxu1 %v1221_v36 }
 0x92c   :  { %4291 = vmatpush3.bf16.msra.mxu1 %v1221_v36  ;;  %v4598_v36 = vld [vmem:[%s6064_s6 + $0x48] sm:$0xff]  }
 0x92d   :  { %4292 = vmatprep.subr.bf16.mxu1 %v1222_v43 }
 0x930   :  { %4293 = vmatpush3.bf16.msra.mxu1 %v1222_v43 }
 0x933   :  { %4295 = vmatmul.mubr.msk.bf16.vlgmr.msra.gmra.mrb[20].mxu1 %vm1238_vm2, %v4598_v36 }
 0x9ee   :  { %v4268_v44 = vpop.f32.mrb[16].mxu1 }
 0x9ef   :  { %v978_v6 = vadd.f32 %v4268_v44, %v3891_v49  ;;  %v969_v47 = vpop.f32.mrb[17].mxu1 }
 0x9f0   :  { %v970_v50 = vadd.f32 %v3891_v49, %v969_v47  ;;  %v4269_v9 = vpop.f32.mrb[18].mxu1 }
 0x9f1   :  { %v986_v51 = vmul.f32 %v978_v6, %v978_v6  ;;  %v981_v7 = vadd.f32 %v4269_v9, %v3891_v49  ;;  %v972_v52 = vpop.f32.mrb[19].mxu1 }
 0x9f2   :  { %v984_v12 = vmul.f32 %v970_v50, %v970_v50  ;;  %v973_v53 = vadd.f32 %v3891_v49, %v972_v52 }
 0x9f3   :  { %v990_v10 = vmul.f32 %v986_v51, %v978_v6  ;;  %v987_v54 = vmul.f32 %v981_v7, %v981_v7 }
 0x9f4   :  { %v988_v55 = vmul.f32 %v984_v12, %v970_v50  ;;  %v985_v37 = vmul.f32 %v973_v53, %v973_v53 }
 0x9f5   :  { %v994_v57 = vmul.f32 0.044715, %v990_v10  ;;  %v991_v58 = vmul.f32 %v987_v54, %v981_v7 }
 0x9f6   :  { %v992_v59 = vmul.f32 0.044715, %v988_v55  ;;  %v989_v38 = vmul.f32 %v985_v37, %v973_v53 }
 0x9f7   :  { %v998_v60 = vadd.f32 %v994_v57, %v978_v6  ;;  %v995_v41 = vmul.f32 0.044715, %v991_v58 }
 0x9f8   :  { %v996_v62 = vadd.f32 %v992_v59, %v970_v50  ;;  %v993_v63 = vmul.f32 0.044715, %v989_v38 }
 0x9f9   :  { %v1002_v0 = vmul.f32 0.7978846, %v998_v60  ;;  %v999_v42 = vadd.f32 %v995_v41, %v981_v7 }
 0x9fa   :  { %v1000_v1 = vmul.f32 0.7978846, %v996_v62  ;;  %v997_v2 = vadd.f32 %v993_v63, %v973_v53 }
 0x9fb   :  { %4682 = vtanh.f32 %v1002_v0  ;;  %v1003_v3 = vmul.f32 0.7978846, %v999_v42 }
 0x9fc   :  { %4684 = vtanh.f32 %v1000_v1  ;;  %v1001_v4 = vmul.f32 0.7978846, %v997_v2  ;;  %v4599_v2 = vld [vmem:[%s6065_s4 + $0x30] sm:$0xff]  }
 0x9fd   :  { %4686 = vtanh.f32 %v1003_v3  ;;  %4298 = vmatprep.subr.bf16.mxu0 %v4599_v2 }
 0x9fe   :  { %4688 = vtanh.f32 %v1001_v4 }
 0xa05   :  { %v4683_v5 = vpop.eup %4682 }
 0xa06   :  { %v4685_v13 = vpop.eup %4684  ;;  %v1010_v16 = vadd.f32 1.0, %v4683_v5  ;;  %v4296_v3 = vpop.f32.mrb[20].mxu1 }
 0xa07   :  { %v4687_v17 = vpop.eup %4686  ;;  %v1008_v18 = vadd.f32 1.0, %v4685_v13  ;;  %v1279_v4 = vpop.f32.mrb[21].mxu1  ;;  %v3905_v13 = vld [vmem:[%s6066_s5 + $0x38] ss:$0 sm:$0xff] }
 0xa08   :  { %v4689_v23 = vpop.eup %4688  ;;  %v1014_v24 = vmul.f32 0.5, %v1010_v16  ;;  %v1011_v25 = vadd.f32 1.0, %v4687_v17  ;;  %v4297_v5 = vpop.f32.mrb[22].mxu1  ;;  %v4600_v17 = vld [vmem:[%s6065_s4 + $0x38] sm:$0xff]  }
 0xa09   :  { %v1012_v26 = vmul.f32 0.5, %v1008_v18  ;;  %v1009_v27 = vadd.f32 1.0, %v4689_v23  ;;  %v1282_v16 = vpop.f32.mrb[23].mxu1  ;;  %v1280_v18 = vadd.f32 %v3905_v13, %v1279_v4 }
 0xa0a   :  { %v1015_v28 = vmul.f32 0.5, %v1011_v25  ;;  %v1018_v31 = vmul.f32 %v1014_v24, %v978_v6  ;;  %v1283_v23 = vadd.f32 %v3905_v13, %v1282_v16  ;;  %v1288_v24 = vadd.f32 %v4296_v3, %v3905_v13 }
 0xa0b   :  { %v1013_v29 = vmul.f32 0.5, %v1009_v27  ;;  %v1016_v56 = vmul.f32 %v1012_v26, %v970_v50  ;;  %v1291_v25 = vadd.f32 %v4297_v5, %v3905_v13 }
 0xa0c   :  { %v1019_v32 = vmul.f32 %v1015_v28, %v981_v7  ;;  %v1298_v26 = vpack.c.bf16 %v1283_v23, %v1280_v18  ;;  %v4808_v28 = vmov 0.0  }
 0xa0d   :  { %v1017_v33 = vmul.f32 %v1013_v29, %v973_v53  ;;  %v1299_v27 = vpack.c.bf16 %v1291_v25, %v1288_v24  ;;  %4322 = vmatprep.subr.bf16.mxu1 %v4808_v28  ;;  %4326 = vmatprep.mubr.msk.bf16.mxu1 %vm4809_vm3, %v4808_v28 }
 0xa0e   :  { %v1029_v34 = vpack.c.bf16 %v1019_v32, %v1018_v31 }
 0xa0f   :  { %v1028_v35 = vpack.c.bf16 %v1017_v33, %v1016_v56 }
 0xa11   :  { %4278 = vmatprep.mubr.msk.bf16.mxu0 %vm517_vm1, %v1028_v35 }
 0xa12   :  { %4279 = vmatmul.mubr.msk.bf16.vlgmr.msra.gmra.mrb[24].mxu0 %vm517_vm1, %v1029_v34 }
 0xa13   :  { %4299 = vmatpush3.bf16.msra.mxu0 %v4599_v2  ;;  %4302 = vmatprep.mubr.msk.bf16.mxu0 %vm69_vm0, %v1298_v26 }
 0xa14   :  { %4300 = vmatprep.subr.bf16.mxu0 %v4600_v17 }
 0xa17   :  { %4301 = vmatpush3.bf16.msra.mxu0 %v4600_v17 }
 0xa18   :  { %4306 = vmatprep.subr.bf16.mxu0 %v4808_v28 }
 0xa1a   :  { %4303 = vmatmul.mubr.msk.bf16.vlgmr.msra.gmra.mrb[28].mxu0 %vm69_vm0, %v1299_v27 }
 0xa1b   :  { %4318 = vmatprep.mubr.msk.bf16.mxu0 %vm4809_vm3, %v4808_v28 }
 0xae5   :  { %v4280_v40 = vpop.f32.mrb[24].mxu0 }
 0xae6   :  { %v1099_v43 = vpop.f32.mrb[25].mxu0  ;;  %v1108_v19 = vadd.f32 %v4280_v40, %v3896_v39 }
 0xae7   :  { %v1100_v45 = vadd.f32 %v3896_v39, %v1099_v43  ;;  %v4281_v46 = vpop.f32.mrb[26].mxu0 }
 0xae8   :  { %v1102_v48 = vpop.f32.mrb[27].mxu0  ;;  %v1111_v49 = vadd.f32 %v4281_v46, %v3896_v39  ;;  %v1116_v9 = vadd.f32 %v1108_v19, %v5087_v21 }
 0xae9   :  { %v1103_v44 = vadd.f32 %v3896_v39, %v1102_v48  ;;  %v1114_v6 = vadd.f32 %v1100_v45, %v5079_v14  ;;  %v3903_v45 = vld [vmem:[%s6066_s5 + $0xc0] ss:$0 sm:$0xff] }
 0xaea   :  { %v1117_v7 = vadd.f32 %v1111_v49, %v5089_v22  ;;  %v1126_v52 = vsel %vm69_vm0, %v1116_v9, 0.0  ;;  %v3904_v49 = vld [vmem:[%s6066_s5 + $0xc8] ss:$0 sm:$0xff] }
 0xaeb   :  { %v1120_v47 = vsel %vm69_vm0, %v1114_v6, 0.0  ;;  %v1115_v50 = vadd.f32 %v1103_v44, %v5081_v15  ;;  %v1372_v44 = vld [vmem:[%s6066_s5 + $0xe0] sm:$0x7] }
 0xaec   :  { %1121 = vadd.xlane.f32.xlu0 %v1120_v47  ;;  %v1129_v12 = vsel %vm69_vm0, %v1117_v7, 0.0 }
 0xaed   :  { %v1123_v51 = vsel %vm69_vm0, %v1115_v50, 0.0  ;;  %v4304_v13 = vpop.f32.mrb[28].mxu0 }
 0xaee   :  { %1124 = vadd.xlane.f32.xlu1 %v1123_v51  ;;  %v1357_v17 = vpop.f32.mrb[29].mxu0 }
 0xaef   :  { %v4305_v23 = vpop.f32.mrb[30].mxu0 }
 0xaf0   :  { %1127 = vadd.xlane.f32.xlu0 %v1126_v52  ;;  %v1376_v52 = vrot.slane %v1372_v44, %v1191_v8  ;;  %v1360_v25 = vpop.f32.mrb[31].mxu0 }
 0xaf2   :  { %1130 = vadd.xlane.f32.xlu1 %v1129_v12 }
 0xb79   :  { %v1122_v53 = vpop.xlane.xlu0 %1121 }
 0xb7a   :  { %v1132_v14 = vmul.f32 0.03125, %v1122_v53 }
 0xb7b   :  { %v1125_v10 = vpop.xlane.xlu1 %1124 }
 0xb7c   :  { %v5150_v54 = vsub.f32 %v1114_v6, %v1132_v14  ;;  %v1133_v15 = vmul.f32 0.03125, %v1125_v10 }
 0xb7d   :  { %v1128_v55 = vpop.xlane.xlu0 %1127 }
 0xb7e   :  { %v5152_v21 = vsub.f32 %v1115_v50, %v1133_v15  ;;  %v1134_v37 = vmul.f32 0.03125, %v1128_v55  ;;  %v1140_v22 = vmul.f32 %v5150_v54, %v5150_v54 }
 0xb7f   :  { %v1131_v57 = vpop.xlane.xlu1 %1130 }
 0xb80   :  { %v5156_v58 = vsub.f32 %v1116_v9, %v1134_v37  ;;  %v1135_v59 = vmul.f32 0.03125, %v1131_v57  ;;  %v1144_v38 = vsel %vm69_vm0, %v1140_v22, 0.0  ;;  %v1141_v60 = vmul.f32 %v5152_v21, %v5152_v21 }
 0xb81   :  { %1145 = vadd.xlane.f32.xlu0 %v1144_v38 }
 0xb82   :  { %v5161_v41 = vsub.f32 %v1117_v7, %v1135_v59  ;;  %v1147_v62 = vsel %vm69_vm0, %v1141_v60, 0.0  ;;  %v1142_v63 = vmul.f32 %v5156_v58, %v5156_v58 }
 0xb83   :  { %1148 = vadd.xlane.f32.xlu1 %v1147_v62 }
 0xb84   :  { %v1150_v0 = vsel %vm69_vm0, %v1142_v63, 0.0  ;;  %v1143_v42 = vmul.f32 %v5161_v41, %v5161_v41 }
 0xb85   :  { %1151 = vadd.xlane.f32.xlu0 %v1150_v0  ;;  %v1392_v0 = vrot.slane %v1372_v44, %v1207_v30  ;;  %v3910_v30 = vld [vmem:[%s6066_s5 + $0x40] ss:$0 sm:$0xff] }
 0xb86   :  { %v1153_v1 = vsel %vm69_vm0, %v1143_v42, 0.0  ;;  %v5221_v16 = vadd.f32 %v4304_v13, %v3910_v30  ;;  %v5223_v18 = vadd.f32 %v3910_v30, %v1357_v17  ;;  %v5225_v24 = vadd.f32 %v4305_v23, %v3910_v30  ;;  %v1527_v13 = vld [vmem:[%s6068_s2] sm:$0xff] }
 0xb87   :  { %1154 = vadd.xlane.f32.xlu1 %v1153_v1  ;;  %v5227_v26 = vadd.f32 %v3910_v30, %v1360_v25  ;;  %v4611_v30 = vld [vmem:[%s6065_s4 + $0x78] sm:$0xff]  }
 0xb88   :  { %v2044_v27 = vpack.c.bf16 %v5225_v24, %v5221_v16 }
 0xc0e   :  { %v1146_v29 = vpop.xlane.xlu0 %1145 }
 0xc0f   :  { %v1156_v31 = vmul.f32 0.03125, %v1146_v29  ;;  %v2043_v29 = vpack.c.bf16 %v5227_v26, %v5223_v18  ;;  %v1528_v18 = vld [vmem:[%s6068_s2 + $0x8] sm:$0xff] }
 0xc10   :  { %v1149_v32 = vpop.xlane.xlu1 %1148 }
 0xc11   :  { %v1160_v56 = vadd.f32 1e-05, %v1156_v31  ;;  %v1157_v33 = vmul.f32 0.03125, %v1149_v32  ;;  %v4602_v31 = vld [vmem:[%s6065_s4 + $0xf0] sm:$0xff]   ;;  %v4603_v32 = vld [vmem:[%s6065_s4 + $0xf8] sm:$0xff]  }
 0xc12   :  { %v1152_v34 = vpop.xlane.xlu0 %1151  ;;  %4323 = vmatpush3.bf16.msra.mxu1 %v4602_v31 }
 0xc13   :  { %4690 = vrsqrt.f32 %v1160_v56  ;;  %v1161_v35 = vadd.f32 1e-05, %v1157_v33  ;;  %v1158_v61 = vmul.f32 0.03125, %v1152_v34  ;;  %4324 = vmatprep.subr.bf16.mxu1 %v4808_v28  ;;  %v5244_v56 = vld [vmem:[%s6064_s6 + $0x60] sm:$0xff]   ;;  %v5249_v33 = vld [vmem:[%s6064_s6 + $0x58] sm:$0xff]   ;;  %v5256_v34 = vld [vmem:[%s6064_s6 + $0x68] sm:$0xff]  }
 0xc14   :  { %v1155_v36 = vpop.xlane.xlu1 %1154  ;;  %1626 = vrot.lane.b32.xlu1 %v5244_v56, %s4810_s26  ;;  %1624 = vrot.lane.b32.xlu0 %v5249_v33, %s4810_s26 }
 0xc15   :  { %4692 = vrsqrt.f32 %v1161_v35  ;;  %v1162_v39 = vadd.f32 1e-05, %v1158_v61  ;;  %v1159_v40 = vmul.f32 0.03125, %v1155_v36  ;;  %v5265_v35 = vld [vmem:[%s6064_s6 + $0x70] sm:$0xff]   ;;  %v3915_v61 = vld [vmem:[%s6066_s5 + $0xe8] ss:$0 sm:$0xff] }
 0xc16   :  { %4325 = vmatpush3.bf16.msra.mxu1 %v4603_v32  ;;  %v3942_v32 = vld [vmem:[%s6066_s5 + $0x60] ss:$0 sm:$0xff] }
 0xc17   :  { %4694 = vrsqrt.f32 %v1162_v39  ;;  %v1163_v43 = vadd.f32 1e-05, %v1159_v40  ;;  %4330 = vmatprep.subr.bf16.mxu1 %v4808_v28 }
 0xc18   :  { %1628 = vrot.lane.b32.xlu1 %v5256_v34, %s4810_s26 }
 0xc19   :  { %4696 = vrsqrt.f32 %v1163_v43 }
 0xc1c   :  { %1630 = vrot.lane.b32.xlu1 %v5265_v35, %s4810_s26 }
 0xc1d   :  { %v4691_v19 = vpop.eup %4690 }
 0xc1e   :  { %v1168_v46 = vmul.f32 %v4691_v19, %v5150_v54 }
 0xc1f   :  { %v4693_v48 = vpop.eup %4692 }
 0xc20   :  { %v1176_v6 = vmul.f32 %v3903_v45, %v1168_v46  ;;  %v1169_v47 = vmul.f32 %v4693_v48, %v5152_v21  ;;  %v4604_v46 = vld [vmem:[%s6065_s4 + $0x40] sm:$0xff]  }
 0xc21   :  { %v4695_v50 = vpop.eup %4694 }
 0xc22   :  { %v1177_v9 = vmul.f32 %v3903_v45, %v1169_v47  ;;  %v1170_v51 = vmul.f32 %v4695_v50, %v5156_v58  ;;  %v1184_v7 = vadd.f32 %v3904_v49, %v1176_v6  ;;  %v1384_v58 = vrot.slane %v1372_v44, %v1199_v20  ;;  %v5284_v44 = vld [vmem:[%s6067_s1] sm:$0xff]  ;;  %v5289_v6 = vld [vmem:[%s6067_s1 + $0x8] sm:$0xff]  ;;  %v3918_v50 = vld [vmem:[%s6066_s5 + $0xf0] ss:$0 sm:$0xff] }
 0xc23   :  { %v4697_v12 = vpop.eup %4696  ;;  %v1533_v47 = vpack.c.bf16 %v5289_v6, %v5284_v44 }
 0xc24   :  { %v1178_v53 = vmul.f32 %v3903_v45, %v1170_v51  ;;  %v1171_v14 = vmul.f32 %v4697_v12, %v5161_v41  ;;  %v1185_v10 = vadd.f32 %v3904_v49, %v1177_v9  ;;  %v1377_v15 = vmul.f32 %v1376_v52, %v1184_v7 }
 0xc25   :  { %v1385_v60 = vmul.f32 %v1384_v58, %v1184_v7  ;;  %v1393_v20 = vmul.f32 %v1392_v0, %v1184_v7 }
 0xc26   :  { %v1179_v54 = vmul.f32 %v3903_v45, %v1171_v14  ;;  %v1378_v55 = vmul.f32 %v1376_v52, %v1185_v10  ;;  %v1186_v37 = vadd.f32 %v3904_v49, %v1178_v53  ;;  %v1386_v38 = vmul.f32 %v1384_v58, %v1185_v10 }
 0xc27   :  { %v1394_v1 = vmul.f32 %v1392_v0, %v1185_v10 }
 0xc28   :  { %v1399_v22 = vpack.c.bf16 %v1378_v55, %v1377_v15  ;;  %v1187_v57 = vadd.f32 %v3904_v49, %v1179_v54  ;;  %v1379_v21 = vmul.f32 %v1376_v52, %v1186_v37  ;;  %v1401_v41 = vpack.c.bf16 %v1386_v38, %v1385_v60  ;;  %v4605_v49 = vld [vmem:[%s6065_s4 + $0x48] sm:$0xff]  }
 0xc29   :  { %v1387_v63 = vmul.f32 %v1384_v58, %v1186_v37  ;;  %v1403_v2 = vpack.c.bf16 %v1394_v1, %v1393_v20  ;;  %v1395_v4 = vmul.f32 %v1392_v0, %v1186_v37  ;;  %v3922_v54 = vld [vmem:[%s6066_s5 + $0x48] ss:$0 sm:$0xff] }
 0xc2a   :  { %4307 = vmatpush3.bf16.msra.mxu0 %v1399_v22  ;;  %v1380_v59 = vmul.f32 %v1376_v52, %v1187_v57  ;;  %v1388_v62 = vmul.f32 %v1384_v58, %v1187_v57  ;;  %v1396_v3 = vmul.f32 %v1392_v0, %v1187_v57 }
 0xc2b   :  { %4308 = vmatprep.subr.bf16.mxu0 %v4808_v28 }
 0xc2c   :  { %v1400_v8 = vpack.c.bf16 %v1380_v59, %v1379_v21  ;;  %v1402_v42 = vpack.c.bf16 %v1388_v62, %v1387_v63  ;;  %v1404_v5 = vpack.c.bf16 %v1396_v3, %v1395_v4 }
 0xc2e   :  { %4309 = vmatpush3.bf16.msra.mxu0 %v1400_v8 }
 0xc2f   :  { %4310 = vmatprep.subr.bf16.mxu0 %v4808_v28 }
 0xc32   :  { %4311 = vmatpush3.bf16.msra.mxu0 %v1401_v41 }
 0xc33   :  { %4312 = vmatprep.subr.bf16.mxu0 %v4808_v28 }
 0xc36   :  { %4313 = vmatpush3.bf16.msra.mxu0 %v1402_v42 }
 0xc37   :  { %4314 = vmatprep.subr.bf16.mxu0 %v4808_v28 }
 0xc3a   :  { %4315 = vmatpush3.bf16.msra.mxu0 %v1403_v2 }
 0xc3b   :  { %4316 = vmatprep.subr.bf16.mxu0 %v4808_v28 }
 0xc3e   :  { %4317 = vmatpush3.bf16.msra.mxu0 %v1404_v5  ;;  %v4610_v5 = vld [vmem:[%s6065_s4 + $0x70] sm:$0xff]  }
 0xc3f   :  { %4350 = vmatprep.subr.bf16.mxu0 %v4808_v28 }
 0xc41   :  { %4319 = vmatmul.mubr.msk.bf16.vlgmr.msra.gmra.mrb[32].mxu0 %vm1238_vm2, %v4601_v11 }
 0xc42   :  { %4358 = vmatprep.mubr.msk.bf16.mxu0 %vm4809_vm3, %v4808_v28 }
 0xc86   :  { %v5305_v14 = vpop.permute.xlu1 %1626  ;;  %v5314_v58 = vpop.permute.xlu0 %1624 }
 0xc8a   :  { %v5312_v37 = vpop.permute.xlu1 %1628 }
 0xc8e   :  { %v5322_v41 = vpop.permute.xlu1 %1630 }
 0xd14   :  { %v1452_v36 = vpop.f32.mrb[32].mxu0 }
 0xd15   :  { %v4320_v39 = vpop.f32.mrb[33].mxu0  ;;  %v1453_v43 = vadd.f32 %v3915_v61, %v1452_v36 }
 0xd16   :  { %v1455_v40 = vpop.f32.mrb[34].mxu0 }
 0xd17   :  { %v1456_v19 = vadd.f32 %v3915_v61, %v1455_v40  ;;  %v4321_v45 = vpop.f32.mrb[35].mxu0 }
 0xd19   :  { %v1463_v48 = vpack.c.bf16 %v1456_v19, %v1453_v43 }
 0xd1b   :  { %4327 = vmatmul.mubr.msk.bf16.vlgmr.msra.gmra.mrb[24].mxu1 %vm69_vm0, %v1463_v48 }
 0xd1c   :  { %4331 = vmatpush3.bf16.msra.mxu1 %v4604_v46  ;;  %4334 = vmatprep.mubr.msk.bf16.mxu1 %vm4809_vm3, %v4808_v28 }
 0xd1d   :  { %4332 = vmatprep.subr.bf16.mxu1 %v4808_v28 }
 0xd20   :  { %4333 = vmatpush3.bf16.msra.mxu1 %v4605_v49 }
 0xd21   :  { %4338 = vmatprep.subr.bf16.mxu1 %v4808_v28 }
 0xd23   :  { %4335 = vmatmul.mubr.msk.bf16.vlgmr.msra.gmra.mrb[28].mxu1 %vm69_vm0, %v1533_v47 }
 0xd24   :  { %4346 = vmatprep.mubr.msk.bf16.mxu1 %vm4809_vm3, %v4808_v28 }
 0xdee   :  { %v1518_v9 = vpop.f32.mrb[24].mxu1 }
 0xdef   :  { %v4328_v51 = vpop.f32.mrb[25].mxu1  ;;  %v5301_v52 = vadd.f32 %v3918_v50, %v1518_v9 }
 0xdf0   :  { %v1521_v7 = vpop.f32.mrb[26].mxu1 }
 0xdf1   :  { %v5303_v12 = vadd.f32 %v3918_v50, %v1521_v7  ;;  %v4329_v53 = vpop.f32.mrb[27].mxu1 }
 0xdf3   :  { %v3204_v10 = vpack.c.bf16 %v5303_v12, %v5301_v52 }
 0xdf6   :  { %v1588_v15 = vpop.f32.mrb[28].mxu1 }
 0xdf7   :  { %v4336_v55 = vpop.f32.mrb[29].mxu1  ;;  %v1589_v57 = vadd.f32 %v3922_v54, %v1588_v15 }
 0xdf8   :  { %v1591_v22 = vpop.f32.mrb[30].mxu1 }
 0xdf9   :  { %v1592_v21 = vadd.f32 %v3922_v54, %v1591_v22  ;;  %v4337_v59 = vpop.f32.mrb[31].mxu1 }
 0xdfb   :  { %v5316_v8 = vpack.c.bf16 %v1592_v21, %v1589_v57 }
 0xdfd   :  { %v1637_v38 = vmul.bf16 %v5305_v14, %v5316_v8  ;;  %v1636_v60 = vmul.bf16 %v5314_v58, %v5316_v8  ;;  %v1639_v62 = vmul.bf16 %v5322_v41, %v5316_v8  ;;  %v1638_v63 = vmul.bf16 %v5312_v37, %v5316_v8 }
 0xdff   :  { %1646 = vrot.lane.b32.xlu1 %v1637_v38, %s4811_s20  ;;  %1644 = vrot.lane.b32.xlu0 %v1636_v60, %s4811_s20 }
 0xe03   :  { %1650 = vrot.lane.b32.xlu1 %v1639_v62, %s4811_s20  ;;  %1648 = vrot.lane.b32.xlu0 %v1638_v63, %s4811_s20 }
 0xe71   :  { %v1645_v0 = vpop.permute.xlu0 %1644  ;;  %v1647_v1 = vpop.permute.xlu1 %1646 }
 0xe72   :  { %v1656_v42 = vsel %vm69_vm0, %v1645_v0, 0  ;;  %v1659_v20 = vsel %vm69_vm0, %v1647_v1, 0 }
 0xe73   :  { %4339 = vmatpush3.bf16.xpose.msra.mxu1 %v1656_v42 }
 0xe74   :  { %4340 = vmatprep.subr.bf16.mxu1 %v4808_v28 }
 0xe75   :  { %v1649_v2 = vpop.permute.xlu0 %1648  ;;  %v1651_v4 = vpop.permute.xlu1 %1650 }
 0xe76   :  { %v1662_v3 = vsel %vm69_vm0, %v1649_v2, 0  ;;  %v1665_v11 = vsel %vm69_vm0, %v1651_v4, 0 }
 0xe7b   :  { %4341 = vmatpush3.bf16.xpose.msra.mxu1 %v1659_v20 }
 0xe7c   :  { %4342 = vmatprep.subr.bf16.mxu1 %v4808_v28 }
 0xe83   :  { %4343 = vmatpush3.bf16.xpose.msra.mxu1 %v1662_v3 }
 0xe84   :  { %4344 = vmatprep.subr.bf16.mxu1 %v4808_v28 }
 0xe8b   :  { %4345 = vmatpush3.bf16.xpose.msra.mxu1 %v1665_v11 }
 0xe8c   :  { %4378 = vmatprep.subr.bf16.mxu1 %v4610_v5 }
 0xe92   :  { %4347 = vmatmul.mubr.msk.bf16.vlgmr.msra.gmra.mrb[32].mxu1 %vm69_vm0, %v5316_v8 }
 0xe93   :  { %4379 = vmatpush3.bf16.msra.mxu1 %v4610_v5  ;;  %4382 = vmatprep.mubr.msk.bf16.mxu1 %vm69_vm0, %v2043_v29 }
 0xe94   :  { %4380 = vmatprep.subr.bf16.mxu1 %v4611_v30 }
 0xe97   :  { %4381 = vmatpush3.bf16.msra.mxu1 %v4611_v30 }
 0xe98   :  { %4406 = vmatprep.subr.bf16.mxu1 %v4808_v28 }
 0xe9a   :  { %4383 = vmatmul.mubr.msk.bf16.vlgmr.msra.gmra.mrb[36].mxu1 %vm69_vm0, %v2044_v27 }
 0xe9b   :  { %4422 = vmatprep.mubr.msk.bf16.mxu1 %vm4809_vm3, %v4808_v28 }
 0xf65   :  { %v1701_v17 = vpop.f32.mrb[32].mxu1 }
 0xf66   :  { %v1702_v23 = vadd.f32 %v1701_v17, %v1527_v13  ;;  %v4348_v25 = vpop.f32.mrb[33].mxu1 }
 0xf67   :  { %v1704_v26 = vpop.f32.mrb[34].mxu1 }
 0xf68   :  { %v1705_v29 = vadd.f32 %v1704_v26, %v1528_v18  ;;  %v4349_v31 = vpop.f32.mrb[35].mxu1  ;;  %v1708_v16 = vsel %vm517_vm1, %v1702_v23, -inf }
 0xf69   :  { %1709 = vmax.xlane.f32.xlu0 %v1708_v16 }
 0xf6a   :  { %v1711_v24 = vsel %vm517_vm1, %v1705_v29, -inf }
 0xf6b   :  { %1712 = vmax.xlane.f32.xlu1 %v1711_v24 }
 0xf6d   :  { %v4384_v27 = vpop.f32.mrb[36].mxu1 }
 0xf6e   :  { %v2102_v61 = vpop.f32.mrb[37].mxu1  ;;  %v2111_v39 = vadd.f32 %v4384_v27, %v3942_v32 }
 0xf6f   :  { %v4385_v36 = vpop.f32.mrb[38].mxu1  ;;  %v2103_v19 = vadd.f32 %v3942_v32, %v2102_v61 }
 0xf70   :  { %v2114_v40 = vadd.f32 %v4385_v36, %v3942_v32  ;;  %v2105_v43 = vpop.f32.mrb[39].mxu1 }
 0xf71   :  { %v2106_v45 = vadd.f32 %v3942_v32, %v2105_v43 }
 0xf72   :  { %v5369_v46 = vpack.c.bf16 %v2114_v40, %v2111_v39 }
 0xf73   :  { %v5371_v48 = vpack.c.bf16 %v2106_v45, %v2103_v19 }
 0xf7c   :  { %1791 = vrot.lane.b32.xlu1 %v5244_v56, %s4812_s9 }
 0xf80   :  { %1795 = vrot.lane.b32.xlu1 %v5265_v35, %s4812_s9 }
 0xff6   :  { %v1710_v49 = vpop.xlane.xlu0 %1709 }
 0xff7   :  { %v1714_v47 = vsub.f32 %v1702_v23, %v1710_v49 }
 0xff8   :  { %v1713_v50 = vpop.xlane.xlu1 %1712 }
 0xff9   :  { %v1716_v9 = vmul.f32 1.442695, %v1714_v47  ;;  %v1715_v51 = vsub.f32 %v1705_v29, %v1713_v50 }
 0xffb   :  { %4698 = vpow2.f32 %v1716_v9  ;;  %v1718_v7 = vmul.f32 1.442695, %v1715_v51 }
 0xffc   :  { %v5401_v15 = vpop.permute.xlu1 %1791 }
 0xffd   :  { %4700 = vpow2.f32 %v1718_v7  ;;  %v1802_v55 = vmul.bf16 %v5401_v15, %v5316_v8 }
0x1000   :  { %v5408_v21 = vpop.permute.xlu1 %1795 }
0x1001   :  { %v1804_v5 = vmul.bf16 %v5408_v21, %v5316_v8 }
0x1005   :  { %v5377_v53 = vpop.eup %4698 }
0x1006   :  { %1733 = vrot.lane.b32.xlu0 %v5377_v53, %s4813_s10  ;;  %v1721_v35 = vsel %vm1720_vm4, %v5377_v53, 0.0 }
0x1007   :  { %v5381_v54 = vpop.eup %4700 }
0x1008   :  { %1735 = vrot.lane.b32.xlu1 %v5381_v54, %s4813_s10  ;;  %v1724_v56 = vsel %vm1720_vm4, %v5381_v54, 0.0 }
0x100a   :  { %1749 = vrot.lane.b32.xlu0 %v5377_v53, %s4811_s20 }
0x100c   :  { %1751 = vrot.lane.b32.xlu1 %v5381_v54, %s4811_s20 }
0x100e   :  { %1765 = vrot.lane.b32.xlu0 %v5377_v53, %s4814_s11 }
0x1010   :  { %1767 = vrot.lane.b32.xlu1 %v5381_v54, %s4814_s11 }
0x1012   :  { %1789 = vrot.lane.b32.xlu0 %v5249_v33, %s4812_s9 }
0x1016   :  { %1793 = vrot.lane.b32.xlu0 %v5256_v34, %s4812_s9 }
0x1034   :  { %1725 = vadd.xlane.f32.xlu1 %v1724_v56 }
0x1035   :  { %1722 = vadd.xlane.f32.xlu0 %v1721_v35 }
0x1045   :  { %1811 = vrot.lane.b32.xlu1 %v1802_v55, %s4812_s9 }
0x1078   :  { %v1734_v33 = vpop.permute.xlu0 %1733 }
0x1079   :  { %v1739_v22 = vsel %vm1720_vm4, %v1734_v33, 0.0 }
0x107a   :  { %1740 = vadd.xlane.f32.xlu0 %v1739_v22  ;;  %v1736_v60 = vpop.permute.xlu1 %1735 }
0x107b   :  { %v1742_v63 = vsel %vm1720_vm4, %v1736_v60, 0.0 }
0x107c   :  { %v1750_v34 = vpop.permute.xlu0 %1749 }
0x107d   :  { %v1755_v57 = vsel %vm1720_vm4, %v1750_v34, 0.0 }
0x107e   :  { %1756 = vadd.xlane.f32.xlu0 %v1755_v57  ;;  %v1752_v20 = vpop.permute.xlu1 %1751 }
0x107f   :  { %v1758_v2 = vsel %vm1720_vm4, %v1752_v20, 0.0 }
0x1080   :  { %v1766_v59 = vpop.permute.xlu0 %1765 }
0x1081   :  { %v1771_v38 = vsel %vm1720_vm4, %v1766_v59, 0.0 }
0x1082   :  { %1772 = vadd.xlane.f32.xlu0 %v1771_v38  ;;  %v1768_v3 = vpop.permute.xlu1 %1767 }
0x1083   :  { %v1774_v4 = vsel %vm1720_vm4, %v1768_v3, 0.0 }
0x1084   :  { %v5411_v62 = vpop.permute.xlu0 %1789 }
0x1085   :  { %v1801_v1 = vmul.bf16 %v5411_v62, %v5316_v8 }
0x1086   :  { %1743 = vadd.xlane.f32.xlu0 %v1742_v63 }
0x1088   :  { %v5414_v0 = vpop.permute.xlu0 %1793 }
0x1089   :  { %v1803_v42 = vmul.bf16 %v5414_v0, %v5316_v8 }
0x108b   :  { %1813 = vrot.lane.b32.xlu1 %v1803_v42, %s4812_s9 }
0x109c   :  { %1809 = vrot.lane.b32.xlu0 %v1801_v1, %s4812_s9  ;;  %v3932_v1 = vld [vmem:[%s6066_s5 + $0x50] ss:$0 sm:$0xff] }
0x10af   :  { %1759 = vadd.xlane.f32.xlu1 %v1758_v2 }
0x10b3   :  { %1775 = vadd.xlane.f32.xlu1 %v1774_v4 }
0x10c1   :  { %v1726_v23 = vpop.xlane.xlu1 %1725 }
0x10c2   :  { %v1723_v11 = vpop.xlane.xlu0 %1722  ;;  %4702 = vrcp.f32 %v1726_v23 }
0x10c3   :  { %4704 = vrcp.f32 %v1723_v11 }
0x10c4   :  { %1815 = vrot.lane.b32.xlu1 %v1804_v5, %s4812_s9 }
0x10c5   :  { %v1812_v26 = vpop.permute.xlu1 %1811 }
0x10cc   :  { %v4703_v16 = vpop.eup %4702 }
0x10cd   :  { %v4705_v24 = vpop.eup %4704  ;;  %v1730_v47 = vmul.f32 %v4703_v16, %v5381_v54 }
0x10ce   :  { %v1728_v50 = vmul.f32 %v4705_v24, %v5377_v53 }
0x10fd   :  { %v1814_v29 = vpop.permute.xlu1 %1813 }
0x1107   :  { %v1741_v30 = vpop.xlane.xlu0 %1740 }
0x1108   :  { %4706 = vrcp.f32 %v1741_v30 }
0x110b   :  { %v1757_v13 = vpop.xlane.xlu0 %1756 }
0x110c   :  { %4708 = vrcp.f32 %v1757_v13 }
0x110f   :  { %v1773_v17 = vpop.xlane.xlu0 %1772 }
0x1112   :  { %v4707_v27 = vpop.eup %4706 }
0x1113   :  { %v1744_v18 = vpop.xlane.xlu0 %1743  ;;  %v1746_v43 = vmul.f32 %v4707_v27, %v5377_v53 }
0x1114   :  { %4710 = vrcp.f32 %v1744_v18 }
0x1115   :  { %4712 = vrcp.f32 %v1773_v17  ;;  %v1781_v7 = vsel %vm1720_vm4, %v1728_v50, %v1746_v43 }
0x1116   :  { %v4709_v32 = vpop.eup %4708 }
0x1117   :  { %v1810_v25 = vpop.permute.xlu0 %1809  ;;  %v1762_v45 = vmul.f32 %v4709_v32, %v5377_v53  ;;  %v4615_v32 = vld [vmem:[%s6065_s4 + $0x68] sm:$0xff]  }
0x1118   :  { %4351 = vmatpush3.bf16.msra.mxu0 %v1810_v25 }
0x1119   :  { %4352 = vmatprep.subr.bf16.mxu0 %v4808_v28  ;;  %v1783_v55 = vsel %vm69_vm0, %v1781_v7, %v1762_v45  ;;  %v5482_v7 = vld [vmem:[%s6064_s6 + $0x78] sm:$0xff]  }
0x111c   :  { %4353 = vmatpush3.bf16.msra.mxu0 %v1812_v26 }
0x111d   :  { %4354 = vmatprep.subr.bf16.mxu0 %v4808_v28 }
0x111e   :  { %v4711_v36 = vpop.eup %4710 }
0x111f   :  { %v4713_v39 = vpop.eup %4712  ;;  %v1748_v19 = vmul.f32 %v4711_v36, %v5381_v54 }
0x1120   :  { %4355 = vmatpush3.bf16.msra.mxu0 %v1814_v29  ;;  %v1778_v9 = vmul.f32 %v4713_v39, %v5377_v53  ;;  %v4612_v53 = vld [vmem:[%s6065_s4 + $0x50] sm:$0xff]  }
0x1121   :  { %4356 = vmatprep.subr.bf16.mxu0 %v4808_v28  ;;  %v1782_v56 = vsel %vm1720_vm4, %v1730_v47, %v1748_v19  ;;  %v3936_v47 = vld [vmem:[%s6066_s5 + $0x70] ss:$0 sm:$0xff] }
0x1122   :  { %v1786_v22 = vsel %vm1785_vm5, %v1783_v55, %v1778_v9 }
0x113c   :  { %v1760_v8 = vpop.xlane.xlu1 %1759 }
0x113d   :  { %4714 = vrcp.f32 %v1760_v8 }
0x1140   :  { %v1776_v31 = vpop.xlane.xlu1 %1775 }
0x1141   :  { %4716 = vrcp.f32 %v1776_v31 }
0x1144   :  { %v1816_v61 = vpop.permute.xlu1 %1815 }
0x1145   :  { %4357 = vmatpush3.bf16.msra.mxu0 %v1816_v61 }
0x1146   :  { %4362 = vmatprep.subr.bf16.mxu0 %v4808_v28 }
0x1147   :  { %v4715_v40 = vpop.eup %4714 }
0x1148   :  { %v1764_v49 = vmul.f32 %v4715_v40, %v5381_v54 }
0x114a   :  { %v1784_v33 = vsel %vm69_vm0, %v1782_v56, %v1764_v49  ;;  %v3937_v56 = vld [vmem:[%s6066_s5 + $0x78] ss:$0 sm:$0xff] }
0x114b   :  { %v4717_v51 = vpop.eup %4716 }
0x114c   :  { %v1780_v35 = vmul.f32 %v4717_v51, %v5381_v54  ;;  %v4613_v54 = vld [vmem:[%s6065_s4 + $0x58] sm:$0xff]  }
0x114e   :  { %v1787_v34 = vsel %vm1785_vm5, %v1784_v33, %v1780_v35 }
0x114f   :  { %v1788_v57 = vpack.c.bf16 %v1787_v34, %v1786_v22  ;;  %v2185_v22 = vmul.bf16 %v5482_v7, %v5371_v48 }
0x1151   :  { %4359 = vmatmul.mubr.msk.bf16.vlgmr.msra.gmra.mrb[36].mxu0 %vm517_vm1, %v1788_v57  ;;  %v4617_v57 = vld [vmem:[%s6064_s6 + $0x80] sm:$0xff]  }
0x1152   :  { %4363 = vmatpush3.bf16.msra.mxu0 %v4612_v53  ;;  %4366 = vmatprep.mubr.msk.bf16.mxu0 %vm4809_vm3, %v4808_v28  ;;  %v2198_v53 = vsel %vm69_vm0, %v2185_v22, 0 }
0x1153   :  { %4364 = vmatprep.subr.bf16.mxu0 %v4808_v28 }
0x1156   :  { %4365 = vmatpush3.bf16.msra.mxu0 %v4613_v54  ;;  %v2186_v54 = vmul.bf16 %v4617_v57, %v5369_v46 }
0x1157   :  { %4370 = vmatprep.subr.bf16.mxu0 %v4808_v28 }
0x1224   :  { %v1858_v59 = vpop.f32.mrb[36].mxu0 }
0x1225   :  { %v4360_v38 = vpop.f32.mrb[37].mxu0 }
0x1226   :  { %v1861_v60 = vpop.f32.mrb[38].mxu0  ;;  %v4618_v38 = vld [vmem:[%s6064_s6 + $0x88] sm:$0xff]  }
0x1227   :  { %v1869_v63 = vpack.c.bf16 %v1861_v60, %v1858_v59  ;;  %v4361_v42 = vpop.f32.mrb[39].mxu0  ;;  %v2201_v59 = vsel %vm69_vm0, %v2186_v54, 0  ;;  %v2187_v60 = vmul.bf16 %v4618_v38, %v5371_v48 }
0x1228   :  { %v5514_v42 = vld [vmem:[%s6064_s6 + $0x90] sm:$0xff]  }
0x1229   :  { %4367 = vmatmul.mubr.msk.bf16.vlgmr.msra.gmra.mrb[40].mxu0 %vm69_vm0, %v1869_v63  ;;  %v2204_v63 = vsel %vm69_vm0, %v2187_v60, 0 }
0x122a   :  { %4374 = vmatprep.mubr.msk.bf16.mxu0 %vm4809_vm3, %v4808_v28 }
0x12fc   :  { %v1924_v20 = vpop.f32.mrb[40].mxu0 }
0x12fd   :  { %v1925_v2 = vadd.f32 %v3932_v1, %v1924_v20  ;;  %v4368_v3 = vpop.f32.mrb[41].mxu0 }
0x12fe   :  { %v1927_v4 = vpop.f32.mrb[42].mxu0 }
0x12ff   :  { %v1928_v5 = vadd.f32 %v3932_v1, %v1927_v4  ;;  %v4369_v11 = vpop.f32.mrb[43].mxu0  ;;  %v1931_v30 = vadd.f32 %v1925_v2, %v5284_v44  ;;  %v2188_v1 = vmul.bf16 %v5514_v42, %v5369_v46  ;;  %v4620_v2 = vld [vmem:[%s6064_s6 + $0x98] sm:$0xff]  }
0x1300   :  { %v2189_v3 = vmul.bf16 %v4620_v2, %v5371_v48 }
0x1301   :  { %v1935_v13 = vsel %vm69_vm0, %v1931_v30, 0.0  ;;  %v1932_v17 = vadd.f32 %v1928_v5, %v5289_v6  ;;  %v4614_v6 = vld [vmem:[%s6065_s4 + $0x60] sm:$0xff]   ;;  %v2207_v20 = vsel %vm69_vm0, %v2188_v1, 0 }
0x1302   :  { %1936 = vadd.xlane.f32.xlu0 %v1935_v13  ;;  %4371 = vmatpush3.bf16.msra.mxu0 %v4614_v6  ;;  %v2210_v4 = vsel %vm69_vm0, %v2189_v3, 0  ;;  %v4621_v5 = vld [vmem:[%s6064_s6 + $0xa0] sm:$0xff]   ;;  %v4622_v13 = vld [vmem:[%s6064_s6 + $0xa8] sm:$0xff]  }
0x1303   :  { %v1938_v18 = vsel %vm69_vm0, %v1932_v17, 0.0  ;;  %4372 = vmatprep.subr.bf16.mxu0 %v4808_v28  ;;  %v2190_v11 = vmul.bf16 %v4621_v5, %v5369_v46 }
0x1304   :  { %1939 = vadd.xlane.f32.xlu1 %v1938_v18 }
0x1306   :  { %4373 = vmatpush3.bf16.msra.mxu0 %v4615_v32  ;;  %v2117_v32 = vld [vmem:[%s6069_s3] sm:$0xff] }
0x1307   :  { %4386 = vmatprep.subr.bf16.mxu0 %v4808_v28 }
0x138f   :  { %v1937_v23 = vpop.xlane.xlu0 %1936 }
0x1390   :  { %v1941_v25 = vmul.f32 0.03125, %v1937_v23  ;;  %v4623_v23 = vld [vmem:[%s6064_s6 + $0xb0] sm:$0xff]  }
0x1391   :  { %v1940_v26 = vpop.xlane.xlu1 %1939 }
0x1392   :  { %v1943_v29 = vsub.f32 %v1931_v30, %v1941_v25  ;;  %v1942_v8 = vmul.f32 0.03125, %v1940_v26  ;;  %v2213_v30 = vsel %vm69_vm0, %v2190_v11, 0  ;;  %v2192_v25 = vmul.bf16 %v4623_v23, %v5369_v46 }
0x1394   :  { %v1944_v31 = vsub.f32 %v1932_v17, %v1942_v8  ;;  %v1945_v16 = vmul.f32 %v1943_v29, %v1943_v29  ;;  %v2191_v17 = vmul.bf16 %v4622_v13, %v5371_v48  ;;  %v2219_v26 = vsel %vm69_vm0, %v2192_v25, 0 }
0x1396   :  { %v1947_v24 = vsel %vm69_vm0, %v1945_v16, 0.0  ;;  %v1946_v27 = vmul.f32 %v1944_v31, %v1944_v31  ;;  %v2216_v18 = vsel %vm69_vm0, %v2191_v17, 0 }
0x1397   :  { %1948 = vadd.xlane.f32.xlu0 %v1947_v24 }
0x1398   :  { %v1950_v44 = vsel %vm69_vm0, %v1946_v27, 0.0 }
0x139b   :  { %1951 = vadd.xlane.f32.xlu0 %v1950_v44 }
0x1424   :  { %v1949_v61 = vpop.xlane.xlu0 %1948 }
0x1425   :  { %v1953_v36 = vmul.f32 0.03125, %v1949_v61 }
0x1427   :  { %v1955_v39 = vadd.f32 1e-05, %v1953_v36  ;;  %v2118_v36 = vld [vmem:[%s6069_s3 + $0x8] sm:$0xff] }
0x1428   :  { %v1952_v40 = vpop.xlane.xlu0 %1951 }
0x1429   :  { %4718 = vrsqrt.f32 %v1955_v39  ;;  %v1954_v43 = vmul.f32 0.03125, %v1952_v40 }
0x142b   :  { %v1956_v19 = vadd.f32 1e-05, %v1954_v43 }
0x142d   :  { %4720 = vrsqrt.f32 %v1956_v19 }
0x1433   :  { %v4719_v45 = vpop.eup %4718 }
0x1434   :  { %v1959_v49 = vmul.f32 %v4719_v45, %v1943_v29  ;;  %v3938_v29 = vld [vmem:[%s6066_s5 + $0x58] ss:$0 sm:$0xff] }
0x1436   :  { %v1965_v51 = vmul.f32 %v3936_v47, %v1959_v49 }
0x1437   :  { %v4721_v50 = vpop.eup %4720 }
0x1438   :  { %v1960_v9 = vmul.f32 %v4721_v50, %v1944_v31  ;;  %v5487_v55 = vadd.f32 %v3937_v56, %v1965_v51 }
0x143a   :  { %v1966_v35 = vmul.f32 %v3936_v47, %v1960_v9 }
0x143c   :  { %v5489_v33 = vadd.f32 %v3937_v56, %v1966_v35 }
0x143e   :  { %v1977_v34 = vpack.c.bf16 %v5489_v33, %v5487_v55 }
0x1440   :  { %4375 = vmatmul.mubr.msk.bf16.vlgmr.msra.gmra.mrb[44].mxu0 %vm69_vm0, %v1977_v34 }
0x1441   :  { %4387 = vmatpush3.bf16.xpose.msra.mxu0 %v2198_v53  ;;  %4402 = vmatprep.mubr.msk.bf16.mxu0 %vm4809_vm3, %v4808_v28 }
0x1442   :  { %4388 = vmatprep.subr.bf16.mxu0 %v4808_v28 }
0x1449   :  { %4389 = vmatpush3.bf16.xpose.msra.mxu0 %v2201_v59 }
0x144a   :  { %4390 = vmatprep.subr.bf16.mxu0 %v4808_v28 }
0x1451   :  { %4391 = vmatpush3.bf16.xpose.msra.mxu0 %v2204_v63 }
0x1452   :  { %4392 = vmatprep.subr.bf16.mxu0 %v4808_v28 }
0x1459   :  { %4393 = vmatpush3.bf16.xpose.msra.mxu0 %v2207_v20 }
0x145a   :  { %4394 = vmatprep.subr.bf16.mxu0 %v4808_v28 }
0x1461   :  { %4395 = vmatpush3.bf16.xpose.msra.mxu0 %v2210_v4 }
0x1462   :  { %4396 = vmatprep.subr.bf16.mxu0 %v4808_v28 }
0x1469   :  { %4397 = vmatpush3.bf16.xpose.msra.mxu0 %v2213_v30 }
0x146a   :  { %4398 = vmatprep.subr.bf16.mxu0 %v4808_v28 }
0x1471   :  { %4399 = vmatpush3.bf16.xpose.msra.mxu0 %v2216_v18 }
0x1472   :  { %4400 = vmatprep.subr.bf16.mxu0 %v4808_v28 }
0x1479   :  { %4401 = vmatpush3.bf16.xpose.msra.mxu0 %v2219_v26 }
0x147a   :  { %4454 = vmatprep.subr.bf16.mxu0 %v4808_v28 }
0x1513   :  { %v2032_v8 = vpop.f32.mrb[44].mxu0 }
0x1514   :  { %v4376_v31 = vpop.f32.mrb[45].mxu0  ;;  %v2033_v24 = vadd.f32 %v3938_v29, %v2032_v8 }
0x1515   :  { %v2035_v16 = vpop.f32.mrb[46].mxu0 }
0x1516   :  { %v2036_v27 = vadd.f32 %v3938_v29, %v2035_v16  ;;  %v4377_v44 = vpop.f32.mrb[47].mxu0 }
0x1518   :  { %v2193_v6 = vpack.c.bf16 %v2036_v27, %v2033_v24 }
0x151a   :  { %4403 = vmatmul.mubr.msk.bf16.vlgmr.msra.gmra.mrb[48].mxu0 %vm69_vm0, %v2193_v6 }
0x151b   :  { %4458 = vmatprep.mubr.msk.bf16.mxu0 %vm4809_vm3, %v4808_v28 }
0x15ed   :  { %v2255_v61 = vpop.f32.mrb[48].mxu0 }
0x15ee   :  { %v2256_v39 = vadd.f32 %v2255_v61, %v2117_v32  ;;  %v4404_v40 = vpop.f32.mrb[49].mxu0 }
0x15ef   :  { %v2258_v43 = vpop.f32.mrb[50].mxu0 }
0x15f0   :  { %v2259_v19 = vadd.f32 %v2258_v43, %v2118_v36  ;;  %2262 = vmax.xlane.f32.xlu0 %v2256_v39  ;;  %v4405_v45 = vpop.f32.mrb[51].mxu0 }
0x15f2   :  { %2264 = vmax.xlane.f32.xlu1 %v2259_v19 }
0x1603   :  { %2339 = vrot.lane.b32.xlu1 %v5482_v7, %s4810_s26 }
0x1606   :  { %2343 = vrot.lane.b32.xlu0 %v4618_v38, %s4810_s26 }
0x1607   :  { %2341 = vrot.lane.b32.xlu1 %v4617_v57, %s4810_s26 }
0x167d   :  { %v2263_v49 = vpop.xlane.xlu0 %2262 }
0x167e   :  { %v2266_v47 = vsub.f32 %v2256_v39, %v2263_v49 }
0x167f   :  { %v2265_v50 = vpop.xlane.xlu1 %2264 }
0x1680   :  { %v2268_v9 = vmul.f32 1.442695, %v2266_v47  ;;  %v2267_v51 = vsub.f32 %v2259_v19, %v2265_v50 }
0x1681   :  { %v2344_v59 = vpop.permute.xlu0 %2343 }
0x1682   :  { %4722 = vpow2.f32 %v2268_v9  ;;  %v2270_v56 = vmul.f32 1.442695, %v2267_v51  ;;  %v2365_v38 = vmul.bf16 %v2344_v59, %v5371_v48 }
0x1683   :  { %v2340_v22 = vpop.permute.xlu1 %2339 }
0x1684   :  { %4724 = vpow2.f32 %v2270_v56  ;;  %v2363_v54 = vmul.bf16 %v2340_v22, %v5371_v48 }
0x1687   :  { %v2342_v34 = vpop.permute.xlu1 %2341 }
0x1688   :  { %v2364_v53 = vmul.bf16 %v2342_v34, %v5369_v46 }
0x168c   :  { %v5561_v35 = vpop.eup %4722 }
0x168d   :  { %2284 = vrot.lane.b32.xlu0 %v5561_v35, %s4811_s20  ;;  %2300 = vrot.lane.b32.xlu1 %v5561_v35, %s4812_s9  ;;  %v2272_v57 = vsel %vm69_vm0, %v5561_v35, 0.0 }
0x168e   :  { %v5570_v7 = vpop.eup %4724 }
0x1691   :  { %2347 = vrot.lane.b32.xlu0 %v4620_v2, %s4810_s26  ;;  %2316 = vrot.lane.b32.xlu1 %v5561_v35, %s4810_s26 }
0x1695   :  { %2351 = vrot.lane.b32.xlu0 %v4622_v13, %s4810_s26  ;;  %2286 = vrot.lane.b32.xlu1 %v5570_v7, %s4811_s20 }
0x1699   :  { %2302 = vrot.lane.b32.xlu0 %v5570_v7, %s4812_s9  ;;  %2345 = vrot.lane.b32.xlu1 %v5514_v42, %s4810_s26 }
0x169d   :  { %2318 = vrot.lane.b32.xlu0 %v5570_v7, %s4810_s26  ;;  %2349 = vrot.lane.b32.xlu1 %v4621_v5, %s4810_s26 }
0x16a1   :  { %2353 = vrot.lane.b32.xlu1 %v4623_v23, %s4810_s26  ;;  %v2275_v23 = vsel %vm69_vm0, %v5570_v7, 0.0 }
0x16a5   :  { %2381 = vrot.lane.b32.xlu1 %v2364_v53, %s4811_s20 }
0x16bc   :  { %2273 = vadd.xlane.f32.xlu0 %v2272_v57 }
0x16d2   :  { %2379 = vrot.lane.b32.xlu0 %v2363_v54, %s4811_s20 }
0x16d6   :  { %2383 = vrot.lane.b32.xlu0 %v2365_v38, %s4811_s20 }
0x16ff   :  { %v2285_v60 = vpop.permute.xlu0 %2284  ;;  %v2301_v63 = vpop.permute.xlu1 %2300 }
0x1700   :  { %v2290_v30 = vsel %vm69_vm0, %v2285_v60, 0.0  ;;  %v2306_v13 = vsel %vm69_vm0, %v2301_v63, 0.0 }
0x1703   :  { %v2348_v42 = vpop.permute.xlu0 %2347  ;;  %v2317_v1 = vpop.permute.xlu1 %2316 }
0x1704   :  { %v2367_v20 = vmul.bf16 %v2348_v42, %v5371_v48  ;;  %v2322_v26 = vsel %vm69_vm0, %v2317_v1, 0.0 }
0x1706   :  { %2387 = vrot.lane.b32.xlu0 %v2367_v20, %s4811_s20 }
0x1707   :  { %v2287_v2 = vpop.permute.xlu1 %2286  ;;  %v2352_v18 = vpop.permute.xlu0 %2351 }
0x1708   :  { %v2293_v17 = vsel %vm69_vm0, %v2287_v2, 0.0  ;;  %v2369_v31 = vmul.bf16 %v2352_v18, %v5371_v48  ;;  %v4624_v18 = vld [vmem:[%s6065_s4 + $0x80] sm:$0xff]  }
0x170b   :  { %v2346_v3 = vpop.permute.xlu1 %2345  ;;  %v2303_v25 = vpop.permute.xlu0 %2302 }
0x170c   :  { %v2366_v4 = vmul.bf16 %v2346_v3, %v5369_v46  ;;  %v2309_v29 = vsel %vm69_vm0, %v2303_v25, 0.0 }
0x170e   :  { %2385 = vrot.lane.b32.xlu1 %v2366_v4, %s4811_s20 }
0x170f   :  { %v2350_v5 = vpop.permute.xlu1 %2349  ;;  %v2319_v8 = vpop.permute.xlu0 %2318 }
0x1710   :  { %v2368_v11 = vmul.bf16 %v2350_v5, %v5369_v46  ;;  %v2325_v16 = vsel %vm69_vm0, %v2319_v8, 0.0 }
0x1712   :  { %2389 = vrot.lane.b32.xlu1 %v2368_v11, %s4811_s20 }
0x1713   :  { %v2354_v27 = vpop.permute.xlu1 %2353 }
0x1714   :  { %v2370_v6 = vmul.bf16 %v2354_v27, %v5369_v46 }
0x1717   :  { %v2382_v32 = vpop.permute.xlu1 %2381 }
0x1725   :  { %2291 = vadd.xlane.f32.xlu0 %v2290_v30 }
0x1729   :  { %2307 = vadd.xlane.f32.xlu0 %v2306_v13 }
0x172d   :  { %2294 = vadd.xlane.f32.xlu0 %v2293_v17 }
0x1736   :  { %2276 = vadd.xlane.f32.xlu1 %v2275_v23 }
0x173a   :  { %2323 = vadd.xlane.f32.xlu1 %v2322_v26 }
0x173e   :  { %2310 = vadd.xlane.f32.xlu1 %v2309_v29 }
0x1742   :  { %2326 = vadd.xlane.f32.xlu1 %v2325_v16 }
0x1743   :  { %2391 = vrot.lane.b32.xlu0 %v2369_v31, %s4811_s20  ;;  %v3956_v31 = vld [vmem:[%s6066_s5 + $0x68] ss:$0 sm:$0xff] }
0x1749   :  { %v2274_v24 = vpop.xlane.xlu0 %2273 }
0x174a   :  { %4726 = vrcp.f32 %v2274_v24 }
0x174d   :  { %v2380_v44 = vpop.permute.xlu0 %2379 }
0x174e   :  { %4407 = vmatpush3.bf16.msra.mxu1 %v2380_v44 }
0x174f   :  { %4408 = vmatprep.subr.bf16.mxu1 %v4808_v28 }
0x1751   :  { %v2384_v48 = vpop.permute.xlu0 %2383 }
0x1752   :  { %4409 = vmatpush3.bf16.msra.mxu1 %v2382_v32 }
0x1753   :  { %2393 = vrot.lane.b32.xlu1 %v2370_v6, %s4811_s20  ;;  %4410 = vmatprep.subr.bf16.mxu1 %v4808_v28 }
0x1754   :  { %v4727_v9 = vpop.eup %4726 }
0x1755   :  { %v2279_v42 = vmul.f32 %v4727_v9, %v5561_v35 }
0x1756   :  { %4411 = vmatpush3.bf16.msra.mxu1 %v2384_v48 }
0x1757   :  { %4412 = vmatprep.subr.bf16.mxu1 %v4808_v28 }
0x1778   :  { %v2388_v36 = vpop.permute.xlu0 %2387 }
0x1780   :  { %v2386_v61 = vpop.permute.xlu1 %2385 }
0x1781   :  { %4413 = vmatpush3.bf16.msra.mxu1 %v2386_v61 }
0x1782   :  { %4414 = vmatprep.subr.bf16.mxu1 %v4808_v28 }
0x1784   :  { %v2390_v39 = vpop.permute.xlu1 %2389 }
0x1785   :  { %4415 = vmatpush3.bf16.msra.mxu1 %v2388_v36 }
0x1786   :  { %4416 = vmatprep.subr.bf16.mxu1 %v4808_v28 }
0x1789   :  { %4417 = vmatpush3.bf16.msra.mxu1 %v2390_v39 }
0x178a   :  { %4418 = vmatprep.subr.bf16.mxu1 %v4808_v28 }
0x17b2   :  { %v2292_v46 = vpop.xlane.xlu0 %2291 }
0x17b3   :  { %4728 = vrcp.f32 %v2292_v46 }
0x17b6   :  { %v2308_v40 = vpop.xlane.xlu0 %2307 }
0x17b7   :  { %4730 = vrcp.f32 %v2308_v40 }
0x17ba   :  { %v2295_v43 = vpop.xlane.xlu0 %2294 }
0x17bb   :  { %4732 = vrcp.f32 %v2295_v43 }
0x17bd   :  { %v4729_v51 = vpop.eup %4728 }
0x17be   :  { %v2392_v19 = vpop.permute.xlu0 %2391  ;;  %v2297_v59 = vmul.f32 %v4729_v51, %v5561_v35  ;;  %v4627_v51 = vld [vmem:[%s6065_s4 + $0x98] sm:$0xff]  }
0x17bf   :  { %4419 = vmatpush3.bf16.msra.mxu1 %v2392_v19 }
0x17c0   :  { %4420 = vmatprep.subr.bf16.mxu1 %v4808_v28  ;;  %v2332_v4 = vsel %vm69_vm0, %v2279_v42, %v2297_v59 }
0x17c1   :  { %v4731_v56 = vpop.eup %4730 }
0x17c2   :  { %v2313_v60 = vmul.f32 %v4731_v56, %v5561_v35 }
0x17c3   :  { %v2277_v45 = vpop.xlane.xlu1 %2276 }
0x17c4   :  { %4734 = vrcp.f32 %v2277_v45  ;;  %v2334_v11 = vsel %vm517_vm1, %v2332_v4, %v2313_v60  ;;  %v3960_v60 = vld [vmem:[%s6066_s5 + $0x80] ss:$0 sm:$0xff] }
0x17c5   :  { %v4733_v22 = vpop.eup %4732 }
0x17c6   :  { %v2299_v1 = vmul.f32 %v4733_v22, %v5570_v7 }
0x17c7   :  { %v2324_v49 = vpop.xlane.xlu1 %2323 }
0x17c8   :  { %4736 = vrcp.f32 %v2324_v49 }
0x17cb   :  { %v2311_v47 = vpop.xlane.xlu1 %2310 }
0x17cc   :  { %4738 = vrcp.f32 %v2311_v47 }
0x17ce   :  { %v4735_v53 = vpop.eup %4734 }
0x17cf   :  { %v2327_v50 = vpop.xlane.xlu1 %2326  ;;  %v2281_v38 = vmul.f32 %v4735_v53, %v5570_v7 }
0x17d0   :  { %4740 = vrcp.f32 %v2327_v50 }
0x17d1   :  { %v2333_v5 = vsel %vm69_vm0, %v2281_v38, %v2299_v1 }
0x17d2   :  { %v4737_v57 = vpop.eup %4736 }
0x17d3   :  { %v2394_v34 = vpop.permute.xlu1 %2393  ;;  %v2329_v20 = vmul.f32 %v4737_v57, %v5561_v35 }
0x17d4   :  { %4421 = vmatpush3.bf16.msra.mxu1 %v2394_v34 }
0x17d5   :  { %4426 = vmatprep.subr.bf16.mxu1 %v4808_v28  ;;  %v2336_v13 = vsel %vm1238_vm2, %v2334_v11, %v2329_v20  ;;  %v3961_v20 = vld [vmem:[%s6066_s5 + $0x88] ss:$0 sm:$0xff] }
0x17d6   :  { %v4739_v54 = vpop.eup %4738 }
0x17d7   :  { %v2315_v63 = vmul.f32 %v4739_v54, %v5570_v7 }
0x17d9   :  { %v2335_v30 = vsel %vm517_vm1, %v2333_v5, %v2315_v63  ;;  %v4628_v5 = vld [vmem:[%s6065_s4 + $0xa0] sm:$0xff]  }
0x17da   :  { %v4741_v2 = vpop.eup %4740 }
0x17db   :  { %v2331_v3 = vmul.f32 %v4741_v2, %v5570_v7  ;;  %v4625_v7 = vld [vmem:[%s6065_s4 + $0x88] sm:$0xff]  }
0x17dd   :  { %v2337_v17 = vsel %vm1238_vm2, %v2335_v30, %v2331_v3  ;;  %v4629_v30 = vld [vmem:[%s6065_s4 + $0xa8] sm:$0xff]  }
0x17de   :  { %v2338_v35 = vpack.c.bf16 %v2337_v17, %v2336_v13  ;;  %v4630_v13 = vld [vmem:[%s6065_s4 + $0xb0] sm:$0xff]   ;;  %v4631_v17 = vld [vmem:[%s6065_s4 + $0xb8] sm:$0xff]  }
0x17e0   :  { %4423 = vmatmul.mubr.bf16.vlgmr.msra.gmra.mrb[40].mxu1 %v2338_v35 }
0x17e1   :  { %4427 = vmatpush3.bf16.msra.mxu1 %v4624_v18  ;;  %4430 = vmatprep.mubr.msk.bf16.mxu1 %vm4809_vm3, %v4808_v28  ;;  %v3962_v18 = vld [vmem:[%s6066_s5 + $0xa0] ss:$0 sm:$0xff] }
0x17e2   :  { %4428 = vmatprep.subr.bf16.mxu1 %v4808_v28 }
0x17e5   :  { %4429 = vmatpush3.bf16.msra.mxu1 %v4625_v7 }
0x17e6   :  { %4434 = vmatprep.subr.bf16.mxu1 %v4808_v28 }
0x18b3   :  { %v2437_v23 = vpop.f32.mrb[40].mxu1 }
0x18b4   :  { %v4424_v25 = vpop.f32.mrb[41].mxu1 }
0x18b5   :  { %v2440_v26 = vpop.f32.mrb[42].mxu1 }
0x18b6   :  { %v2448_v29 = vpack.c.bf16 %v2440_v26, %v2437_v23  ;;  %v4425_v8 = vpop.f32.mrb[43].mxu1 }
0x18b8   :  { %4431 = vmatmul.mubr.msk.bf16.vlgmr.msra.gmra.mrb[44].mxu1 %vm69_vm0, %v2448_v29 }
0x18b9   :  { %4438 = vmatprep.mubr.msk.bf16.mxu1 %vm4809_vm3, %v4808_v28 }
0x198b   :  { %v2503_v16 = vpop.f32.mrb[44].mxu1 }
0x198c   :  { %v2504_v24 = vadd.f32 %v3956_v31, %v2503_v16  ;;  %v4432_v27 = vpop.f32.mrb[45].mxu1 }
0x198d   :  { %v2506_v44 = vpop.f32.mrb[46].mxu1 }
0x198e   :  { %v2510_v6 = vadd.f32 %v2504_v24, %v5487_v55  ;;  %v2507_v32 = vadd.f32 %v3956_v31, %v2506_v44  ;;  %v4433_v48 = vpop.f32.mrb[47].mxu1  ;;  %v3966_v24 = vld [vmem:[%s6066_s5 + $0xa8] ss:$0 sm:$0xff] }
0x1990   :  { %v2511_v61 = vadd.f32 %v2507_v32, %v5489_v33  ;;  %v2514_v36 = vsel %vm69_vm0, %v2510_v6, 0.0  ;;  %v4626_v33 = vld [vmem:[%s6065_s4 + $0x90] sm:$0xff]  }
0x1991   :  { %2515 = vadd.xlane.f32.xlu0 %v2514_v36  ;;  %4435 = vmatpush3.bf16.msra.mxu1 %v4626_v33 }
0x1992   :  { %v2517_v39 = vsel %vm69_vm0, %v2511_v61, 0.0  ;;  %4436 = vmatprep.subr.bf16.mxu1 %v4808_v28 }
0x1993   :  { %2518 = vadd.xlane.f32.xlu1 %v2517_v39 }
0x1995   :  { %4437 = vmatpush3.bf16.msra.mxu1 %v4627_v51 }
0x1996   :  { %4442 = vmatprep.subr.bf16.mxu1 %v4808_v28 }
0x1a1e   :  { %v2516_v46 = vpop.xlane.xlu0 %2515 }
0x1a1f   :  { %v2520_v40 = vmul.f32 0.03125, %v2516_v46 }
0x1a20   :  { %v2519_v43 = vpop.xlane.xlu1 %2518 }
0x1a21   :  { %v2522_v19 = vsub.f32 %v2510_v6, %v2520_v40  ;;  %v2521_v45 = vmul.f32 0.03125, %v2519_v43 }
0x1a23   :  { %v2523_v49 = vsub.f32 %v2511_v61, %v2521_v45  ;;  %v2524_v47 = vmul.f32 %v2522_v19, %v2522_v19 }
0x1a25   :  { %v2526_v50 = vsel %vm69_vm0, %v2524_v47, 0.0  ;;  %v2525_v55 = vmul.f32 %v2523_v49, %v2523_v49 }
0x1a26   :  { %2527 = vadd.xlane.f32.xlu0 %v2526_v50 }
0x1a27   :  { %v2529_v9 = vsel %vm69_vm0, %v2525_v55, 0.0 }
0x1a2a   :  { %2530 = vadd.xlane.f32.xlu0 %v2529_v9 }
0x1ab3   :  { %v2528_v56 = vpop.xlane.xlu0 %2527 }
0x1ab4   :  { %v2532_v22 = vmul.f32 0.03125, %v2528_v56  ;;  %v4632_v56 = vld [vmem:[%s6065_s4 + $0x100] sm:$0xff]  }
0x1ab5   :  { %4455 = vmatpush3.bf16.msra.mxu0 %v4632_v56 }
0x1ab6   :  { %v2534_v34 = vadd.f32 1e-05, %v2532_v22  ;;  %v4633_v22 = vld [vmem:[%s6065_s4 + $0x108] sm:$0xff]   ;;  %4456 = vmatprep.subr.bf16.mxu0 %v4808_v28 }
0x1ab7   :  { %v2531_v53 = vpop.xlane.xlu0 %2530 }
0x1ab8   :  { %4742 = vrsqrt.f32 %v2534_v34  ;;  %v2533_v57 = vmul.f32 0.03125, %v2531_v53 }
0x1ab9   :  { %4457 = vmatpush3.bf16.msra.mxu0 %v4633_v22 }
0x1aba   :  { %v2535_v54 = vadd.f32 1e-05, %v2533_v57  ;;  %4474 = vmatprep.subr.bf16.mxu0 %v4808_v28 }
0x1abc   :  { %4744 = vrsqrt.f32 %v2535_v54 }
0x1ac2   :  { %v4743_v59 = vpop.eup %4742 }
0x1ac3   :  { %v2538_v38 = vmul.f32 %v4743_v59, %v2522_v19 }
0x1ac5   :  { %v2544_v42 = vmul.f32 %v3960_v60, %v2538_v38 }
0x1ac6   :  { %v4745_v63 = vpop.eup %4744 }
0x1ac7   :  { %v2539_v1 = vmul.f32 %v4745_v63, %v2523_v49  ;;  %v2550_v3 = vadd.f32 %v3961_v20, %v2544_v42  ;;  %v3972_v63 = vld [vmem:[%s6066_s5 + $0x90] ss:$0 sm:$0xff] }
0x1ac9   :  { %v2545_v2 = vmul.f32 %v3960_v60, %v2539_v1 }
0x1acb   :  { %v2551_v4 = vadd.f32 %v3961_v20, %v2545_v2 }
0x1acd   :  { %v2556_v11 = vpack.c.bf16 %v2551_v4, %v2550_v3 }
0x1acf   :  { %4439 = vmatmul.mubr.msk.bf16.vlgmr.msra.gmra.mrb[48].mxu1 %vm69_vm0, %v2556_v11 }
0x1ad0   :  { %4443 = vmatpush3.bf16.msra.mxu1 %v4628_v5  ;;  %4450 = vmatprep.mubr.msk.bf16.mxu1 %vm4809_vm3, %v4808_v28 }
0x1ad1   :  { %4444 = vmatprep.subr.bf16.mxu1 %v4808_v28 }
0x1ad4   :  { %4445 = vmatpush3.bf16.msra.mxu1 %v4629_v30 }
0x1ad5   :  { %4446 = vmatprep.subr.bf16.mxu1 %v4808_v28 }
0x1ad8   :  { %4447 = vmatpush3.bf16.msra.mxu1 %v4630_v13  ;;  %v3974_v13 = vld [vmem:[%s6066_s5 + $0xf8] ss:$0 sm:$0xff] }
0x1ad9   :  { %4448 = vmatprep.subr.bf16.mxu1 %v4808_v28 }
0x1adc   :  { %4449 = vmatpush3.bf16.msra.mxu1 %v4631_v17 }
0x1add   :  { %4462 = vmatprep.subr.bf16.mxu1 %v4808_v28 }
0x1ba2   :  { %v2611_v35 = vpop.f32.mrb[48].mxu1 }
0x1ba3   :  { %v2612_v7 = vadd.f32 %v3962_v18, %v2611_v35  ;;  %v4440_v23 = vpop.f32.mrb[49].mxu1 }
0x1ba4   :  { %v2614_v25 = vpop.f32.mrb[50].mxu1 }
0x1ba5   :  { %v2615_v26 = vadd.f32 %v3962_v18, %v2614_v25  ;;  %v4441_v29 = vpop.f32.mrb[51].mxu1  ;;  %v2618_v8 = vmax.f32 %v2612_v7, 0.0 }
0x1ba7   :  { %v2619_v31 = vmax.f32 %v2615_v26, 0.0 }
0x1ba9   :  { %v2628_v16 = vpack.c.bf16 %v2619_v31, %v2618_v8 }
0x1bab   :  { %4451 = vmatmul.mubr.msk.bf16.vlgmr.msra.gmra.mrb[52].mxu1 %vm517_vm1, %v2628_v16 }
0x1bac   :  { %4470 = vmatprep.mubr.msk.bf16.mxu1 %vm4809_vm3, %v4808_v28 }
0x1c7e   :  { %v2695_v27 = vpop.f32.mrb[52].mxu1 }
0x1c7f   :  { %v2696_v44 = vadd.f32 %v3966_v24, %v2695_v27  ;;  %v4452_v6 = vpop.f32.mrb[53].mxu1 }
0x1c80   :  { %v2698_v32 = vpop.f32.mrb[54].mxu1 }
0x1c81   :  { %v2702_v48 = vadd.f32 %v2696_v44, %v2550_v3  ;;  %v2699_v61 = vadd.f32 %v3966_v24, %v2698_v32  ;;  %v4453_v36 = vpop.f32.mrb[55].mxu1  ;;  %v3973_v3 = vld [vmem:[%s6066_s5 + $0x98] ss:$0 sm:$0xff] }
0x1c83   :  { %v2703_v39 = vadd.f32 %v2699_v61, %v2551_v4  ;;  %v2706_v46 = vsel %vm69_vm0, %v2702_v48, 0.0 }
0x1c84   :  { %2707 = vadd.xlane.f32.xlu0 %v2706_v46  ;;  %v4635_v46 = vld [vmem:[%s6065_s4 + $0x138] sm:$0xff]  }
0x1c85   :  { %v2709_v40 = vsel %vm69_vm0, %v2703_v39, 0.0 }
0x1c86   :  { %2710 = vadd.xlane.f32.xlu1 %v2709_v40 }
0x1d11   :  { %v2708_v43 = vpop.xlane.xlu0 %2707 }
0x1d12   :  { %v2712_v19 = vmul.f32 0.03125, %v2708_v43  ;;  %v4802_v43 = vld [vmem:[%s6068_s2] sm:$0xff] }
0x1d13   :  { %v2711_v45 = vpop.xlane.xlu1 %2710 }
0x1d14   :  { %v2714_v49 = vsub.f32 %v2702_v48, %v2712_v19  ;;  %v2713_v47 = vmul.f32 0.03125, %v2711_v45 }
0x1d16   :  { %v2715_v50 = vsub.f32 %v2703_v39, %v2713_v47  ;;  %v2716_v55 = vmul.f32 %v2714_v49, %v2714_v49  ;;  %v4634_v39 = vld [vmem:[%s6065_s4 + $0x130] sm:$0xff]   ;;  %v4803_v47 = vld [vmem:[%s6068_s2 + $0x8] sm:$0xff] }
0x1d18   :  { %v2718_v9 = vsel %vm69_vm0, %v2716_v55, 0.0  ;;  %v2717_v33 = vmul.f32 %v2715_v50, %v2715_v50 }
0x1d19   :  { %2719 = vadd.xlane.f32.xlu0 %v2718_v9 }
0x1d1a   :  { %v2721_v51 = vsel %vm69_vm0, %v2717_v33, 0.0 }
0x1d1b   :  { %2722 = vadd.xlane.f32.xlu1 %v2721_v51 }
0x1da6   :  { %v2720_v34 = vpop.xlane.xlu0 %2719 }
0x1da7   :  { %v2724_v53 = vmul.f32 0.03125, %v2720_v34 }
0x1da8   :  { %v2723_v57 = vpop.xlane.xlu1 %2722 }
0x1da9   :  { %v2726_v54 = vadd.f32 1e-05, %v2724_v53  ;;  %v2725_v59 = vmul.f32 0.03125, %v2723_v57 }
0x1dab   :  { %4746 = vrsqrt.f32 %v2726_v54  ;;  %v2727_v38 = vadd.f32 1e-05, %v2725_v59 }
0x1dad   :  { %4748 = vrsqrt.f32 %v2727_v38 }
0x1db5   :  { %v4747_v60 = vpop.eup %4746 }
0x1db6   :  { %v2730_v42 = vmul.f32 %v4747_v60, %v2714_v49 }
0x1db7   :  { %v4749_v1 = vpop.eup %4748 }
0x1db8   :  { %v2736_v20 = vmul.f32 %v3972_v63, %v2730_v42  ;;  %v2731_v2 = vmul.f32 %v4749_v1, %v2715_v50 }
0x1dba   :  { %v2737_v4 = vmul.f32 %v3972_v63, %v2731_v2  ;;  %v5713_v5 = vadd.f32 %v3973_v3, %v2736_v20 }
0x1dbc   :  { %v5715_v11 = vadd.f32 %v3973_v3, %v2737_v4 }
0x1dbe   :  { %v2748_v30 = vpack.c.bf16 %v5715_v11, %v5713_v5 }
0x1dc0   :  { %4459 = vmatmul.mubr.msk.bf16.vlgmr.msra.gmra.mrb[52].mxu0 %vm69_vm0, %v2748_v30 }
0x1dc1   :  { %4482 = vmatprep.mubr.msk.bf16.mxu0 %vm4809_vm3, %v4808_v28 }
0x1e93   :  { %v2803_v17 = vpop.f32.mrb[52].mxu0 }
0x1e94   :  { %v4460_v18 = vpop.f32.mrb[53].mxu0  ;;  %v2804_v7 = vadd.f32 %v3974_v13, %v2803_v17 }
0x1e95   :  { %v2806_v35 = vpop.f32.mrb[54].mxu0 }
0x1e96   :  { %v2807_v23 = vadd.f32 %v3974_v13, %v2806_v35  ;;  %v4461_v25 = vpop.f32.mrb[55].mxu0 }
0x1e98   :  { %v5725_v26 = vpack.c.bf16 %v2807_v23, %v2804_v7 }
0x1e9a   :  { %v2812_v29 = vmul.bf16 %v5725_v26, %v5305_v14  ;;  %v2811_v8 = vmul.bf16 %v5725_v26, %v5314_v58  ;;  %v2813_v31 = vmul.bf16 %v5725_v26, %v5312_v37  ;;  %v2814_v16 = vmul.bf16 %v5725_v26, %v5322_v41 }
0x1e9b   :  { %v2963_v3 = vmul.bf16 %v5725_v26, %v5401_v15  ;;  %v2964_v4 = vmul.bf16 %v5725_v26, %v5414_v0 }
0x1e9c   :  { %2821 = vrot.lane.b32.xlu1 %v2812_v29, %s4811_s20  ;;  %2819 = vrot.lane.b32.xlu0 %v2811_v8, %s4811_s20 }
0x1ea0   :  { %2823 = vrot.lane.b32.xlu1 %v2813_v31, %s4811_s20  ;;  %v2965_v31 = vmul.bf16 %v5725_v26, %v5408_v21 }
0x1ea4   :  { %2825 = vrot.lane.b32.xlu1 %v2814_v16, %s4811_s20  ;;  %v2962_v16 = vmul.bf16 %v5725_v26, %v5411_v62 }
0x1f0e   :  { %v2820_v24 = vpop.permute.xlu0 %2819  ;;  %v2822_v44 = vpop.permute.xlu1 %2821 }
0x1f0f   :  { %v2831_v27 = vsel %vm69_vm0, %v2820_v24, 0  ;;  %v2834_v6 = vsel %vm69_vm0, %v2822_v44, 0 }
0x1f10   :  { %4463 = vmatpush3.bf16.xpose.msra.mxu1 %v2831_v27 }
0x1f11   :  { %4464 = vmatprep.subr.bf16.mxu1 %v4808_v28 }
0x1f12   :  { %v2824_v32 = vpop.permute.xlu1 %2823 }
0x1f13   :  { %v2837_v48 = vsel %vm69_vm0, %v2824_v32, 0 }
0x1f16   :  { %v2826_v61 = vpop.permute.xlu1 %2825 }
0x1f17   :  { %v2840_v36 = vsel %vm69_vm0, %v2826_v61, 0 }
0x1f18   :  { %4465 = vmatpush3.bf16.xpose.msra.mxu1 %v2834_v6 }
0x1f19   :  { %4466 = vmatprep.subr.bf16.mxu1 %v4808_v28 }
0x1f20   :  { %4467 = vmatpush3.bf16.xpose.msra.mxu1 %v2837_v48 }
0x1f21   :  { %4468 = vmatprep.subr.bf16.mxu1 %v4808_v28 }
0x1f28   :  { %4469 = vmatpush3.bf16.xpose.msra.mxu1 %v2840_v36 }
0x1f29   :  { %4502 = vmatprep.subr.bf16.mxu1 %v4808_v28 }
0x1f2f   :  { %4471 = vmatmul.mubr.msk.bf16.vlgmr.msra.gmra.mrb[56].mxu1 %vm69_vm0, %v5725_v26 }
0x1f30   :  { %4503 = vmatpush3.bf16.msra.mxu1 %v4634_v39  ;;  %4506 = vmatprep.mubr.msk.bf16.mxu1 %vm4809_vm3, %v4808_v28 }
0x1f31   :  { %4504 = vmatprep.subr.bf16.mxu1 %v4808_v28 }
0x1f34   :  { %4505 = vmatpush3.bf16.msra.mxu1 %v4635_v46 }
0x1f35   :  { %4522 = vmatprep.subr.bf16.mxu1 %v4808_v28 }
0x1f37   :  { %4507 = vmatmul.mubr.msk.bf16.vlgmr.msra.gmra.mrb[60].mxu1 %vm69_vm0, %v3204_v10  ;;  %v3990_v10 = vld [vmem:[%s6066_s5 + $0x110] ss:$0 sm:$0xff] }
0x1f38   :  { %4530 = vmatprep.mubr.msk.bf16.mxu1 %vm4809_vm3, %v4808_v28 }
0x2002   :  { %v2876_v40 = vpop.f32.mrb[56].mxu1 }
0x2003   :  { %v2877_v19 = vadd.f32 %v4802_v43, %v2876_v40  ;;  %v4472_v45 = vpop.f32.mrb[57].mxu1 }
0x2004   :  { %v2879_v49 = vpop.f32.mrb[58].mxu1 }
0x2005   :  { %v2880_v50 = vadd.f32 %v4803_v47, %v2879_v49  ;;  %v4473_v55 = vpop.f32.mrb[59].mxu1  ;;  %v2883_v52 = vsel %vm517_vm1, %v2877_v19, -inf }
0x2006   :  { %2884 = vmax.xlane.f32.xlu0 %v2883_v52 }
0x2007   :  { %v2886_v12 = vsel %vm517_vm1, %v2880_v50, -inf }
0x2008   :  { %2887 = vmax.xlane.f32.xlu1 %v2886_v12 }
0x200a   :  { %v3259_v9 = vpop.f32.mrb[60].mxu1 }
0x200b   :  { %v4508_v33 = vpop.f32.mrb[61].mxu1  ;;  %v3260_v56 = vadd.f32 %v3990_v10, %v3259_v9 }
0x200c   :  { %v3262_v51 = vpop.f32.mrb[62].mxu1 }
0x200d   :  { %v3263_v22 = vadd.f32 %v3990_v10, %v3262_v51  ;;  %v4509_v34 = vpop.f32.mrb[63].mxu1 }
0x200f   :  { %v5776_v53 = vpack.c.bf16 %v3263_v22, %v3260_v56 }
0x2093   :  { %v2885_v57 = vpop.xlane.xlu0 %2884 }
0x2094   :  { %v2889_v54 = vsub.f32 %v2877_v19, %v2885_v57 }
0x2095   :  { %v2888_v59 = vpop.xlane.xlu1 %2887 }
0x2096   :  { %v2891_v38 = vmul.f32 1.442695, %v2889_v54  ;;  %v2890_v60 = vsub.f32 %v2880_v50, %v2888_v59 }
0x2098   :  { %4750 = vpow2.f32 %v2891_v38  ;;  %v2893_v63 = vmul.f32 1.442695, %v2890_v60 }
0x209a   :  { %4752 = vpow2.f32 %v2893_v63  ;;  %v4636_v63 = vld [vmem:[%s6065_s4 + $0x110] sm:$0xff]  }
0x20a2   :  { %v5778_v42 = vpop.eup %4750 }
0x20a3   :  { %2907 = vrot.lane.b32.xlu0 %v5778_v42, %s4813_s10  ;;  %v2895_v20 = vsel %vm1720_vm4, %v5778_v42, 0.0 }
0x20a4   :  { %v5782_v1 = vpop.eup %4752 }
0x20a5   :  { %2909 = vrot.lane.b32.xlu1 %v5782_v1, %s4813_s10  ;;  %v2898_v2 = vsel %vm1720_vm4, %v5782_v1, 0.0 }
0x20a7   :  { %2923 = vrot.lane.b32.xlu0 %v5778_v42, %s4811_s20 }
0x20a9   :  { %2925 = vrot.lane.b32.xlu1 %v5782_v1, %s4811_s20 }
0x20ab   :  { %2939 = vrot.lane.b32.xlu0 %v5778_v42, %s4814_s11 }
0x20ad   :  { %2941 = vrot.lane.b32.xlu1 %v5782_v1, %s4814_s11 }
0x20ca   :  { %2896 = vadd.xlane.f32.xlu0 %v2895_v20 }
0x20d1   :  { %2899 = vadd.xlane.f32.xlu1 %v2898_v2 }
0x20e2   :  { %2972 = vrot.lane.b32.xlu1 %v2963_v3, %s4812_s9 }
0x20e6   :  { %2974 = vrot.lane.b32.xlu1 %v2964_v4, %s4812_s9 }
0x2115   :  { %v2908_v30 = vpop.permute.xlu0 %2907 }
0x2116   :  { %v2913_v13 = vsel %vm1720_vm4, %v2908_v30, 0.0  ;;  %v3980_v30 = vld [vmem:[%s6066_s5 + $0x100] ss:$0 sm:$0xff] }
0x2117   :  { %2914 = vadd.xlane.f32.xlu0 %v2913_v13  ;;  %v2910_v17 = vpop.permute.xlu1 %2909 }
0x2118   :  { %v2916_v8 = vsel %vm1720_vm4, %v2910_v17, 0.0 }
0x2119   :  { %v2924_v18 = vpop.permute.xlu0 %2923 }
0x211a   :  { %v2929_v35 = vsel %vm1720_vm4, %v2924_v18, 0.0 }
0x211b   :  { %2930 = vadd.xlane.f32.xlu0 %v2929_v35  ;;  %v2926_v7 = vpop.permute.xlu1 %2925 }
0x211c   :  { %v2932_v23 = vsel %vm1720_vm4, %v2926_v7, 0.0 }
0x211d   :  { %v2940_v15 = vpop.permute.xlu0 %2939  ;;  %2933 = vadd.xlane.f32.xlu1 %v2932_v23 }
0x211e   :  { %v2945_v25 = vsel %vm1720_vm4, %v2940_v15, 0.0 }
0x211f   :  { %2946 = vadd.xlane.f32.xlu0 %v2945_v25  ;;  %v2942_v0 = vpop.permute.xlu1 %2941 }
0x2120   :  { %v2948_v29 = vsel %vm1720_vm4, %v2942_v0, 0.0 }
0x2121   :  { %2949 = vadd.xlane.f32.xlu1 %v2948_v29 }
0x2123   :  { %2917 = vadd.xlane.f32.xlu0 %v2916_v8 }
0x2132   :  { %2976 = vrot.lane.b32.xlu1 %v2965_v31, %s4812_s9 }
0x2139   :  { %2970 = vrot.lane.b32.xlu0 %v2962_v16, %s4812_s9 }
0x2157   :  { %v2897_v27 = vpop.xlane.xlu0 %2896 }
0x2158   :  { %4754 = vrcp.f32 %v2897_v27 }
0x215e   :  { %v2900_v24 = vpop.xlane.xlu1 %2899 }
0x215f   :  { %4756 = vrcp.f32 %v2900_v24 }
0x2162   :  { %v2973_v44 = vpop.permute.xlu1 %2972  ;;  %v4755_v62 = vpop.eup %4754 }
0x2163   :  { %v2902_v52 = vmul.f32 %v4755_v62, %v5778_v42 }
0x2166   :  { %v2975_v32 = vpop.permute.xlu1 %2974 }
0x2169   :  { %v4757_v46 = vpop.eup %4756 }
0x216a   :  { %v2904_v12 = vmul.f32 %v4757_v46, %v5782_v1 }
0x21a4   :  { %v2915_v6 = vpop.xlane.xlu0 %2914 }
0x21a5   :  { %4758 = vrcp.f32 %v2915_v6 }
0x21a8   :  { %v2931_v48 = vpop.xlane.xlu0 %2930 }
0x21a9   :  { %4760 = vrcp.f32 %v2931_v48 }
0x21aa   :  { %v2934_v61 = vpop.xlane.xlu1 %2933 }
0x21ab   :  { %4762 = vrcp.f32 %v2934_v61  ;;  %v4639_v61 = vld [vmem:[%s6065_s4 + $0x128] sm:$0xff]  }
0x21ac   :  { %v2947_v36 = vpop.xlane.xlu0 %2946 }
0x21ad   :  { %4764 = vrcp.f32 %v2947_v36 }
0x21ae   :  { %v2950_v21 = vpop.xlane.xlu1 %2949 }
0x21af   :  { %4766 = vrcp.f32 %v2950_v21  ;;  %v4759_v40 = vpop.eup %4758 }
0x21b0   :  { %v2918_v39 = vpop.xlane.xlu0 %2917  ;;  %v2920_v47 = vmul.f32 %v4759_v40, %v5778_v42 }
0x21b1   :  { %4768 = vrcp.f32 %v2918_v39 }
0x21b2   :  { %v2955_v51 = vsel %vm1720_vm4, %v2902_v52, %v2920_v47  ;;  %v2977_v54 = vpop.permute.xlu1 %2976 }
0x21b3   :  { %v4761_v43 = vpop.eup %4760 }
0x21b4   :  { %v2971_v26 = vpop.permute.xlu0 %2970  ;;  %v2936_v55 = vmul.f32 %v4761_v43, %v5778_v42 }
0x21b5   :  { %4475 = vmatpush3.bf16.msra.mxu0 %v2971_v26  ;;  %v4763_v19 = vpop.eup %4762 }
0x21b6   :  { %4476 = vmatprep.subr.bf16.mxu0 %v4808_v28  ;;  %v2938_v33 = vmul.f32 %v4763_v19, %v5782_v1  ;;  %v2957_v34 = vsel %vm69_vm0, %v2955_v51, %v2936_v55  ;;  %v3984_v19 = vld [vmem:[%s6066_s5 + $0x120] ss:$0 sm:$0xff] }
0x21b7   :  { %v4765_v45 = vpop.eup %4764 }
0x21b8   :  { %v2952_v10 = vmul.f32 %v4765_v45, %v5778_v42  ;;  %v4637_v42 = vld [vmem:[%s6065_s4 + $0x118] sm:$0xff]  }
0x21b9   :  { %4477 = vmatpush3.bf16.msra.mxu0 %v2973_v44  ;;  %v4767_v49 = vpop.eup %4766 }
0x21ba   :  { %4478 = vmatprep.subr.bf16.mxu0 %v4808_v28  ;;  %v2954_v56 = vmul.f32 %v4767_v49, %v5782_v1  ;;  %v2959_v59 = vsel %vm1785_vm5, %v2957_v34, %v2952_v10  ;;  %v4804_v10 = vld [vmem:[%s6064_s6 + $0x58] sm:$0xff]  }
0x21bb   :  { %v4769_v50 = vpop.eup %4768 }
0x21bc   :  { %v2922_v9 = vmul.f32 %v4769_v50, %v5782_v1  ;;  %v3985_v50 = vld [vmem:[%s6066_s5 + $0x128] ss:$0 sm:$0xff] }
0x21bd   :  { %4479 = vmatpush3.bf16.msra.mxu0 %v2975_v32 }
0x21be   :  { %v2956_v22 = vsel %vm1720_vm4, %v2904_v12, %v2922_v9  ;;  %4480 = vmatprep.subr.bf16.mxu0 %v4808_v28  ;;  %v3273_v9 = vmul.bf16 %v4804_v10, %v5776_v53 }
0x21bf   :  { %v2958_v57 = vsel %vm69_vm0, %v2956_v22, %v2938_v33 }
0x21c0   :  { %v2960_v38 = vsel %vm1785_vm5, %v2958_v57, %v2954_v56  ;;  %v3282_v51 = vsel %vm69_vm0, %v3273_v9, 0  ;;  %v4805_v56 = vld [vmem:[%s6064_s6 + $0x60] sm:$0xff]   ;;  %v4806_v57 = vld [vmem:[%s6064_s6 + $0x68] sm:$0xff]  }
0x21c1   :  { %4481 = vmatpush3.bf16.msra.mxu0 %v2977_v54  ;;  %v2961_v60 = vpack.c.bf16 %v2960_v38, %v2959_v59  ;;  %v3274_v22 = vmul.bf16 %v4805_v56, %v5776_v53  ;;  %v3275_v54 = vmul.bf16 %v4806_v57, %v5776_v53  ;;  %v4807_v38 = vld [vmem:[%s6064_s6 + $0x70] sm:$0xff]  }
0x21c2   :  { %4486 = vmatprep.subr.bf16.mxu0 %v4808_v28 }
0x21c3   :  { %v3285_v34 = vsel %vm69_vm0, %v3274_v22, 0  ;;  %v3288_v59 = vsel %vm69_vm0, %v3275_v54, 0 }
0x21c4   :  { %4483 = vmatmul.mubr.msk.bf16.vlgmr.msra.gmra.mrb[56].mxu0 %vm517_vm1, %v2961_v60  ;;  %v3276_v60 = vmul.bf16 %v4807_v38, %v5776_v53 }
0x21c5   :  { %4487 = vmatpush3.bf16.msra.mxu0 %v4636_v63  ;;  %4490 = vmatprep.mubr.msk.bf16.mxu0 %vm4809_vm3, %v4808_v28 }
0x21c6   :  { %4488 = vmatprep.subr.bf16.mxu0 %v4808_v28  ;;  %v3291_v63 = vsel %vm69_vm0, %v3276_v60, 0 }
0x21c9   :  { %4489 = vmatpush3.bf16.msra.mxu0 %v4637_v42  ;;  %v3986_v42 = vld [vmem:[%s6066_s5 + $0x108] ss:$0 sm:$0xff] }
0x21ca   :  { %4494 = vmatprep.subr.bf16.mxu0 %v4808_v28 }
0x2297   :  { %v3019_v1 = vpop.f32.mrb[56].mxu0 }
0x2298   :  { %v4484_v20 = vpop.f32.mrb[57].mxu0 }
0x2299   :  { %v3022_v2 = vpop.f32.mrb[58].mxu0 }
0x229a   :  { %v3030_v3 = vpack.c.bf16 %v3022_v2, %v3019_v1  ;;  %v4485_v4 = vpop.f32.mrb[59].mxu0 }
0x229c   :  { %4491 = vmatmul.mubr.msk.bf16.vlgmr.msra.gmra.mrb[60].mxu0 %vm69_vm0, %v3030_v3 }
0x229d   :  { %4498 = vmatprep.mubr.msk.bf16.mxu0 %vm4809_vm3, %v4808_v28 }
0x236f   :  { %v3085_v13 = vpop.f32.mrb[60].mxu0 }
0x2370   :  { %v3086_v17 = vadd.f32 %v3980_v30, %v3085_v13  ;;  %v4492_v18 = vpop.f32.mrb[61].mxu0 }
0x2371   :  { %v3088_v35 = vpop.f32.mrb[62].mxu0 }
0x2372   :  { %v3092_v7 = vadd.f32 %v3086_v17, %v5713_v5  ;;  %v3089_v23 = vadd.f32 %v3980_v30, %v3088_v35  ;;  %v4493_v15 = vpop.f32.mrb[63].mxu0  ;;  %v3266_v17 = vld [vmem:[%s6069_s3 + $0x10] sm:$0xff]  ;;  %v3267_v35 = vld [vmem:[%s6069_s3 + $0x18] sm:$0xff] }
0x2374   :  { %v3093_v25 = vadd.f32 %v3089_v23, %v5715_v11  ;;  %v3096_v0 = vsel %vm69_vm0, %v3092_v7, 0.0  ;;  %v4638_v11 = vld [vmem:[%s6065_s4 + $0x120] sm:$0xff]  }
0x2375   :  { %3097 = vadd.xlane.f32.xlu0 %v3096_v0  ;;  %4495 = vmatpush3.bf16.msra.mxu0 %v4638_v11 }
0x2376   :  { %v3099_v29 = vsel %vm69_vm0, %v3093_v25, 0.0  ;;  %4496 = vmatprep.subr.bf16.mxu0 %v4808_v28 }
0x2377   :  { %3100 = vadd.xlane.f32.xlu1 %v3099_v29 }
0x2379   :  { %4497 = vmatpush3.bf16.msra.mxu0 %v4639_v61  ;;  %v3414_v61 = vmul.bf16 %v5776_v53, %v5305_v14 }
0x237a   :  { %4510 = vmatprep.subr.bf16.mxu0 %v4808_v28 }
0x2402   :  { %v3098_v8 = vpop.xlane.xlu0 %3097 }
0x2403   :  { %v3102_v31 = vmul.f32 0.03125, %v3098_v8 }
0x2404   :  { %v3101_v16 = vpop.xlane.xlu1 %3100 }
0x2405   :  { %v3104_v24 = vsub.f32 %v3092_v7, %v3102_v31  ;;  %v3103_v27 = vmul.f32 0.03125, %v3101_v16 }
0x2407   :  { %v3105_v44 = vsub.f32 %v3093_v25, %v3103_v27  ;;  %v3106_v6 = vmul.f32 %v3104_v24, %v3104_v24 }
0x2409   :  { %v3108_v32 = vsel %vm69_vm0, %v3106_v6, 0.0  ;;  %v3107_v5 = vmul.f32 %v3105_v44, %v3105_v44 }
0x240a   :  { %3109 = vadd.xlane.f32.xlu0 %v3108_v32 }
0x240b   :  { %v3111_v48 = vsel %vm69_vm0, %v3107_v5, 0.0 }
0x240e   :  { %3112 = vadd.xlane.f32.xlu0 %v3111_v48 }
0x2497   :  { %v3110_v36 = vpop.xlane.xlu0 %3109 }
0x2498   :  { %v3114_v21 = vmul.f32 0.03125, %v3110_v36  ;;  %v3415_v36 = vmul.bf16 %v5776_v53, %v5312_v37 }
0x249a   :  { %v3116_v39 = vadd.f32 1e-05, %v3114_v21 }
0x249b   :  { %v3113_v62 = vpop.xlane.xlu0 %3112 }
0x249c   :  { %4770 = vrsqrt.f32 %v3116_v39  ;;  %v3115_v26 = vmul.f32 0.03125, %v3113_v62 }
0x249e   :  { %v3117_v46 = vadd.f32 1e-05, %v3115_v26 }
0x24a0   :  { %4772 = vrsqrt.f32 %v3117_v46 }
0x24a6   :  { %v4771_v40 = vpop.eup %4770 }
0x24a7   :  { %v3120_v43 = vmul.f32 %v4771_v40, %v3104_v24 }
0x24a9   :  { %v3126_v49 = vmul.f32 %v3984_v19, %v3120_v43 }
0x24aa   :  { %v4773_v45 = vpop.eup %4772 }
0x24ab   :  { %v3121_v47 = vmul.f32 %v4773_v45, %v3105_v44  ;;  %v5871_v52 = vadd.f32 %v3985_v50, %v3126_v49 }
0x24ad   :  { %v3127_v55 = vmul.f32 %v3984_v19, %v3121_v47  ;;  %v3416_v47 = vmul.bf16 %v5776_v53, %v5322_v41 }
0x24af   :  { %v5873_v12 = vadd.f32 %v3985_v50, %v3127_v55  ;;  %v3413_v50 = vmul.bf16 %v5776_v53, %v5314_v58 }
0x24b1   :  { %v3138_v33 = vpack.c.bf16 %v5873_v12, %v5871_v52 }
0x24b3   :  { %4499 = vmatmul.mubr.msk.bf16.vlgmr.msra.gmra.mrb[64].mxu0 %vm69_vm0, %v3138_v33 }
0x24b4   :  { %4511 = vmatpush3.bf16.xpose.msra.mxu0 %v3282_v51  ;;  %4518 = vmatprep.mubr.msk.bf16.mxu0 %vm4809_vm3, %v4808_v28 }
0x24b5   :  { %4512 = vmatprep.subr.bf16.mxu0 %v4808_v28 }
0x24bc   :  { %4513 = vmatpush3.bf16.xpose.msra.mxu0 %v3285_v34 }
0x24bd   :  { %4514 = vmatprep.subr.bf16.mxu0 %v4808_v28 }
0x24c4   :  { %4515 = vmatpush3.bf16.xpose.msra.mxu0 %v3288_v59 }
0x24c5   :  { %4516 = vmatprep.subr.bf16.mxu0 %v4808_v28 }
0x24cc   :  { %4517 = vmatpush3.bf16.xpose.msra.mxu0 %v3291_v63 }
0x24cd   :  { %4550 = vmatprep.subr.bf16.mxu0 %v4808_v28 }
0x2586   :  { %v3193_v1 = vpop.f32.mrb[64].mxu0 }
0x2587   :  { %v4500_v20 = vpop.f32.mrb[65].mxu0  ;;  %v3194_v3 = vadd.f32 %v3986_v42, %v3193_v1 }
0x2588   :  { %v3196_v2 = vpop.f32.mrb[66].mxu0 }
0x2589   :  { %v3197_v4 = vadd.f32 %v3986_v42, %v3196_v2  ;;  %v4501_v30 = vpop.f32.mrb[67].mxu0 }
0x258b   :  { %v3277_v13 = vpack.c.bf16 %v3197_v4, %v3194_v3 }
0x258d   :  { %4519 = vmatmul.mubr.msk.bf16.vlgmr.msra.gmra.mrb[68].mxu0 %vm69_vm0, %v3277_v13 }
0x258e   :  { %4558 = vmatprep.mubr.msk.bf16.mxu0 %vm4809_vm3, %v4808_v28 }
0x2660   :  { %v3327_v18 = vpop.f32.mrb[68].mxu0 }
0x2661   :  { %v3328_v7 = vadd.f32 %v3327_v18, %v3266_v17  ;;  %v4520_v23 = vpop.f32.mrb[69].mxu0 }
0x2662   :  { %v3330_v15 = vpop.f32.mrb[70].mxu0 }
0x2663   :  { %v3331_v25 = vadd.f32 %v3330_v15, %v3267_v35  ;;  %v4521_v0 = vpop.f32.mrb[71].mxu0  ;;  %v3334_v29 = vsel %vm517_vm1, %v3328_v7, -inf }
0x2664   :  { %3335 = vmax.xlane.f32.xlu0 %v3334_v29 }
0x2665   :  { %v3337_v8 = vsel %vm517_vm1, %v3331_v25, -inf }
0x2666   :  { %3338 = vmax.xlane.f32.xlu1 %v3337_v8 }
0x26f1   :  { %v3336_v31 = vpop.xlane.xlu0 %3335 }
0x26f2   :  { %v3340_v16 = vsub.f32 %v3328_v7, %v3336_v31  ;;  %v4640_v31 = vld [vmem:[%s6065_s4 + $0x140] sm:$0xff]  }
0x26f3   :  { %v3339_v24 = vpop.xlane.xlu1 %3338 }
0x26f4   :  { %v3342_v27 = vmul.f32 1.442695, %v3340_v16  ;;  %v3341_v44 = vsub.f32 %v3331_v25, %v3339_v24  ;;  %v4641_v16 = vld [vmem:[%s6065_s4 + $0x148] sm:$0xff]  }
0x26f6   :  { %4774 = vpow2.f32 %v3342_v27  ;;  %v3344_v6 = vmul.f32 1.442695, %v3341_v44 }
0x26f8   :  { %4776 = vpow2.f32 %v3344_v6 }
0x2700   :  { %v5918_v32 = vpop.eup %4774 }
0x2701   :  { %3358 = vrot.lane.b32.xlu0 %v5918_v32, %s4813_s10  ;;  %3374 = vrot.lane.b32.xlu1 %v5918_v32, %s4811_s20  ;;  %v3346_v48 = vsel %vm1720_vm4, %v5918_v32, 0.0 }
0x2702   :  { %v5924_v5 = vpop.eup %4776 }
0x2703   :  { %v3349_v11 = vsel %vm1720_vm4, %v5924_v5, 0.0 }
0x2705   :  { %3390 = vrot.lane.b32.xlu0 %v5918_v32, %s4814_s11  ;;  %3360 = vrot.lane.b32.xlu1 %v5924_v5, %s4813_s10 }
0x2709   :  { %3376 = vrot.lane.b32.xlu1 %v5924_v5, %s4811_s20 }
0x270d   :  { %3392 = vrot.lane.b32.xlu1 %v5924_v5, %s4814_s11 }
0x2724   :  { %3347 = vadd.xlane.f32.xlu0 %v3346_v48 }
0x2731   :  { %3350 = vadd.xlane.f32.xlu1 %v3349_v11 }
0x2742   :  { %3423 = vrot.lane.b32.xlu1 %v3414_v61, %s4811_s20 }
0x2746   :  { %3425 = vrot.lane.b32.xlu1 %v3415_v36, %s4811_s20 }
0x2773   :  { %v3359_v21 = vpop.permute.xlu0 %3358  ;;  %v3375_v39 = vpop.permute.xlu1 %3374 }
0x2774   :  { %v3364_v62 = vsel %vm1720_vm4, %v3359_v21, 0.0  ;;  %v3380_v46 = vsel %vm1720_vm4, %v3375_v39, 0.0 }
0x2775   :  { %3365 = vadd.xlane.f32.xlu0 %v3364_v62 }
0x2777   :  { %v3361_v26 = vpop.permute.xlu1 %3360  ;;  %v3391_v40 = vpop.permute.xlu0 %3390 }
0x2778   :  { %v3396_v14 = vsel %vm1720_vm4, %v3391_v40, 0.0  ;;  %v3367_v45 = vsel %vm1720_vm4, %v3361_v26, 0.0 }
0x2779   :  { %3381 = vadd.xlane.f32.xlu0 %v3380_v46 }
0x277b   :  { %v3377_v43 = vpop.permute.xlu1 %3376 }
0x277c   :  { %v3383_v19 = vsel %vm1720_vm4, %v3377_v43, 0.0 }
0x277d   :  { %3397 = vadd.xlane.f32.xlu0 %v3396_v14  ;;  %3384 = vadd.xlane.f32.xlu1 %v3383_v19 }
0x277f   :  { %v3393_v37 = vpop.permute.xlu1 %3392 }
0x2780   :  { %v3399_v49 = vsel %vm1720_vm4, %v3393_v37, 0.0 }
0x2781   :  { %3368 = vadd.xlane.f32.xlu0 %v3367_v45  ;;  %3400 = vadd.xlane.f32.xlu1 %v3399_v49 }
0x2792   :  { %3427 = vrot.lane.b32.xlu1 %v3416_v47, %s4811_s20 }
0x2797   :  { %3421 = vrot.lane.b32.xlu0 %v3413_v50, %s4811_s20 }
0x27b1   :  { %v3348_v10 = vpop.xlane.xlu0 %3347 }
0x27b2   :  { %4778 = vrcp.f32 %v3348_v10  ;;  %v4643_v10 = vld [vmem:[%s6065_s4 + $0x158] sm:$0xff]  }
0x27bc   :  { %v4779_v53 = vpop.eup %4778 }
0x27bd   :  { %v3353_v3 = vmul.f32 %v4779_v53, %v5918_v32 }
0x27be   :  { %v3351_v55 = vpop.xlane.xlu1 %3350 }
0x27bf   :  { %4780 = vrcp.f32 %v3351_v55 }
0x27c2   :  { %v3424_v9 = vpop.permute.xlu1 %3423 }
0x27c6   :  { %v3426_v51 = vpop.permute.xlu1 %3425 }
0x27c9   :  { %v4781_v54 = vpop.eup %4780 }
0x27ca   :  { %v3355_v4 = vmul.f32 %v4781_v54, %v5924_v5  ;;  %v4000_v54 = vld [vmem:[%s6066_s5 + $0x130] ss:$0 sm:$0xff] }
0x2802   :  { %v3366_v33 = vpop.xlane.xlu0 %3365 }
0x2803   :  { %4782 = vrcp.f32 %v3366_v33  ;;  %v4645_v33 = vld [vmem:[%s6065_s4 + $0x168] sm:$0xff]  }
0x2806   :  { %v3382_v56 = vpop.xlane.xlu0 %3381 }
0x2807   :  { %4784 = vrcp.f32 %v3382_v56 }
0x280a   :  { %v3398_v22 = vpop.xlane.xlu0 %3397  ;;  %v3385_v34 = vpop.xlane.xlu1 %3384 }
0x280b   :  { %4786 = vrcp.f32 %v3398_v22 }
0x280c   :  { %4788 = vrcp.f32 %v3385_v34 }
0x280d   :  { %v4783_v59 = vpop.eup %4782 }
0x280e   :  { %v3369_v41 = vpop.xlane.xlu0 %3368  ;;  %v3401_v57 = vpop.xlane.xlu1 %3400  ;;  %v3371_v42 = vmul.f32 %v4783_v59, %v5918_v32 }
0x280f   :  { %4790 = vrcp.f32 %v3369_v41 }
0x2810   :  { %4792 = vrcp.f32 %v3401_v57  ;;  %v3406_v18 = vsel %vm1720_vm4, %v3353_v3, %v3371_v42  ;;  %v4646_v3 = vld [vmem:[%s6065_s4 + $0x170] sm:$0xff]  }
0x2811   :  { %v4785_v38 = vpop.eup %4784 }
0x2812   :  { %v3422_v58 = vpop.permute.xlu0 %3421  ;;  %v3387_v20 = vmul.f32 %v4785_v38, %v5918_v32  ;;  %v3428_v25 = vpop.permute.xlu1 %3427 }
0x2813   :  { %4523 = vmatpush3.bf16.msra.mxu1 %v3422_v58 }
0x2814   :  { %4524 = vmatprep.subr.bf16.mxu1 %v4808_v28  ;;  %v3408_v23 = vsel %vm69_vm0, %v3406_v18, %v3387_v20 }
0x2815   :  { %v4787_v60 = vpop.eup %4786 }
0x2816   :  { %v4789_v63 = vpop.eup %4788  ;;  %v3403_v30 = vmul.f32 %v4787_v60, %v5918_v32 }
0x2817   :  { %4525 = vmatpush3.bf16.msra.mxu1 %v3424_v9  ;;  %v3389_v17 = vmul.f32 %v4789_v63, %v5924_v5  ;;  %v4644_v9 = vld [vmem:[%s6065_s4 + $0x160] sm:$0xff]   ;;  %v4001_v63 = vld [vmem:[%s6066_s5 + $0x138] ss:$0 sm:$0xff] }
0x2818   :  { %4526 = vmatprep.subr.bf16.mxu1 %v4808_v28  ;;  %v3410_v0 = vsel %vm1785_vm5, %v3408_v23, %v3403_v30  ;;  %4551 = vmatpush3.bf16.msra.mxu0 %v4644_v9  ;;  %v4002_v30 = vld [vmem:[%s6066_s5 + $0x150] ss:$0 sm:$0xff] }
0x2819   :  { %v4791_v1 = vpop.eup %4790  ;;  %4552 = vmatprep.subr.bf16.mxu0 %v4808_v28 }
0x281a   :  { %v4793_v2 = vpop.eup %4792  ;;  %v3373_v13 = vmul.f32 %v4791_v1, %v5924_v5 }
0x281b   :  { %4527 = vmatpush3.bf16.msra.mxu1 %v3426_v51  ;;  %v3405_v7 = vmul.f32 %v4793_v2, %v5924_v5  ;;  %v3996_v5 = vld [vmem:[%s6066_s5 + $0x118] ss:$0 sm:$0xff] }
0x281c   :  { %v3407_v35 = vsel %vm1720_vm4, %v3355_v4, %v3373_v13  ;;  %4528 = vmatprep.subr.bf16.mxu1 %v4808_v28  ;;  %4553 = vmatpush3.bf16.msra.mxu0 %v4645_v33  ;;  %v4647_v4 = vld [vmem:[%s6065_s4 + $0x178] sm:$0xff]  }
0x281d   :  { %v3409_v15 = vsel %vm69_vm0, %v3407_v35, %v3389_v17  ;;  %4554 = vmatprep.subr.bf16.mxu0 %v4808_v28 }
0x281e   :  { %v3411_v29 = vsel %vm1785_vm5, %v3409_v15, %v3405_v7 }
0x281f   :  { %4529 = vmatpush3.bf16.msra.mxu1 %v3428_v25  ;;  %v3412_v8 = vpack.c.bf16 %v3411_v29, %v3410_v0  ;;  %v4006_v29 = vld [vmem:[%s6066_s5 + $0x158] ss:$0 sm:$0xff] }
0x2820   :  { %4534 = vmatprep.subr.bf16.mxu1 %v4808_v28  ;;  %4555 = vmatpush3.bf16.msra.mxu0 %v4646_v3 }
0x2821   :  { %4556 = vmatprep.subr.bf16.mxu0 %v4808_v28 }
0x2822   :  { %4531 = vmatmul.mubr.msk.bf16.vlgmr.msra.gmra.mrb[64].mxu1 %vm517_vm1, %v3412_v8 }
0x2823   :  { %4535 = vmatpush3.bf16.msra.mxu1 %v4640_v31  ;;  %4538 = vmatprep.mubr.msk.bf16.mxu1 %vm4809_vm3, %v4808_v28 }
0x2824   :  { %4536 = vmatprep.subr.bf16.mxu1 %v4808_v28  ;;  %4557 = vmatpush3.bf16.msra.mxu0 %v4647_v4 }
0x2827   :  { %4537 = vmatpush3.bf16.msra.mxu1 %v4641_v16 }
0x2828   :  { %4542 = vmatprep.subr.bf16.mxu1 %v4808_v28 }
0x28f5   :  { %v3470_v24 = vpop.f32.mrb[64].mxu1 }
0x28f6   :  { %v4532_v27 = vpop.f32.mrb[65].mxu1 }
0x28f7   :  { %v3473_v44 = vpop.f32.mrb[66].mxu1 }
0x28f8   :  { %v3481_v6 = vpack.c.bf16 %v3473_v44, %v3470_v24  ;;  %v4533_v32 = vpop.f32.mrb[67].mxu1 }
0x28fa   :  { %4539 = vmatmul.mubr.msk.bf16.vlgmr.msra.gmra.mrb[68].mxu1 %vm69_vm0, %v3481_v6 }
0x28fb   :  { %4546 = vmatprep.mubr.msk.bf16.mxu1 %vm4809_vm3, %v4808_v28 }
0x29cd   :  { %v3536_v48 = vpop.f32.mrb[68].mxu1 }
0x29ce   :  { %v3537_v11 = vadd.f32 %v3996_v5, %v3536_v48  ;;  %v4540_v61 = vpop.f32.mrb[69].mxu1 }
0x29cf   :  { %v3539_v36 = vpop.f32.mrb[70].mxu1 }
0x29d0   :  { %v3543_v21 = vadd.f32 %v3537_v11, %v5871_v52  ;;  %v3540_v39 = vadd.f32 %v3996_v5, %v3539_v36  ;;  %v4541_v62 = vpop.f32.mrb[71].mxu1 }
0x29d2   :  { %v3544_v26 = vadd.f32 %v3540_v39, %v5873_v12  ;;  %v3547_v46 = vsel %vm69_vm0, %v3543_v21, 0.0  ;;  %v4642_v12 = vld [vmem:[%s6065_s4 + $0x150] sm:$0xff]  }
0x29d3   :  { %3548 = vadd.xlane.f32.xlu0 %v3547_v46  ;;  %4543 = vmatpush3.bf16.msra.mxu1 %v4642_v12  ;;  %v4012_v12 = vld [vmem:[%s6066_s5 + $0x140] ss:$0 sm:$0xff] }
0x29d4   :  { %v3550_v40 = vsel %vm69_vm0, %v3544_v26, 0.0  ;;  %4544 = vmatprep.subr.bf16.mxu1 %v4808_v28 }
0x29d5   :  { %3551 = vadd.xlane.f32.xlu1 %v3550_v40 }
0x29d7   :  { %4545 = vmatpush3.bf16.msra.mxu1 %v4643_v10 }
0x29d8   :  { %4562 = vmatprep.subr.bf16.mxu1 %v4808_v28 }
0x2a60   :  { %v3549_v43 = vpop.xlane.xlu0 %3548 }
0x2a61   :  { %v3553_v14 = vmul.f32 0.03125, %v3549_v43 }
0x2a62   :  { %v3552_v19 = vpop.xlane.xlu1 %3551 }
0x2a63   :  { %v3555_v37 = vsub.f32 %v3543_v21, %v3553_v14  ;;  %v3554_v45 = vmul.f32 0.03125, %v3552_v19  ;;  %v4648_v14 = vld [vmem:[%s6065_s4 + $0x180] sm:$0xff]   ;;  %v4649_v19 = vld [vmem:[%s6065_s4 + $0x188] sm:$0xff]  }
0x2a65   :  { %v3556_v49 = vsub.f32 %v3544_v26, %v3554_v45  ;;  %v3557_v47 = vmul.f32 %v3555_v37, %v3555_v37 }
0x2a67   :  { %v3559_v50 = vsel %vm69_vm0, %v3557_v47, 0.0  ;;  %v3558_v52 = vmul.f32 %v3556_v49, %v3556_v49 }
0x2a68   :  { %3560 = vadd.xlane.f32.xlu0 %v3559_v50 }
0x2a69   :  { %v3562_v55 = vsel %vm69_vm0, %v3558_v52, 0.0 }
0x2a6c   :  { %3563 = vadd.xlane.f32.xlu0 %v3562_v55 }
0x2af5   :  { %v3561_v51 = vpop.xlane.xlu0 %3560 }
0x2af6   :  { %v3565_v56 = vmul.f32 0.03125, %v3561_v51 }
0x2af8   :  { %v3567_v22 = vadd.f32 1e-05, %v3565_v56 }
0x2af9   :  { %v3564_v34 = vpop.xlane.xlu0 %3563 }
0x2afa   :  { %4794 = vrsqrt.f32 %v3567_v22  ;;  %v3566_v41 = vmul.f32 0.03125, %v3564_v34 }
0x2afc   :  { %v3568_v57 = vadd.f32 1e-05, %v3566_v41 }
0x2afe   :  { %4796 = vrsqrt.f32 %v3568_v57  ;;  %v4014_v57 = vld [vmem:[%s6066_s5 + $0x160] ss:$0 sm:$0xff] }
0x2b04   :  { %v4795_v58 = vpop.eup %4794 }
0x2b05   :  { %v3571_v53 = vmul.f32 %v4795_v58, %v3555_v37 }
0x2b07   :  { %v3577_v38 = vmul.f32 %v4000_v54, %v3571_v53 }
0x2b08   :  { %v4797_v59 = vpop.eup %4796 }
0x2b09   :  { %v3572_v60 = vmul.f32 %v4797_v59, %v3556_v49  ;;  %v3583_v1 = vadd.f32 %v4001_v63, %v3577_v38 }
0x2b0b   :  { %v3578_v42 = vmul.f32 %v4000_v54, %v3572_v60 }
0x2b0d   :  { %v3584_v20 = vadd.f32 %v4001_v63, %v3578_v42 }
0x2b0f   :  { %v3589_v2 = vpack.c.bf16 %v3584_v20, %v3583_v1 }
0x2b11   :  { %4547 = vmatmul.mubr.msk.bf16.vlgmr.msra.gmra.mrb[72].mxu1 %vm69_vm0, %v3589_v2 }
0x2b12   :  { %4566 = vmatprep.mubr.msk.bf16.mxu1 %vm4809_vm3, %v4808_v28  ;;  %4563 = vmatpush3.bf16.msra.mxu1 %v4648_v14 }
0x2b13   :  { %4564 = vmatprep.subr.bf16.mxu1 %v4808_v28  ;;  %v4013_v28 = vld [vmem:[%s6066_s5 + $0x148] ss:$0 sm:$0xff] }
0x2b16   :  { %4565 = vmatpush3.bf16.msra.mxu1 %v4649_v19 }
0x2be4   :  { %v3644_v13 = vpop.f32.mrb[72].mxu1 }
0x2be5   :  { %v3645_v17 = vadd.f32 %v4002_v30, %v3644_v13  ;;  %v4548_v18 = vpop.f32.mrb[73].mxu1 }
0x2be6   :  { %v3647_v35 = vpop.f32.mrb[74].mxu1 }
0x2be7   :  { %v3648_v7 = vadd.f32 %v4002_v30, %v3647_v35  ;;  %v4549_v23 = vpop.f32.mrb[75].mxu1  ;;  %v3651_v15 = vmax.f32 %v3645_v17, 0.0 }
0x2be9   :  { %v3652_v25 = vmax.f32 %v3648_v7, 0.0 }
0x2beb   :  { %v3661_v0 = vpack.c.bf16 %v3652_v25, %v3651_v15 }
0x2bed   :  { %4559 = vmatmul.mubr.msk.bf16.vlgmr.msra.gmra.mrb[72].mxu0 %vm517_vm1, %v3661_v0 }
0x2cc0   :  { %v3728_v8 = vpop.f32.mrb[72].mxu0 }
0x2cc1   :  { %v3729_v31 = vadd.f32 %v4006_v29, %v3728_v8  ;;  %v4560_v16 = vpop.f32.mrb[73].mxu0 }
0x2cc2   :  { %v3731_v24 = vpop.f32.mrb[74].mxu0 }
0x2cc3   :  { %v3735_v27 = vadd.f32 %v3729_v31, %v3583_v1  ;;  %v3732_v44 = vadd.f32 %v4006_v29, %v3731_v24  ;;  %v4561_v6 = vpop.f32.mrb[75].mxu0 }
0x2cc5   :  { %v3736_v32 = vadd.f32 %v3732_v44, %v3584_v20  ;;  %v3739_v5 = vsel %vm69_vm0, %v3735_v27, 0.0 }
0x2cc6   :  { %3740 = vadd.xlane.f32.xlu0 %v3739_v5 }
0x2cc7   :  { %v3742_v48 = vsel %vm69_vm0, %v3736_v32, 0.0 }
0x2cc8   :  { %3743 = vadd.xlane.f32.xlu1 %v3742_v48 }
0x2d53   :  { %v3741_v11 = vpop.xlane.xlu0 %3740 }
0x2d54   :  { %v3745_v61 = vmul.f32 0.03125, %v3741_v11 }
0x2d55   :  { %v3744_v36 = vpop.xlane.xlu1 %3743 }
0x2d56   :  { %v3747_v21 = vsub.f32 %v3735_v27, %v3745_v61  ;;  %v3746_v39 = vmul.f32 0.03125, %v3744_v36 }
0x2d58   :  { %v3748_v62 = vsub.f32 %v3736_v32, %v3746_v39  ;;  %v3749_v26 = vmul.f32 %v3747_v21, %v3747_v21 }
0x2d5a   :  { %v3751_v46 = vsel %vm69_vm0, %v3749_v26, 0.0  ;;  %v3750_v40 = vmul.f32 %v3748_v62, %v3748_v62 }
0x2d5b   :  { %3752 = vadd.xlane.f32.xlu0 %v3751_v46 }
0x2d5c   :  { %v3754_v43 = vsel %vm69_vm0, %v3750_v40, 0.0 }
0x2d5d   :  { %3755 = vadd.xlane.f32.xlu1 %v3754_v43 }
0x2de8   :  { %v3753_v37 = vpop.xlane.xlu0 %3752 }
0x2de9   :  { %v3757_v45 = vmul.f32 0.03125, %v3753_v37 }
0x2dea   :  { %v3756_v49 = vpop.xlane.xlu1 %3755 }
0x2deb   :  { %v3759_v47 = vadd.f32 1e-05, %v3757_v45  ;;  %v3758_v50 = vmul.f32 0.03125, %v3756_v49 }
0x2ded   :  { %4798 = vrsqrt.f32 %v3759_v47  ;;  %v3760_v52 = vadd.f32 1e-05, %v3758_v50 }
0x2def   :  { %4800 = vrsqrt.f32 %v3760_v52 }
0x2df7   :  { %v4799_v55 = vpop.eup %4798 }
0x2df8   :  { %v3763_v10 = vmul.f32 %v4799_v55, %v3747_v21 }
0x2df9   :  { %v4801_v9 = vpop.eup %4800 }
0x2dfa   :  { %v3769_v33 = vmul.f32 %v4012_v12, %v3763_v10  ;;  %v3764_v51 = vmul.f32 %v4801_v9, %v3748_v62 }
0x2dfc   :  { %v3770_v56 = vmul.f32 %v4012_v12, %v3764_v51  ;;  %v3775_v22 = vadd.f32 %v4013_v28, %v3769_v33 }
0x2dfe   :  { %v3776_v34 = vadd.f32 %v4013_v28, %v3770_v56 }
0x2e00   :  { %v3781_v41 = vpack.c.bf16 %v3776_v34, %v3775_v22 }
0x2e02   :  { %4567 = vmatmul.mubr.msk.bf16.vlgmr.msra.gmra.mrb[76].mxu1 %vm69_vm0, %v3781_v41 }
0x2ed5   :  { %v3836_v58 = vpop.f32.mrb[76].mxu1 }
0x2ed6   :  { %v3837_v53 = vadd.f32 %v4014_v57, %v3836_v58  ;;  %v4568_v54 = vpop.f32.mrb[77].mxu1 }
0x2ed7   :  { %v3839_v59 = vpop.f32.mrb[78].mxu1 }
0x2ed8   :  { %3843 = vst [vmem:[%s6070_s7] sm:$0xff] %v3837_v53  ;;  %v3840_v38 = vadd.f32 %v4014_v57, %v3839_v59  ;;  %v4569_v60 = vpop.f32.mrb[79].mxu1 }
0x2eda   :  { %3844 = vst [vmem:[%s6070_s7 + $0x8] sm:$0xff] %v3840_v38 }

</bundles_post_ra>
